<compile_context>
chip_gen: v5e
topology: v5e:2x2
jax: 0.10.0
libtpu: 0.0.40
codegen_flags: <defaults>
</compile_context>

<pallas_src>
import functools
import math

import jax
import jax.numpy as jnp
import numpy as np
from jax import lax
from jax.experimental import pallas as pl
from jax.experimental.pallas import tpu as pltpu

K = 5            # conv kernel size
PAD = 2          # conv padding
EPS = 1e-5       # GroupNorm eps (PyTorch default)


def _conv_stats_kernel(xg_hbm, wkk_ref, mask_ref,
                       y_ref, sum_ref, ssq_ref,
                       xbuf, sem,
                       *, C, H, W, TS, TSG, CHUNK, n_inner, trivial):
    """Pass 1: conv tile + streamed GroupNorm statistics.

    grid = (sample n, spatial split p, spatial tile i inside the split)

      xg_hbm  : (N, C, Sg) HBM         input, D padded by 3, spatial flattened
      wkk_ref : (25, C, 5*C) VMEM      weights per (kh,kw); kd & C_in folded
                                       into the contraction dim, resident
      mask_ref: (25, TS) f32 VMEM      0/1 H/W boundary masks, resident
      y_ref   : (1, C, TS)             conv output tile (spatial in lanes)
      sum_ref : (1, 1, C, 1)           running per-(n,p,c) sum      (resident over i)
      ssq_ref : (1, 1, C, 1)           running per-(n,p,c) sum of x^2
      xbuf    : (2, C, TSG) VMEM       double-buffered halo'd input slab
      sem     : (2,) DMA semaphores
    """
    n = pl.program_id(0)
    p = pl.program_id(1)
    i = pl.program_id(2)
    HW = H * W
    st = p * n_inner + i                                  # absolute spatial tile
    slot = i % 2

    def _start(tile_idx, s):
        s0 = pl.multiple_of(tile_idx * TS, TS)
        pltpu.make_async_copy(xg_hbm.at[n, :, pl.ds(s0, TSG)],
                              xbuf.at[s], sem.at[s]).start()

    # Prime the pipeline at the start of each (n, p) strip.
    @pl.when(i == 0)
    def _():
        _start(st, slot)

    # Prefetch the next tile of this strip before computing the current one so
    # the HBM fetch overlaps the MXU work.
    @pl.when(i + 1 < n_inner)
    def _():
        _start(st + 1, 1 - slot)

    # Wait only for the current slot.
    pltpu.make_async_copy(xg_hbm.at[n, :, pl.ds(0, TSG)],
                          xbuf.at[slot], sem.at[slot]).wait()

    # Build ONE kd-stacked slab per tile: (5*C, TS + 4W + 4).  Each (kh,kw) tap
    # is then a single lane-shifted slice of this slab + one dot_general.
    xfull = xbuf[slot]                                    # (C, TSG)
    slab_w = TS + 4 * W + 4
    xstk = jnp.concatenate(
        [xfull[:, (kd + 1) * HW - (2 * W + 2):
                  (kd + 1) * HW - (2 * W + 2) + slab_w] for kd in range(K)],
        axis=0)                                           # (5*C, TS + 4W + 4)

    w_taps = [wkk_ref[kk] for kk in range(K * K)]         # each (C, 5*C)
    masks = mask_ref[...]                                 # (25, TS) f32

    tot = jnp.zeros((C, 1), jnp.float32)
    tsq = jnp.zeros((C, 1), jnp.float32)
    n_chunks = TS // CHUNK
    for c in range(n_chunks):                             # lane chunks keep the
        c0 = c * CHUNK                                    # f32 acc in vregs
        acc = jnp.zeros((C, CHUNK), dtype=jnp.float32)
        for kk in range(K * K):                           # static unroll (kh,kw)
            kh, kw = divmod(kk, K)
            off = kh * W + kw + c0
            contrib = lax.dot_general(
                w_taps[kk], xstk[:, off:off + CHUNK],
                dimension_numbers=(((1,), (0,)), ((), ())),
                preferred_element_type=jnp.float32)       # (C, CHUNK)
            if trivial[kk]:                               # all-ones mask: skip mul
                acc = acc + contrib
            else:
                acc = acc + contrib * masks[kk:kk + 1, c0:c0 + CHUNK]
        y_ref[0, :, pl.ds(c0, CHUNK)] = acc.astype(y_ref.dtype)
        tot = tot + jnp.sum(acc, axis=1, keepdims=True)
        tsq = tsq + jnp.sum(acc * acc, axis=1, keepdims=True)

    # Streamed GroupNorm stats (f32), resident across the inner tile axis.
    @pl.when(i == 0)
    def _():
        sum_ref[...] = jnp.zeros_like(sum_ref)
        ssq_ref[...] = jnp.zeros_like(ssq_ref)

    sum_ref[0, 0] += tot
    ssq_ref[0, 0] += tsq


def _norm_prelu_kernel(y_ref, scale_ref, shift_ref, alpha_ref, o_ref):
    """Pass 2: fused GroupNorm affine (scale/shift) + PReLU, per tile."""
    # TODO(synk): for C < 8 (f32 sublane=8) pad C to 8 or flatten to (N*C, S)
    # row blocks to avoid half-empty vregs in this memory-bound pass.
    y = y_ref[0].astype(jnp.float32)                      # (C, TS)
    z = y * scale_ref[0] + shift_ref[0]
    o_ref[0] = jnp.where(z >= 0.0, z, alpha_ref[0] * z).astype(o_ref.dtype)


def _vmem_limit_bytes():
    try:
        cap = int(pltpu.get_tpu_info().vmem_capacity_bytes)
    except Exception:
        cap = 64 * 1024 * 1024          # conservative fallback (v7x per-core)
    return max(32 * 1024 * 1024, min(cap * 3 // 4, 100 * 1024 * 1024))


def _auto_tile(S, HW, C, itemsize, vmem_limit):
    """Largest spatial tile (multiple of lcm(HW,128), divisor of S) that fits."""
    base = (HW * 128) // math.gcd(HW, 128)                # lcm(HW, 128)

    def est(ts):
        tsg = ts + 6 * HW
        b = 2 * C * tsg * itemsize                        # double-buffered xbuf
        b += 5 * C * tsg * itemsize                       # kd-stacked slab (upper bound)
        b += 2 * C * ts * itemsize                        # pipelined y tile
        b += 2 * (K * K) * C * (K * C) * itemsize         # weights
        b += 2 * (K * K) * ts * 4                         # masks
        b += 2 * C * min(ts, 1024) * 4                    # f32 acc chunk (rough)
        return b

    ts = base
    while S % (ts * 2) == 0 and ts * 2 <= 32768 and est(ts * 2) * 2 <= vmem_limit:
        ts *= 2
    return ts


def _auto_chunk(TS, C):
    """Largest multiple-of-128 divisor of TS with C*chunk*4B <= ~96 KB."""
    cap = max(128, ((96 * 1024 // 4) // max(C, 1)) // 128 * 128)
    best = 128
    m = TS // 128
    for f in range(1, m + 1):
        if m % f == 0 and 128 * f <= cap:
            best = 128 * f
    return best


def conv_step_pallas(x_ncdhw, w_oidhw, gamma, beta, alpha, *,
                     tile_spatial=None, chunk_lanes=None,
                     compute_dtype=jnp.bfloat16, split_spatial=None):
    """x_ncdhw: (N, C, D, H, W); w_oidhw: (C, C, 5, 5, 5)."""
    N, C, D, H, W = x_ncdhw.shape
    S = D * H * W
    HW = H * W
    assert W * (H - 2) >= 2, "spatial plane too small for the flat-shift scheme"

    cdt = jnp.dtype(compute_dtype)
    itemsize = cdt.itemsize
    vmem_limit = _vmem_limit_bytes()

    if tile_spatial is None:
        tile_spatial = _auto_tile(S, HW, C, itemsize, vmem_limit)
    TS = tile_spatial
    # TODO(synk): generate the boundary mask in-kernel from the tile's absolute
    # offset (broadcasted_iota) to drop the TS % HW == 0 constraint for very
    # large H*W planes (where the 6*HW halo gets expensive).
    assert TS % HW == 0 and TS % 128 == 0 and S % TS == 0, (TS, HW, S)
    TSG = TS + 6 * HW                                      # tile + conv halo guard
    n_st = S // TS

    if chunk_lanes is None:
        chunk_lanes = _auto_chunk(TS, C)
    CHUNK = chunk_lanes
    assert TS % CHUNK == 0 and CHUNK % 128 == 0, (TS, CHUNK)

    if split_spatial is None:
        split_spatial = 2 if (n_st % 2 == 0 and n_st >= 2) else 1
    n_split = split_spatial
    assert n_st % n_split == 0, (n_st, n_split)
    n_inner = n_st // n_split

    # ---- glue (once): cast, pad D by 3, flatten spatial, keep (N, C, S) ----
    xg = jnp.pad(x_ncdhw.astype(cdt), ((0, 0), (0, 0), (3, 3), (0, 0), (0, 0)))
    xg = xg.reshape(N, C, (D + 6) * HW)                    # (N, C, Sg)

    # weights: (C_out, C_in, kd, kh, kw) -> (25, C_out, 5*C_in); kd folded into
    # the contraction dim, matching the kd-stacked slab row order.
    wkk = jnp.transpose(w_oidhw, (3, 4, 0, 2, 1)).reshape(K * K, C, K * C)
    wkk = wkk.astype(cdt)

    # 0/1 masks for the H/W conv boundary per (kh,kw); periodic in H*W so one
    # tile's mask is valid for every tile.  numpy so all-ones taps are skipped
    # statically in the kernel.
    j = np.arange(TS)
    hh = (j // W) % H
    ww = j % W
    rows = []
    for kh in range(K):
        for kw in range(K):
            ok = ((hh + kh - PAD >= 0) & (hh + kh - PAD < H) &
                  (ww + kw - PAD >= 0) & (ww + kw - PAD < W))
            rows.append(ok)
    mask_np = np.stack(rows).astype(np.float32)            # (25, TS)
    trivial = tuple(bool(np.all(mask_np[kk] > 0.5)) for kk in range(K * K))
    mask25 = jnp.asarray(mask_np)

    kern1 = functools.partial(
        _conv_stats_kernel, C=C, H=H, W=W, TS=TS, TSG=TSG,
        CHUNK=CHUNK, n_inner=n_inner, trivial=trivial)
    y, tot, tsq = pl.pallas_call(
        kern1,
        out_shape=(
            jax.ShapeDtypeStruct((N, C, S), cdt),                  # conv output
            jax.ShapeDtypeStruct((N, n_split, C, 1), jnp.float32),  # partial sums
            jax.ShapeDtypeStruct((N, n_split, C, 1), jnp.float32),  # partial sum sq
        ),
        grid=(N, n_split, n_inner),
        in_specs=[
            pl.BlockSpec(memory_space=pl.ANY),                     # input in HBM
            pl.BlockSpec((K * K, C, K * C), lambda n, p, i: (0, 0, 0)),
            pl.BlockSpec((K * K, TS), lambda n, p, i: (0, 0)),
        ],
        out_specs=(
            pl.BlockSpec((1, C, TS), lambda n, p, i: (n, 0, p * n_inner + i)),
            pl.BlockSpec((1, 1, C, 1), lambda n, p, i: (n, p, 0, 0)),
            pl.BlockSpec((1, 1, C, 1), lambda n, p, i: (n, p, 0, 0)),
        ),
        scratch_shapes=[
            pltpu.VMEM((2, C, TSG), cdt),                          # double buffer
            pltpu.SemaphoreType.DMA((2,)),
        ],
        compiler_params=pltpu.CompilerParams(
            dimension_semantics=("parallel", "parallel", "arbitrary"),
            vmem_limit_bytes=vmem_limit,
        ),
    )(xg, wkk, mask25)

    # ---- reduce per-split partial stats, fold GroupNorm + affine ----
    tot = jnp.sum(tot[:, :, :, 0], axis=1)                 # (N, C)
    tsq = jnp.sum(tsq[:, :, :, 0], axis=1)                 # (N, C)
    mean = tot / S
    var = tsq / S - mean * mean                            # biased variance, f32
    scale = gamma[None, :] * lax.rsqrt(var + EPS)
    shift = beta[None, :] - mean * scale
    scale3 = scale[:, :, None].astype(jnp.float32)         # (N, C, 1)
    shift3 = shift[:, :, None].astype(jnp.float32)
    alpha3 = alpha.reshape(1, C, 1).astype(jnp.float32)

    out = pl.pallas_call(
        _norm_prelu_kernel,
        out_shape=jax.ShapeDtypeStruct((N, C, S), x_ncdhw.dtype),
        grid=(N, n_st),
        in_specs=[
            pl.BlockSpec((1, C, TS), lambda n, st: (n, 0, st)),
            pl.BlockSpec((1, C, 1), lambda n, st: (n, 0, 0)),
            pl.BlockSpec((1, C, 1), lambda n, st: (n, 0, 0)),
            pl.BlockSpec((1, C, 1), lambda n, st: (0, 0, 0)),
        ],
        out_specs=pl.BlockSpec((1, C, TS), lambda n, st: (n, 0, st)),
        compiler_params=pltpu.CompilerParams(
            dimension_semantics=("parallel", "parallel"),
            vmem_limit_bytes=vmem_limit,
        ),
    )(y, scale3, shift3, alpha3)

    return out.reshape(N, C, D, H, W)


def conv_step_reference(x_ncdhw, w_oidhw, gamma, beta, alpha):
    """Pure-JAX reference matching PyTorch semantics (f32)."""
    dn = lax.conv_dimension_numbers(
        x_ncdhw.shape, w_oidhw.shape, ("NCDHW", "OIDHW", "NCDHW"))
    y = lax.conv_general_dilated(
        x_ncdhw, w_oidhw, window_strides=(1, 1, 1),
        padding=[(PAD, PAD)] * 3, dimension_numbers=dn)
    mean = jnp.mean(y, axis=(2, 3, 4), keepdims=True)
    var = jnp.mean((y - mean) ** 2, axis=(2, 3, 4), keepdims=True)
    yhat = (y - mean) / jnp.sqrt(var + EPS)
    g = gamma[None, :, None, None, None]
    b = beta[None, :, None, None, None]
    a = alpha[None, :, None, None, None]
    yhat = yhat * g + b
    return jnp.where(yhat >= 0, yhat, a * yhat)


if __name__ == "__main__":
    # Small, deterministic shapes: batch=2, channels=4, spatial=8x8x16
    N, C, D, H, W = 2, 4, 8, 8, 16

    key = jax.random.PRNGKey(0)
    k_x, k_w, k_g, k_b, k_a = jax.random.split(key, 5)

    x = jax.random.normal(k_x, (N, C, D, H, W), dtype=jnp.float32)
    w = jax.random.normal(k_w, (C, C, K, K, K), dtype=jnp.float32) * 0.05
    gamma = 1.0 + 0.1 * jax.random.normal(k_g, (C,), dtype=jnp.float32)
    beta = 0.1 * jax.random.normal(k_b, (C,), dtype=jnp.float32)
    alpha = 0.25 + 0.05 * jax.random.normal(k_a, (C,), dtype=jnp.float32)  # PReLU

    # TODO(synk): Dropout3d (training-mode channel dropout) not implemented;
    # module is exercised with dropout=False (eval-mode identity).

    ref = jax.block_until_ready(conv_step_reference(x, w, gamma, beta, alpha))

    # bf16 fast path: tile_spatial=256 -> 4 spatial tiles -> 2-way parallel split
    # with 2 tiles/strip (exercises the double-buffered prefetch and streamed
    # stats); chunk_lanes=128 -> 2 lane chunks per tile.
    out_bf16 = jax.block_until_ready(
        conv_step_pallas(x, w, gamma, beta, alpha,
                         tile_spatial=256, chunk_lanes=128,
                         compute_dtype=jnp.bfloat16))
    assert out_bf16.shape == (N, C, D, H, W)
    err_bf16 = float(jnp.max(jnp.abs(out_bf16 - ref)))
    assert jnp.allclose(out_bf16, ref, atol=3e-2, rtol=3e-2), err_bf16

    # f32 exact path: same structure, tight tolerance against the reference.
    out_f32 = jax.block_until_ready(
        conv_step_pallas(x, w, gamma, beta, alpha,
                         tile_spatial=256, chunk_lanes=128,
                         compute_dtype=jnp.float32))
    err_f32 = float(jnp.max(jnp.abs(out_f32 - ref)))
    assert jnp.allclose(out_f32, ref, atol=5e-4, rtol=5e-4), err_f32

    print("KERNEL_OK")
</pallas_src>

<mosaic_0001>
module attributes {stable_mosaic.version = 11 : i64} {
  func.func @_conv_stats_kernel(%arg0: i32, %arg1: i32, %arg2: i32, %arg3: memref<2x4x1792xbf16, #tpu.memory_space<any>>, %arg4: memref<25x4x20xbf16, #tpu.memory_space<vmem>>, %arg5: memref<25x256xf32, #tpu.memory_space<vmem>>, %arg6: memref<1x4x256xbf16, #tpu.memory_space<vmem>>, %arg7: memref<1x1x4x1xf32, #tpu.memory_space<vmem>>, %arg8: memref<1x1x4x1xf32, #tpu.memory_space<vmem>>, %arg9: memref<2x4x1024xbf16, #tpu.memory_space<vmem>>, %arg10: memref<2x!tpu.dma_semaphore, #tpu.memory_space<semaphore_mem>>) attributes {dimension_semantics = [#tpu.dimension_semantics<parallel>, #tpu.dimension_semantics<parallel>, #tpu.dimension_semantics<arbitrary>], iteration_bounds = array<i64: 2, 2, 2>, scalar_prefetch = 0 : i64, scratch_operands = 2 : i64, tpu.core_type = #tpu.core_type<tc>, window_params = [{}, {pipeline_mode = #tpu.pipeline_mode<synchronous>, transform_indices = @transform_1, window_bounds = array<i64: 25, 4, 20>}, {pipeline_mode = #tpu.pipeline_mode<synchronous>, transform_indices = @transform_2, window_bounds = array<i64: 25, 256>}, {transform_indices = @transform_3, window_bounds = array<i64: 1, 4, 256>}, {transform_indices = @transform_4, window_bounds = array<i64: 1, 1, 4, 1>}, {transform_indices = @transform_5, window_bounds = array<i64: 1, 1, 4, 1>}]} {
    %c2_i32 = arith.constant 2 : i32
    %0 = arith.muli %arg1, %c2_i32 : i32
    %1 = arith.addi %0, %arg2 : i32
    %c2_i32_0 = arith.constant 2 : i32
    %c0_i32 = arith.constant 0 : i32
    %2 = arith.cmpi eq, %c2_i32_0, %c0_i32 : i32
    %c1_i32 = arith.constant 1 : i32
    %3 = arith.select %2, %c1_i32, %c2_i32_0 : i32
    %4 = arith.remsi %arg2, %3 : i32
    %c0_i32_1 = arith.constant 0 : i32
    %5 = arith.cmpi ne, %4, %c0_i32_1 : i32
    %c0_i32_2 = arith.constant 0 : i32
    %6 = arith.cmpi slt, %4, %c0_i32_2 : i32
    %c0_i32_3 = arith.constant 0 : i32
    %7 = arith.cmpi slt, %3, %c0_i32_3 : i32
    %8 = arith.xori %6, %7 : i1
    %9 = arith.andi %8, %5 : i1
    %10 = arith.addi %4, %3 : i32
    %11 = arith.select %9, %10, %4 : i32
    %c0_i32_4 = arith.constant 0 : i32
    %12 = arith.cmpi eq, %arg2, %c0_i32_4 : i32
    %13 = arith.extui %12 : i1 to i32
    %c0_i32_5 = arith.constant 0 : i32
    %14 = arith.cmpi ne, %13, %c0_i32_5 : i32
    scf.if %14 {
      %c256_i32 = arith.constant 256 : i32
      %420 = arith.muli %1, %c256_i32 : i32
      %421 = tpu.assume_multiple %420, 256 : i32
      %c0_i32_147 = arith.constant 0 : i32
      %422 = tpu.memref_slice %arg3[%arg0, %c0_i32_147, %421] : memref<2x4x1792xbf16, #tpu.memory_space<any>> -> memref<1x4x1024xbf16, #tpu.memory_space<any>>
      %423 = tpu.memref_squeeze %422 : memref<1x4x1024xbf16, #tpu.memory_space<any>> -> memref<4x1024xbf16, #tpu.memory_space<any>>
      %c0_i32_148 = arith.constant 0 : i32
      %c0_i32_149 = arith.constant 0 : i32
      %424 = tpu.memref_slice %arg9[%11, %c0_i32_148, %c0_i32_149] : memref<2x4x1024xbf16, #tpu.memory_space<vmem>> -> memref<1x4x1024xbf16, #tpu.memory_space<vmem>>
      %425 = tpu.memref_squeeze %424 : memref<1x4x1024xbf16, #tpu.memory_space<vmem>> -> memref<4x1024xbf16, #tpu.memory_space<vmem>>
      %426 = tpu.memref_slice %arg10[%11] : memref<2x!tpu.dma_semaphore, #tpu.memory_space<semaphore_mem>> -> memref<1x!tpu.dma_semaphore, #tpu.memory_space<semaphore_mem>>
      %427 = tpu.memref_squeeze %426 : memref<1x!tpu.dma_semaphore, #tpu.memory_space<semaphore_mem>> -> memref<!tpu.dma_semaphore, #tpu.memory_space<semaphore_mem>>
      tpu.enqueue_dma source(%423 : memref<4x1024xbf16, #tpu.memory_space<any>>) target(%425 : memref<4x1024xbf16, #tpu.memory_space<vmem>>) target_semaphore(%427 : memref<!tpu.dma_semaphore, #tpu.memory_space<semaphore_mem>>)
    } else {
    }
    %c1_i32_6 = arith.constant 1 : i32
    %15 = arith.addi %arg2, %c1_i32_6 : i32
    %c2_i32_7 = arith.constant 2 : i32
    %16 = arith.cmpi slt, %15, %c2_i32_7 : i32
    %17 = arith.extui %16 : i1 to i32
    %c0_i32_8 = arith.constant 0 : i32
    %18 = arith.cmpi ne, %17, %c0_i32_8 : i32
    scf.if %18 {
      %c1_i32_147 = arith.constant 1 : i32
      %420 = arith.addi %1, %c1_i32_147 : i32
      %c1_i32_148 = arith.constant 1 : i32
      %421 = arith.subi %c1_i32_148, %11 : i32
      %c256_i32 = arith.constant 256 : i32
      %422 = arith.muli %420, %c256_i32 : i32
      %423 = tpu.assume_multiple %422, 256 : i32
      %c0_i32_149 = arith.constant 0 : i32
      %424 = tpu.memref_slice %arg3[%arg0, %c0_i32_149, %423] : memref<2x4x1792xbf16, #tpu.memory_space<any>> -> memref<1x4x1024xbf16, #tpu.memory_space<any>>
      %425 = tpu.memref_squeeze %424 : memref<1x4x1024xbf16, #tpu.memory_space<any>> -> memref<4x1024xbf16, #tpu.memory_space<any>>
      %c0_i32_150 = arith.constant 0 : i32
      %c0_i32_151 = arith.constant 0 : i32
      %426 = tpu.memref_slice %arg9[%421, %c0_i32_150, %c0_i32_151] : memref<2x4x1024xbf16, #tpu.memory_space<vmem>> -> memref<1x4x1024xbf16, #tpu.memory_space<vmem>>
      %427 = tpu.memref_squeeze %426 : memref<1x4x1024xbf16, #tpu.memory_space<vmem>> -> memref<4x1024xbf16, #tpu.memory_space<vmem>>
      %428 = tpu.memref_slice %arg10[%421] : memref<2x!tpu.dma_semaphore, #tpu.memory_space<semaphore_mem>> -> memref<1x!tpu.dma_semaphore, #tpu.memory_space<semaphore_mem>>
      %429 = tpu.memref_squeeze %428 : memref<1x!tpu.dma_semaphore, #tpu.memory_space<semaphore_mem>> -> memref<!tpu.dma_semaphore, #tpu.memory_space<semaphore_mem>>
      tpu.enqueue_dma source(%425 : memref<4x1024xbf16, #tpu.memory_space<any>>) target(%427 : memref<4x1024xbf16, #tpu.memory_space<vmem>>) target_semaphore(%429 : memref<!tpu.dma_semaphore, #tpu.memory_space<semaphore_mem>>)
    } else {
    }
    %c0_i32_9 = arith.constant 0 : i32
    %c0_i32_10 = arith.constant 0 : i32
    %19 = tpu.memref_slice %arg3[%arg0, %c0_i32_9, %c0_i32_10] : memref<2x4x1792xbf16, #tpu.memory_space<any>> -> memref<1x4x1024xbf16, #tpu.memory_space<any>>
    %20 = tpu.memref_squeeze %19 : memref<1x4x1024xbf16, #tpu.memory_space<any>> -> memref<4x1024xbf16, #tpu.memory_space<any>>
    %c0_i32_11 = arith.constant 0 : i32
    %c0_i32_12 = arith.constant 0 : i32
    %21 = tpu.memref_slice %arg9[%11, %c0_i32_11, %c0_i32_12] : memref<2x4x1024xbf16, #tpu.memory_space<vmem>> -> memref<1x4x1024xbf16, #tpu.memory_space<vmem>>
    %22 = tpu.memref_squeeze %21 : memref<1x4x1024xbf16, #tpu.memory_space<vmem>> -> memref<4x1024xbf16, #tpu.memory_space<vmem>>
    %23 = tpu.memref_slice %arg10[%11] : memref<2x!tpu.dma_semaphore, #tpu.memory_space<semaphore_mem>> -> memref<1x!tpu.dma_semaphore, #tpu.memory_space<semaphore_mem>>
    %24 = tpu.memref_squeeze %23 : memref<1x!tpu.dma_semaphore, #tpu.memory_space<semaphore_mem>> -> memref<!tpu.dma_semaphore, #tpu.memory_space<semaphore_mem>>
    tpu.wait_dma2 semaphore(%24 : memref<!tpu.dma_semaphore, #tpu.memory_space<semaphore_mem>>) src(%20 : memref<4x1024xbf16, #tpu.memory_space<any>>) dst(%22 : memref<4x1024xbf16, #tpu.memory_space<vmem>>)
    %25 = arith.index_cast %11 : i32 to index
    %c0 = arith.constant 0 : index
    %c0_13 = arith.constant 0 : index
    %26 = vector.load %arg9[%25, %c0, %c0_13] : memref<2x4x1024xbf16, #tpu.memory_space<vmem>>, vector<1x4x1024xbf16>
    %27 = vector.shape_cast %26 : vector<1x4x1024xbf16> to vector<4x1024xbf16>
    %28 = vector.extract_strided_slice %27 {offsets = [0, 94], sizes = [4, 324], strides = [1, 1]} : vector<4x1024xbf16> to vector<4x324xbf16>
    %29 = vector.extract_strided_slice %27 {offsets = [0, 222], sizes = [4, 324], strides = [1, 1]} : vector<4x1024xbf16> to vector<4x324xbf16>
    %30 = vector.extract_strided_slice %27 {offsets = [0, 350], sizes = [4, 324], strides = [1, 1]} : vector<4x1024xbf16> to vector<4x324xbf16>
    %31 = vector.extract_strided_slice %27 {offsets = [0, 478], sizes = [4, 324], strides = [1, 1]} : vector<4x1024xbf16> to vector<4x324xbf16>
    %32 = vector.extract_strided_slice %27 {offsets = [0, 606], sizes = [4, 324], strides = [1, 1]} : vector<4x1024xbf16> to vector<4x324xbf16>
    %33 = tpu.concatenate %28, %29, %30, %31, %32 in 0 : vector<4x324xbf16>, vector<4x324xbf16>, vector<4x324xbf16>, vector<4x324xbf16>, vector<4x324xbf16> -> vector<20x324xbf16>
    %c0_14 = arith.constant 0 : index
    %c0_15 = arith.constant 0 : index
    %c0_16 = arith.constant 0 : index
    %34 = vector.load %arg4[%c0_14, %c0_15, %c0_16] : memref<25x4x20xbf16, #tpu.memory_space<vmem>>, vector<1x4x20xbf16>
    %35 = vector.shape_cast %34 : vector<1x4x20xbf16> to vector<4x20xbf16>
    %c1 = arith.constant 1 : index
    %c0_17 = arith.constant 0 : index
    %c0_18 = arith.constant 0 : index
    %36 = vector.load %arg4[%c1, %c0_17, %c0_18] : memref<25x4x20xbf16, #tpu.memory_space<vmem>>, vector<1x4x20xbf16>
    %37 = vector.shape_cast %36 : vector<1x4x20xbf16> to vector<4x20xbf16>
    %c2 = arith.constant 2 : index
    %c0_19 = arith.constant 0 : index
    %c0_20 = arith.constant 0 : index
    %38 = vector.load %arg4[%c2, %c0_19, %c0_20] : memref<25x4x20xbf16, #tpu.memory_space<vmem>>, vector<1x4x20xbf16>
    %39 = vector.shape_cast %38 : vector<1x4x20xbf16> to vector<4x20xbf16>
    %c3 = arith.constant 3 : index
    %c0_21 = arith.constant 0 : index
    %c0_22 = arith.constant 0 : index
    %40 = vector.load %arg4[%c3, %c0_21, %c0_22] : memref<25x4x20xbf16, #tpu.memory_space<vmem>>, vector<1x4x20xbf16>
    %41 = vector.shape_cast %40 : vector<1x4x20xbf16> to vector<4x20xbf16>
    %c4 = arith.constant 4 : index
    %c0_23 = arith.constant 0 : index
    %c0_24 = arith.constant 0 : index
    %42 = vector.load %arg4[%c4, %c0_23, %c0_24] : memref<25x4x20xbf16, #tpu.memory_space<vmem>>, vector<1x4x20xbf16>
    %43 = vector.shape_cast %42 : vector<1x4x20xbf16> to vector<4x20xbf16>
    %c5 = arith.constant 5 : index
    %c0_25 = arith.constant 0 : index
    %c0_26 = arith.constant 0 : index
    %44 = vector.load %arg4[%c5, %c0_25, %c0_26] : memref<25x4x20xbf16, #tpu.memory_space<vmem>>, vector<1x4x20xbf16>
    %45 = vector.shape_cast %44 : vector<1x4x20xbf16> to vector<4x20xbf16>
    %c6 = arith.constant 6 : index
    %c0_27 = arith.constant 0 : index
    %c0_28 = arith.constant 0 : index
    %46 = vector.load %arg4[%c6, %c0_27, %c0_28] : memref<25x4x20xbf16, #tpu.memory_space<vmem>>, vector<1x4x20xbf16>
    %47 = vector.shape_cast %46 : vector<1x4x20xbf16> to vector<4x20xbf16>
    %c7 = arith.constant 7 : index
    %c0_29 = arith.constant 0 : index
    %c0_30 = arith.constant 0 : index
    %48 = vector.load %arg4[%c7, %c0_29, %c0_30] : memref<25x4x20xbf16, #tpu.memory_space<vmem>>, vector<1x4x20xbf16>
    %49 = vector.shape_cast %48 : vector<1x4x20xbf16> to vector<4x20xbf16>
    %c8 = arith.constant 8 : index
    %c0_31 = arith.constant 0 : index
    %c0_32 = arith.constant 0 : index
    %50 = vector.load %arg4[%c8, %c0_31, %c0_32] : memref<25x4x20xbf16, #tpu.memory_space<vmem>>, vector<1x4x20xbf16>
    %51 = vector.shape_cast %50 : vector<1x4x20xbf16> to vector<4x20xbf16>
    %c9 = arith.constant 9 : index
    %c0_33 = arith.constant 0 : index
    %c0_34 = arith.constant 0 : index
    %52 = vector.load %arg4[%c9, %c0_33, %c0_34] : memref<25x4x20xbf16, #tpu.memory_space<vmem>>, vector<1x4x20xbf16>
    %53 = vector.shape_cast %52 : vector<1x4x20xbf16> to vector<4x20xbf16>
    %c10 = arith.constant 10 : index
    %c0_35 = arith.constant 0 : index
    %c0_36 = arith.constant 0 : index
    %54 = vector.load %arg4[%c10, %c0_35, %c0_36] : memref<25x4x20xbf16, #tpu.memory_space<vmem>>, vector<1x4x20xbf16>
    %55 = vector.shape_cast %54 : vector<1x4x20xbf16> to vector<4x20xbf16>
    %c11 = arith.constant 11 : index
    %c0_37 = arith.constant 0 : index
    %c0_38 = arith.constant 0 : index
    %56 = vector.load %arg4[%c11, %c0_37, %c0_38] : memref<25x4x20xbf16, #tpu.memory_space<vmem>>, vector<1x4x20xbf16>
    %57 = vector.shape_cast %56 : vector<1x4x20xbf16> to vector<4x20xbf16>
    %c12 = arith.constant 12 : index
    %c0_39 = arith.constant 0 : index
    %c0_40 = arith.constant 0 : index
    %58 = vector.load %arg4[%c12, %c0_39, %c0_40] : memref<25x4x20xbf16, #tpu.memory_space<vmem>>, vector<1x4x20xbf16>
    %59 = vector.shape_cast %58 : vector<1x4x20xbf16> to vector<4x20xbf16>
    %c13 = arith.constant 13 : index
    %c0_41 = arith.constant 0 : index
    %c0_42 = arith.constant 0 : index
    %60 = vector.load %arg4[%c13, %c0_41, %c0_42] : memref<25x4x20xbf16, #tpu.memory_space<vmem>>, vector<1x4x20xbf16>
    %61 = vector.shape_cast %60 : vector<1x4x20xbf16> to vector<4x20xbf16>
    %c14 = arith.constant 14 : index
    %c0_43 = arith.constant 0 : index
    %c0_44 = arith.constant 0 : index
    %62 = vector.load %arg4[%c14, %c0_43, %c0_44] : memref<25x4x20xbf16, #tpu.memory_space<vmem>>, vector<1x4x20xbf16>
    %63 = vector.shape_cast %62 : vector<1x4x20xbf16> to vector<4x20xbf16>
    %c15 = arith.constant 15 : index
    %c0_45 = arith.constant 0 : index
    %c0_46 = arith.constant 0 : index
    %64 = vector.load %arg4[%c15, %c0_45, %c0_46] : memref<25x4x20xbf16, #tpu.memory_space<vmem>>, vector<1x4x20xbf16>
    %65 = vector.shape_cast %64 : vector<1x4x20xbf16> to vector<4x20xbf16>
    %c16 = arith.constant 16 : index
    %c0_47 = arith.constant 0 : index
    %c0_48 = arith.constant 0 : index
    %66 = vector.load %arg4[%c16, %c0_47, %c0_48] : memref<25x4x20xbf16, #tpu.memory_space<vmem>>, vector<1x4x20xbf16>
    %67 = vector.shape_cast %66 : vector<1x4x20xbf16> to vector<4x20xbf16>
    %c17 = arith.constant 17 : index
    %c0_49 = arith.constant 0 : index
    %c0_50 = arith.constant 0 : index
    %68 = vector.load %arg4[%c17, %c0_49, %c0_50] : memref<25x4x20xbf16, #tpu.memory_space<vmem>>, vector<1x4x20xbf16>
    %69 = vector.shape_cast %68 : vector<1x4x20xbf16> to vector<4x20xbf16>
    %c18 = arith.constant 18 : index
    %c0_51 = arith.constant 0 : index
    %c0_52 = arith.constant 0 : index
    %70 = vector.load %arg4[%c18, %c0_51, %c0_52] : memref<25x4x20xbf16, #tpu.memory_space<vmem>>, vector<1x4x20xbf16>
    %71 = vector.shape_cast %70 : vector<1x4x20xbf16> to vector<4x20xbf16>
    %c19 = arith.constant 19 : index
    %c0_53 = arith.constant 0 : index
    %c0_54 = arith.constant 0 : index
    %72 = vector.load %arg4[%c19, %c0_53, %c0_54] : memref<25x4x20xbf16, #tpu.memory_space<vmem>>, vector<1x4x20xbf16>
    %73 = vector.shape_cast %72 : vector<1x4x20xbf16> to vector<4x20xbf16>
    %c20 = arith.constant 20 : index
    %c0_55 = arith.constant 0 : index
    %c0_56 = arith.constant 0 : index
    %74 = vector.load %arg4[%c20, %c0_55, %c0_56] : memref<25x4x20xbf16, #tpu.memory_space<vmem>>, vector<1x4x20xbf16>
    %75 = vector.shape_cast %74 : vector<1x4x20xbf16> to vector<4x20xbf16>
    %c21 = arith.constant 21 : index
    %c0_57 = arith.constant 0 : index
    %c0_58 = arith.constant 0 : index
    %76 = vector.load %arg4[%c21, %c0_57, %c0_58] : memref<25x4x20xbf16, #tpu.memory_space<vmem>>, vector<1x4x20xbf16>
    %77 = vector.shape_cast %76 : vector<1x4x20xbf16> to vector<4x20xbf16>
    %c22 = arith.constant 22 : index
    %c0_59 = arith.constant 0 : index
    %c0_60 = arith.constant 0 : index
    %78 = vector.load %arg4[%c22, %c0_59, %c0_60] : memref<25x4x20xbf16, #tpu.memory_space<vmem>>, vector<1x4x20xbf16>
    %79 = vector.shape_cast %78 : vector<1x4x20xbf16> to vector<4x20xbf16>
    %c23 = arith.constant 23 : index
    %c0_61 = arith.constant 0 : index
    %c0_62 = arith.constant 0 : index
    %80 = vector.load %arg4[%c23, %c0_61, %c0_62] : memref<25x4x20xbf16, #tpu.memory_space<vmem>>, vector<1x4x20xbf16>
    %81 = vector.shape_cast %80 : vector<1x4x20xbf16> to vector<4x20xbf16>
    %c24 = arith.constant 24 : index
    %c0_63 = arith.constant 0 : index
    %c0_64 = arith.constant 0 : index
    %82 = vector.load %arg4[%c24, %c0_63, %c0_64] : memref<25x4x20xbf16, #tpu.memory_space<vmem>>, vector<1x4x20xbf16>
    %83 = vector.shape_cast %82 : vector<1x4x20xbf16> to vector<4x20xbf16>
    %c0_65 = arith.constant 0 : index
    %c0_66 = arith.constant 0 : index
    %84 = vector.load %arg5[%c0_65, %c0_66] : memref<25x256xf32, #tpu.memory_space<vmem>>, vector<25x256xf32>
    %cst = arith.constant 0.000000e+00 : f32
    %85 = vector.broadcast %cst : f32 to vector<4x1xf32>
    %cst_67 = arith.constant 0.000000e+00 : f32
    %86 = vector.broadcast %cst_67 : f32 to vector<4x1xf32>
    %cst_68 = arith.constant 0.000000e+00 : f32
    %87 = vector.broadcast %cst_68 : f32 to vector<4x128xf32>
    %88 = vector.extract_strided_slice %33 {offsets = [0, 0], sizes = [20, 128], strides = [1, 1]} : vector<20x324xbf16> to vector<20x128xbf16>
    %cst_69 = arith.constant dense<0.000000e+00> : vector<4x128xf32>
    %89 = tpu.matmul %35, %88, %cst_69 {dimension_numbers = #tpu.dot_dimension_numbers<[1], [0], [0], [1], [0, 0, 1, 1], [], []>} : vector<4x20xbf16>, vector<20x128xbf16>, vector<4x128xf32> -> vector<4x128xf32>
    %90 = vector.extract_strided_slice %84 {offsets = [0, 0], sizes = [1, 128], strides = [1, 1]} : vector<25x256xf32> to vector<1x128xf32>
    %91 = vector.broadcast %90 : vector<1x128xf32> to vector<4x128xf32>
    %92 = arith.mulf %89, %91 : vector<4x128xf32>
    %93 = arith.addf %87, %92 : vector<4x128xf32>
    %94 = vector.extract_strided_slice %33 {offsets = [0, 1], sizes = [20, 128], strides = [1, 1]} : vector<20x324xbf16> to vector<20x128xbf16>
    %cst_70 = arith.constant dense<0.000000e+00> : vector<4x128xf32>
    %95 = tpu.matmul %37, %94, %cst_70 {dimension_numbers = #tpu.dot_dimension_numbers<[1], [0], [0], [1], [0, 0, 1, 1], [], []>} : vector<4x20xbf16>, vector<20x128xbf16>, vector<4x128xf32> -> vector<4x128xf32>
    %96 = vector.extract_strided_slice %84 {offsets = [1, 0], sizes = [1, 128], strides = [1, 1]} : vector<25x256xf32> to vector<1x128xf32>
    %97 = vector.broadcast %96 : vector<1x128xf32> to vector<4x128xf32>
    %98 = arith.mulf %95, %97 : vector<4x128xf32>
    %99 = arith.addf %93, %98 : vector<4x128xf32>
    %100 = vector.extract_strided_slice %33 {offsets = [0, 2], sizes = [20, 128], strides = [1, 1]} : vector<20x324xbf16> to vector<20x128xbf16>
    %cst_71 = arith.constant dense<0.000000e+00> : vector<4x128xf32>
    %101 = tpu.matmul %39, %100, %cst_71 {dimension_numbers = #tpu.dot_dimension_numbers<[1], [0], [0], [1], [0, 0, 1, 1], [], []>} : vector<4x20xbf16>, vector<20x128xbf16>, vector<4x128xf32> -> vector<4x128xf32>
    %102 = vector.extract_strided_slice %84 {offsets = [2, 0], sizes = [1, 128], strides = [1, 1]} : vector<25x256xf32> to vector<1x128xf32>
    %103 = vector.broadcast %102 : vector<1x128xf32> to vector<4x128xf32>
    %104 = arith.mulf %101, %103 : vector<4x128xf32>
    %105 = arith.addf %99, %104 : vector<4x128xf32>
    %106 = vector.extract_strided_slice %33 {offsets = [0, 3], sizes = [20, 128], strides = [1, 1]} : vector<20x324xbf16> to vector<20x128xbf16>
    %cst_72 = arith.constant dense<0.000000e+00> : vector<4x128xf32>
    %107 = tpu.matmul %41, %106, %cst_72 {dimension_numbers = #tpu.dot_dimension_numbers<[1], [0], [0], [1], [0, 0, 1, 1], [], []>} : vector<4x20xbf16>, vector<20x128xbf16>, vector<4x128xf32> -> vector<4x128xf32>
    %108 = vector.extract_strided_slice %84 {offsets = [3, 0], sizes = [1, 128], strides = [1, 1]} : vector<25x256xf32> to vector<1x128xf32>
    %109 = vector.broadcast %108 : vector<1x128xf32> to vector<4x128xf32>
    %110 = arith.mulf %107, %109 : vector<4x128xf32>
    %111 = arith.addf %105, %110 : vector<4x128xf32>
    %112 = vector.extract_strided_slice %33 {offsets = [0, 4], sizes = [20, 128], strides = [1, 1]} : vector<20x324xbf16> to vector<20x128xbf16>
    %cst_73 = arith.constant dense<0.000000e+00> : vector<4x128xf32>
    %113 = tpu.matmul %43, %112, %cst_73 {dimension_numbers = #tpu.dot_dimension_numbers<[1], [0], [0], [1], [0, 0, 1, 1], [], []>} : vector<4x20xbf16>, vector<20x128xbf16>, vector<4x128xf32> -> vector<4x128xf32>
    %114 = vector.extract_strided_slice %84 {offsets = [4, 0], sizes = [1, 128], strides = [1, 1]} : vector<25x256xf32> to vector<1x128xf32>
    %115 = vector.broadcast %114 : vector<1x128xf32> to vector<4x128xf32>
    %116 = arith.mulf %113, %115 : vector<4x128xf32>
    %117 = arith.addf %111, %116 : vector<4x128xf32>
    %118 = vector.extract_strided_slice %33 {offsets = [0, 16], sizes = [20, 128], strides = [1, 1]} : vector<20x324xbf16> to vector<20x128xbf16>
    %cst_74 = arith.constant dense<0.000000e+00> : vector<4x128xf32>
    %119 = tpu.matmul %45, %118, %cst_74 {dimension_numbers = #tpu.dot_dimension_numbers<[1], [0], [0], [1], [0, 0, 1, 1], [], []>} : vector<4x20xbf16>, vector<20x128xbf16>, vector<4x128xf32> -> vector<4x128xf32>
    %120 = vector.extract_strided_slice %84 {offsets = [5, 0], sizes = [1, 128], strides = [1, 1]} : vector<25x256xf32> to vector<1x128xf32>
    %121 = vector.broadcast %120 : vector<1x128xf32> to vector<4x128xf32>
    %122 = arith.mulf %119, %121 : vector<4x128xf32>
    %123 = arith.addf %117, %122 : vector<4x128xf32>
    %124 = vector.extract_strided_slice %33 {offsets = [0, 17], sizes = [20, 128], strides = [1, 1]} : vector<20x324xbf16> to vector<20x128xbf16>
    %cst_75 = arith.constant dense<0.000000e+00> : vector<4x128xf32>
    %125 = tpu.matmul %47, %124, %cst_75 {dimension_numbers = #tpu.dot_dimension_numbers<[1], [0], [0], [1], [0, 0, 1, 1], [], []>} : vector<4x20xbf16>, vector<20x128xbf16>, vector<4x128xf32> -> vector<4x128xf32>
    %126 = vector.extract_strided_slice %84 {offsets = [6, 0], sizes = [1, 128], strides = [1, 1]} : vector<25x256xf32> to vector<1x128xf32>
    %127 = vector.broadcast %126 : vector<1x128xf32> to vector<4x128xf32>
    %128 = arith.mulf %125, %127 : vector<4x128xf32>
    %129 = arith.addf %123, %128 : vector<4x128xf32>
    %130 = vector.extract_strided_slice %33 {offsets = [0, 18], sizes = [20, 128], strides = [1, 1]} : vector<20x324xbf16> to vector<20x128xbf16>
    %cst_76 = arith.constant dense<0.000000e+00> : vector<4x128xf32>
    %131 = tpu.matmul %49, %130, %cst_76 {dimension_numbers = #tpu.dot_dimension_numbers<[1], [0], [0], [1], [0, 0, 1, 1], [], []>} : vector<4x20xbf16>, vector<20x128xbf16>, vector<4x128xf32> -> vector<4x128xf32>
    %132 = vector.extract_strided_slice %84 {offsets = [7, 0], sizes = [1, 128], strides = [1, 1]} : vector<25x256xf32> to vector<1x128xf32>
    %133 = vector.broadcast %132 : vector<1x128xf32> to vector<4x128xf32>
    %134 = arith.mulf %131, %133 : vector<4x128xf32>
    %135 = arith.addf %129, %134 : vector<4x128xf32>
    %136 = vector.extract_strided_slice %33 {offsets = [0, 19], sizes = [20, 128], strides = [1, 1]} : vector<20x324xbf16> to vector<20x128xbf16>
    %cst_77 = arith.constant dense<0.000000e+00> : vector<4x128xf32>
    %137 = tpu.matmul %51, %136, %cst_77 {dimension_numbers = #tpu.dot_dimension_numbers<[1], [0], [0], [1], [0, 0, 1, 1], [], []>} : vector<4x20xbf16>, vector<20x128xbf16>, vector<4x128xf32> -> vector<4x128xf32>
    %138 = vector.extract_strided_slice %84 {offsets = [8, 0], sizes = [1, 128], strides = [1, 1]} : vector<25x256xf32> to vector<1x128xf32>
    %139 = vector.broadcast %138 : vector<1x128xf32> to vector<4x128xf32>
    %140 = arith.mulf %137, %139 : vector<4x128xf32>
    %141 = arith.addf %135, %140 : vector<4x128xf32>
    %142 = vector.extract_strided_slice %33 {offsets = [0, 20], sizes = [20, 128], strides = [1, 1]} : vector<20x324xbf16> to vector<20x128xbf16>
    %cst_78 = arith.constant dense<0.000000e+00> : vector<4x128xf32>
    %143 = tpu.matmul %53, %142, %cst_78 {dimension_numbers = #tpu.dot_dimension_numbers<[1], [0], [0], [1], [0, 0, 1, 1], [], []>} : vector<4x20xbf16>, vector<20x128xbf16>, vector<4x128xf32> -> vector<4x128xf32>
    %144 = vector.extract_strided_slice %84 {offsets = [9, 0], sizes = [1, 128], strides = [1, 1]} : vector<25x256xf32> to vector<1x128xf32>
    %145 = vector.broadcast %144 : vector<1x128xf32> to vector<4x128xf32>
    %146 = arith.mulf %143, %145 : vector<4x128xf32>
    %147 = arith.addf %141, %146 : vector<4x128xf32>
    %148 = vector.extract_strided_slice %33 {offsets = [0, 32], sizes = [20, 128], strides = [1, 1]} : vector<20x324xbf16> to vector<20x128xbf16>
    %cst_79 = arith.constant dense<0.000000e+00> : vector<4x128xf32>
    %149 = tpu.matmul %55, %148, %cst_79 {dimension_numbers = #tpu.dot_dimension_numbers<[1], [0], [0], [1], [0, 0, 1, 1], [], []>} : vector<4x20xbf16>, vector<20x128xbf16>, vector<4x128xf32> -> vector<4x128xf32>
    %150 = vector.extract_strided_slice %84 {offsets = [10, 0], sizes = [1, 128], strides = [1, 1]} : vector<25x256xf32> to vector<1x128xf32>
    %151 = vector.broadcast %150 : vector<1x128xf32> to vector<4x128xf32>
    %152 = arith.mulf %149, %151 : vector<4x128xf32>
    %153 = arith.addf %147, %152 : vector<4x128xf32>
    %154 = vector.extract_strided_slice %33 {offsets = [0, 33], sizes = [20, 128], strides = [1, 1]} : vector<20x324xbf16> to vector<20x128xbf16>
    %cst_80 = arith.constant dense<0.000000e+00> : vector<4x128xf32>
    %155 = tpu.matmul %57, %154, %cst_80 {dimension_numbers = #tpu.dot_dimension_numbers<[1], [0], [0], [1], [0, 0, 1, 1], [], []>} : vector<4x20xbf16>, vector<20x128xbf16>, vector<4x128xf32> -> vector<4x128xf32>
    %156 = vector.extract_strided_slice %84 {offsets = [11, 0], sizes = [1, 128], strides = [1, 1]} : vector<25x256xf32> to vector<1x128xf32>
    %157 = vector.broadcast %156 : vector<1x128xf32> to vector<4x128xf32>
    %158 = arith.mulf %155, %157 : vector<4x128xf32>
    %159 = arith.addf %153, %158 : vector<4x128xf32>
    %160 = vector.extract_strided_slice %33 {offsets = [0, 34], sizes = [20, 128], strides = [1, 1]} : vector<20x324xbf16> to vector<20x128xbf16>
    %cst_81 = arith.constant dense<0.000000e+00> : vector<4x128xf32>
    %161 = tpu.matmul %59, %160, %cst_81 {dimension_numbers = #tpu.dot_dimension_numbers<[1], [0], [0], [1], [0, 0, 1, 1], [], []>} : vector<4x20xbf16>, vector<20x128xbf16>, vector<4x128xf32> -> vector<4x128xf32>
    %162 = arith.addf %159, %161 : vector<4x128xf32>
    %163 = vector.extract_strided_slice %33 {offsets = [0, 35], sizes = [20, 128], strides = [1, 1]} : vector<20x324xbf16> to vector<20x128xbf16>
    %cst_82 = arith.constant dense<0.000000e+00> : vector<4x128xf32>
    %164 = tpu.matmul %61, %163, %cst_82 {dimension_numbers = #tpu.dot_dimension_numbers<[1], [0], [0], [1], [0, 0, 1, 1], [], []>} : vector<4x20xbf16>, vector<20x128xbf16>, vector<4x128xf32> -> vector<4x128xf32>
    %165 = vector.extract_strided_slice %84 {offsets = [13, 0], sizes = [1, 128], strides = [1, 1]} : vector<25x256xf32> to vector<1x128xf32>
    %166 = vector.broadcast %165 : vector<1x128xf32> to vector<4x128xf32>
    %167 = arith.mulf %164, %166 : vector<4x128xf32>
    %168 = arith.addf %162, %167 : vector<4x128xf32>
    %169 = vector.extract_strided_slice %33 {offsets = [0, 36], sizes = [20, 128], strides = [1, 1]} : vector<20x324xbf16> to vector<20x128xbf16>
    %cst_83 = arith.constant dense<0.000000e+00> : vector<4x128xf32>
    %170 = tpu.matmul %63, %169, %cst_83 {dimension_numbers = #tpu.dot_dimension_numbers<[1], [0], [0], [1], [0, 0, 1, 1], [], []>} : vector<4x20xbf16>, vector<20x128xbf16>, vector<4x128xf32> -> vector<4x128xf32>
    %171 = vector.extract_strided_slice %84 {offsets = [14, 0], sizes = [1, 128], strides = [1, 1]} : vector<25x256xf32> to vector<1x128xf32>
    %172 = vector.broadcast %171 : vector<1x128xf32> to vector<4x128xf32>
    %173 = arith.mulf %170, %172 : vector<4x128xf32>
    %174 = arith.addf %168, %173 : vector<4x128xf32>
    %175 = vector.extract_strided_slice %33 {offsets = [0, 48], sizes = [20, 128], strides = [1, 1]} : vector<20x324xbf16> to vector<20x128xbf16>
    %cst_84 = arith.constant dense<0.000000e+00> : vector<4x128xf32>
    %176 = tpu.matmul %65, %175, %cst_84 {dimension_numbers = #tpu.dot_dimension_numbers<[1], [0], [0], [1], [0, 0, 1, 1], [], []>} : vector<4x20xbf16>, vector<20x128xbf16>, vector<4x128xf32> -> vector<4x128xf32>
    %177 = vector.extract_strided_slice %84 {offsets = [15, 0], sizes = [1, 128], strides = [1, 1]} : vector<25x256xf32> to vector<1x128xf32>
    %178 = vector.broadcast %177 : vector<1x128xf32> to vector<4x128xf32>
    %179 = arith.mulf %176, %178 : vector<4x128xf32>
    %180 = arith.addf %174, %179 : vector<4x128xf32>
    %181 = vector.extract_strided_slice %33 {offsets = [0, 49], sizes = [20, 128], strides = [1, 1]} : vector<20x324xbf16> to vector<20x128xbf16>
    %cst_85 = arith.constant dense<0.000000e+00> : vector<4x128xf32>
    %182 = tpu.matmul %67, %181, %cst_85 {dimension_numbers = #tpu.dot_dimension_numbers<[1], [0], [0], [1], [0, 0, 1, 1], [], []>} : vector<4x20xbf16>, vector<20x128xbf16>, vector<4x128xf32> -> vector<4x128xf32>
    %183 = vector.extract_strided_slice %84 {offsets = [16, 0], sizes = [1, 128], strides = [1, 1]} : vector<25x256xf32> to vector<1x128xf32>
    %184 = vector.broadcast %183 : vector<1x128xf32> to vector<4x128xf32>
    %185 = arith.mulf %182, %184 : vector<4x128xf32>
    %186 = arith.addf %180, %185 : vector<4x128xf32>
    %187 = vector.extract_strided_slice %33 {offsets = [0, 50], sizes = [20, 128], strides = [1, 1]} : vector<20x324xbf16> to vector<20x128xbf16>
    %cst_86 = arith.constant dense<0.000000e+00> : vector<4x128xf32>
    %188 = tpu.matmul %69, %187, %cst_86 {dimension_numbers = #tpu.dot_dimension_numbers<[1], [0], [0], [1], [0, 0, 1, 1], [], []>} : vector<4x20xbf16>, vector<20x128xbf16>, vector<4x128xf32> -> vector<4x128xf32>
    %189 = vector.extract_strided_slice %84 {offsets = [17, 0], sizes = [1, 128], strides = [1, 1]} : vector<25x256xf32> to vector<1x128xf32>
    %190 = vector.broadcast %189 : vector<1x128xf32> to vector<4x128xf32>
    %191 = arith.mulf %188, %190 : vector<4x128xf32>
    %192 = arith.addf %186, %191 : vector<4x128xf32>
    %193 = vector.extract_strided_slice %33 {offsets = [0, 51], sizes = [20, 128], strides = [1, 1]} : vector<20x324xbf16> to vector<20x128xbf16>
    %cst_87 = arith.constant dense<0.000000e+00> : vector<4x128xf32>
    %194 = tpu.matmul %71, %193, %cst_87 {dimension_numbers = #tpu.dot_dimension_numbers<[1], [0], [0], [1], [0, 0, 1, 1], [], []>} : vector<4x20xbf16>, vector<20x128xbf16>, vector<4x128xf32> -> vector<4x128xf32>
    %195 = vector.extract_strided_slice %84 {offsets = [18, 0], sizes = [1, 128], strides = [1, 1]} : vector<25x256xf32> to vector<1x128xf32>
    %196 = vector.broadcast %195 : vector<1x128xf32> to vector<4x128xf32>
    %197 = arith.mulf %194, %196 : vector<4x128xf32>
    %198 = arith.addf %192, %197 : vector<4x128xf32>
    %199 = vector.extract_strided_slice %33 {offsets = [0, 52], sizes = [20, 128], strides = [1, 1]} : vector<20x324xbf16> to vector<20x128xbf16>
    %cst_88 = arith.constant dense<0.000000e+00> : vector<4x128xf32>
    %200 = tpu.matmul %73, %199, %cst_88 {dimension_numbers = #tpu.dot_dimension_numbers<[1], [0], [0], [1], [0, 0, 1, 1], [], []>} : vector<4x20xbf16>, vector<20x128xbf16>, vector<4x128xf32> -> vector<4x128xf32>
    %201 = vector.extract_strided_slice %84 {offsets = [19, 0], sizes = [1, 128], strides = [1, 1]} : vector<25x256xf32> to vector<1x128xf32>
    %202 = vector.broadcast %201 : vector<1x128xf32> to vector<4x128xf32>
    %203 = arith.mulf %200, %202 : vector<4x128xf32>
    %204 = arith.addf %198, %203 : vector<4x128xf32>
    %205 = vector.extract_strided_slice %33 {offsets = [0, 64], sizes = [20, 128], strides = [1, 1]} : vector<20x324xbf16> to vector<20x128xbf16>
    %cst_89 = arith.constant dense<0.000000e+00> : vector<4x128xf32>
    %206 = tpu.matmul %75, %205, %cst_89 {dimension_numbers = #tpu.dot_dimension_numbers<[1], [0], [0], [1], [0, 0, 1, 1], [], []>} : vector<4x20xbf16>, vector<20x128xbf16>, vector<4x128xf32> -> vector<4x128xf32>
    %207 = vector.extract_strided_slice %84 {offsets = [20, 0], sizes = [1, 128], strides = [1, 1]} : vector<25x256xf32> to vector<1x128xf32>
    %208 = vector.broadcast %207 : vector<1x128xf32> to vector<4x128xf32>
    %209 = arith.mulf %206, %208 : vector<4x128xf32>
    %210 = arith.addf %204, %209 : vector<4x128xf32>
    %211 = vector.extract_strided_slice %33 {offsets = [0, 65], sizes = [20, 128], strides = [1, 1]} : vector<20x324xbf16> to vector<20x128xbf16>
    %cst_90 = arith.constant dense<0.000000e+00> : vector<4x128xf32>
    %212 = tpu.matmul %77, %211, %cst_90 {dimension_numbers = #tpu.dot_dimension_numbers<[1], [0], [0], [1], [0, 0, 1, 1], [], []>} : vector<4x20xbf16>, vector<20x128xbf16>, vector<4x128xf32> -> vector<4x128xf32>
    %213 = vector.extract_strided_slice %84 {offsets = [21, 0], sizes = [1, 128], strides = [1, 1]} : vector<25x256xf32> to vector<1x128xf32>
    %214 = vector.broadcast %213 : vector<1x128xf32> to vector<4x128xf32>
    %215 = arith.mulf %212, %214 : vector<4x128xf32>
    %216 = arith.addf %210, %215 : vector<4x128xf32>
    %217 = vector.extract_strided_slice %33 {offsets = [0, 66], sizes = [20, 128], strides = [1, 1]} : vector<20x324xbf16> to vector<20x128xbf16>
    %cst_91 = arith.constant dense<0.000000e+00> : vector<4x128xf32>
    %218 = tpu.matmul %79, %217, %cst_91 {dimension_numbers = #tpu.dot_dimension_numbers<[1], [0], [0], [1], [0, 0, 1, 1], [], []>} : vector<4x20xbf16>, vector<20x128xbf16>, vector<4x128xf32> -> vector<4x128xf32>
    %219 = vector.extract_strided_slice %84 {offsets = [22, 0], sizes = [1, 128], strides = [1, 1]} : vector<25x256xf32> to vector<1x128xf32>
    %220 = vector.broadcast %219 : vector<1x128xf32> to vector<4x128xf32>
    %221 = arith.mulf %218, %220 : vector<4x128xf32>
    %222 = arith.addf %216, %221 : vector<4x128xf32>
    %223 = vector.extract_strided_slice %33 {offsets = [0, 67], sizes = [20, 128], strides = [1, 1]} : vector<20x324xbf16> to vector<20x128xbf16>
    %cst_92 = arith.constant dense<0.000000e+00> : vector<4x128xf32>
    %224 = tpu.matmul %81, %223, %cst_92 {dimension_numbers = #tpu.dot_dimension_numbers<[1], [0], [0], [1], [0, 0, 1, 1], [], []>} : vector<4x20xbf16>, vector<20x128xbf16>, vector<4x128xf32> -> vector<4x128xf32>
    %225 = vector.extract_strided_slice %84 {offsets = [23, 0], sizes = [1, 128], strides = [1, 1]} : vector<25x256xf32> to vector<1x128xf32>
    %226 = vector.broadcast %225 : vector<1x128xf32> to vector<4x128xf32>
    %227 = arith.mulf %224, %226 : vector<4x128xf32>
    %228 = arith.addf %222, %227 : vector<4x128xf32>
    %229 = vector.extract_strided_slice %33 {offsets = [0, 68], sizes = [20, 128], strides = [1, 1]} : vector<20x324xbf16> to vector<20x128xbf16>
    %cst_93 = arith.constant dense<0.000000e+00> : vector<4x128xf32>
    %230 = tpu.matmul %83, %229, %cst_93 {dimension_numbers = #tpu.dot_dimension_numbers<[1], [0], [0], [1], [0, 0, 1, 1], [], []>} : vector<4x20xbf16>, vector<20x128xbf16>, vector<4x128xf32> -> vector<4x128xf32>
    %231 = vector.extract_strided_slice %84 {offsets = [24, 0], sizes = [1, 128], strides = [1, 1]} : vector<25x256xf32> to vector<1x128xf32>
    %232 = vector.broadcast %231 : vector<1x128xf32> to vector<4x128xf32>
    %233 = arith.mulf %230, %232 : vector<4x128xf32>
    %234 = arith.addf %228, %233 : vector<4x128xf32>
    %235 = arith.truncf %234 : vector<4x128xf32> to vector<4x128xbf16>
    %c0_94 = arith.constant 0 : index
    %c0_95 = arith.constant 0 : index
    %c0_96 = arith.constant 0 : index
    %236 = vector.load %arg6[%c0_94, %c0_95, %c0_96] : memref<1x4x256xbf16, #tpu.memory_space<vmem>>, vector<1x4x128xbf16>
    %237 = vector.shape_cast %236 : vector<1x4x128xbf16> to vector<4x128xbf16>
    %238 = vector.shape_cast %235 : vector<4x128xbf16> to vector<1x4x128xbf16>
    tpu.vector_store %arg6[%c0_94, %c0_95, %c0_96], %238 {strides = array<i32>} : memref<1x4x256xbf16, #tpu.memory_space<vmem>>, vector<1x4x128xbf16>,
    %cst_97 = arith.constant dense<0.000000e+00> : vector<4xf32>
    %239 = vector.multi_reduction <add>, %234, %cst_97 [1] : vector<4x128xf32> to vector<4xf32>
    %240 = vector.shape_cast %239 : vector<4xf32> to vector<4x1xf32>
    %241 = arith.addf %85, %240 : vector<4x1xf32>
    %242 = arith.mulf %234, %234 : vector<4x128xf32>
    %cst_98 = arith.constant dense<0.000000e+00> : vector<4xf32>
    %243 = vector.multi_reduction <add>, %242, %cst_98 [1] : vector<4x128xf32> to vector<4xf32>
    %244 = vector.shape_cast %243 : vector<4xf32> to vector<4x1xf32>
    %245 = arith.addf %86, %244 : vector<4x1xf32>
    %cst_99 = arith.constant 0.000000e+00 : f32
    %246 = vector.broadcast %cst_99 : f32 to vector<4x128xf32>
    %247 = vector.extract_strided_slice %33 {offsets = [0, 128], sizes = [20, 128], strides = [1, 1]} : vector<20x324xbf16> to vector<20x128xbf16>
    %cst_100 = arith.constant dense<0.000000e+00> : vector<4x128xf32>
    %248 = tpu.matmul %35, %247, %cst_100 {dimension_numbers = #tpu.dot_dimension_numbers<[1], [0], [0], [1], [0, 0, 1, 1], [], []>} : vector<4x20xbf16>, vector<20x128xbf16>, vector<4x128xf32> -> vector<4x128xf32>
    %249 = vector.extract_strided_slice %84 {offsets = [0, 128], sizes = [1, 128], strides = [1, 1]} : vector<25x256xf32> to vector<1x128xf32>
    %250 = vector.broadcast %249 : vector<1x128xf32> to vector<4x128xf32>
    %251 = arith.mulf %248, %250 : vector<4x128xf32>
    %252 = arith.addf %246, %251 : vector<4x128xf32>
    %253 = vector.extract_strided_slice %33 {offsets = [0, 129], sizes = [20, 128], strides = [1, 1]} : vector<20x324xbf16> to vector<20x128xbf16>
    %cst_101 = arith.constant dense<0.000000e+00> : vector<4x128xf32>
    %254 = tpu.matmul %37, %253, %cst_101 {dimension_numbers = #tpu.dot_dimension_numbers<[1], [0], [0], [1], [0, 0, 1, 1], [], []>} : vector<4x20xbf16>, vector<20x128xbf16>, vector<4x128xf32> -> vector<4x128xf32>
    %255 = vector.extract_strided_slice %84 {offsets = [1, 128], sizes = [1, 128], strides = [1, 1]} : vector<25x256xf32> to vector<1x128xf32>
    %256 = vector.broadcast %255 : vector<1x128xf32> to vector<4x128xf32>
    %257 = arith.mulf %254, %256 : vector<4x128xf32>
    %258 = arith.addf %252, %257 : vector<4x128xf32>
    %259 = vector.extract_strided_slice %33 {offsets = [0, 130], sizes = [20, 128], strides = [1, 1]} : vector<20x324xbf16> to vector<20x128xbf16>
    %cst_102 = arith.constant dense<0.000000e+00> : vector<4x128xf32>
    %260 = tpu.matmul %39, %259, %cst_102 {dimension_numbers = #tpu.dot_dimension_numbers<[1], [0], [0], [1], [0, 0, 1, 1], [], []>} : vector<4x20xbf16>, vector<20x128xbf16>, vector<4x128xf32> -> vector<4x128xf32>
    %261 = vector.extract_strided_slice %84 {offsets = [2, 128], sizes = [1, 128], strides = [1, 1]} : vector<25x256xf32> to vector<1x128xf32>
    %262 = vector.broadcast %261 : vector<1x128xf32> to vector<4x128xf32>
    %263 = arith.mulf %260, %262 : vector<4x128xf32>
    %264 = arith.addf %258, %263 : vector<4x128xf32>
    %265 = vector.extract_strided_slice %33 {offsets = [0, 131], sizes = [20, 128], strides = [1, 1]} : vector<20x324xbf16> to vector<20x128xbf16>
    %cst_103 = arith.constant dense<0.000000e+00> : vector<4x128xf32>
    %266 = tpu.matmul %41, %265, %cst_103 {dimension_numbers = #tpu.dot_dimension_numbers<[1], [0], [0], [1], [0, 0, 1, 1], [], []>} : vector<4x20xbf16>, vector<20x128xbf16>, vector<4x128xf32> -> vector<4x128xf32>
    %267 = vector.extract_strided_slice %84 {offsets = [3, 128], sizes = [1, 128], strides = [1, 1]} : vector<25x256xf32> to vector<1x128xf32>
    %268 = vector.broadcast %267 : vector<1x128xf32> to vector<4x128xf32>
    %269 = arith.mulf %266, %268 : vector<4x128xf32>
    %270 = arith.addf %264, %269 : vector<4x128xf32>
    %271 = vector.extract_strided_slice %33 {offsets = [0, 132], sizes = [20, 128], strides = [1, 1]} : vector<20x324xbf16> to vector<20x128xbf16>
    %cst_104 = arith.constant dense<0.000000e+00> : vector<4x128xf32>
    %272 = tpu.matmul %43, %271, %cst_104 {dimension_numbers = #tpu.dot_dimension_numbers<[1], [0], [0], [1], [0, 0, 1, 1], [], []>} : vector<4x20xbf16>, vector<20x128xbf16>, vector<4x128xf32> -> vector<4x128xf32>
    %273 = vector.extract_strided_slice %84 {offsets = [4, 128], sizes = [1, 128], strides = [1, 1]} : vector<25x256xf32> to vector<1x128xf32>
    %274 = vector.broadcast %273 : vector<1x128xf32> to vector<4x128xf32>
    %275 = arith.mulf %272, %274 : vector<4x128xf32>
    %276 = arith.addf %270, %275 : vector<4x128xf32>
    %277 = vector.extract_strided_slice %33 {offsets = [0, 144], sizes = [20, 128], strides = [1, 1]} : vector<20x324xbf16> to vector<20x128xbf16>
    %cst_105 = arith.constant dense<0.000000e+00> : vector<4x128xf32>
    %278 = tpu.matmul %45, %277, %cst_105 {dimension_numbers = #tpu.dot_dimension_numbers<[1], [0], [0], [1], [0, 0, 1, 1], [], []>} : vector<4x20xbf16>, vector<20x128xbf16>, vector<4x128xf32> -> vector<4x128xf32>
    %279 = vector.extract_strided_slice %84 {offsets = [5, 128], sizes = [1, 128], strides = [1, 1]} : vector<25x256xf32> to vector<1x128xf32>
    %280 = vector.broadcast %279 : vector<1x128xf32> to vector<4x128xf32>
    %281 = arith.mulf %278, %280 : vector<4x128xf32>
    %282 = arith.addf %276, %281 : vector<4x128xf32>
    %283 = vector.extract_strided_slice %33 {offsets = [0, 145], sizes = [20, 128], strides = [1, 1]} : vector<20x324xbf16> to vector<20x128xbf16>
    %cst_106 = arith.constant dense<0.000000e+00> : vector<4x128xf32>
    %284 = tpu.matmul %47, %283, %cst_106 {dimension_numbers = #tpu.dot_dimension_numbers<[1], [0], [0], [1], [0, 0, 1, 1], [], []>} : vector<4x20xbf16>, vector<20x128xbf16>, vector<4x128xf32> -> vector<4x128xf32>
    %285 = vector.extract_strided_slice %84 {offsets = [6, 128], sizes = [1, 128], strides = [1, 1]} : vector<25x256xf32> to vector<1x128xf32>
    %286 = vector.broadcast %285 : vector<1x128xf32> to vector<4x128xf32>
    %287 = arith.mulf %284, %286 : vector<4x128xf32>
    %288 = arith.addf %282, %287 : vector<4x128xf32>
    %289 = vector.extract_strided_slice %33 {offsets = [0, 146], sizes = [20, 128], strides = [1, 1]} : vector<20x324xbf16> to vector<20x128xbf16>
    %cst_107 = arith.constant dense<0.000000e+00> : vector<4x128xf32>
    %290 = tpu.matmul %49, %289, %cst_107 {dimension_numbers = #tpu.dot_dimension_numbers<[1], [0], [0], [1], [0, 0, 1, 1], [], []>} : vector<4x20xbf16>, vector<20x128xbf16>, vector<4x128xf32> -> vector<4x128xf32>
    %291 = vector.extract_strided_slice %84 {offsets = [7, 128], sizes = [1, 128], strides = [1, 1]} : vector<25x256xf32> to vector<1x128xf32>
    %292 = vector.broadcast %291 : vector<1x128xf32> to vector<4x128xf32>
    %293 = arith.mulf %290, %292 : vector<4x128xf32>
    %294 = arith.addf %288, %293 : vector<4x128xf32>
    %295 = vector.extract_strided_slice %33 {offsets = [0, 147], sizes = [20, 128], strides = [1, 1]} : vector<20x324xbf16> to vector<20x128xbf16>
    %cst_108 = arith.constant dense<0.000000e+00> : vector<4x128xf32>
    %296 = tpu.matmul %51, %295, %cst_108 {dimension_numbers = #tpu.dot_dimension_numbers<[1], [0], [0], [1], [0, 0, 1, 1], [], []>} : vector<4x20xbf16>, vector<20x128xbf16>, vector<4x128xf32> -> vector<4x128xf32>
    %297 = vector.extract_strided_slice %84 {offsets = [8, 128], sizes = [1, 128], strides = [1, 1]} : vector<25x256xf32> to vector<1x128xf32>
    %298 = vector.broadcast %297 : vector<1x128xf32> to vector<4x128xf32>
    %299 = arith.mulf %296, %298 : vector<4x128xf32>
    %300 = arith.addf %294, %299 : vector<4x128xf32>
    %301 = vector.extract_strided_slice %33 {offsets = [0, 148], sizes = [20, 128], strides = [1, 1]} : vector<20x324xbf16> to vector<20x128xbf16>
    %cst_109 = arith.constant dense<0.000000e+00> : vector<4x128xf32>
    %302 = tpu.matmul %53, %301, %cst_109 {dimension_numbers = #tpu.dot_dimension_numbers<[1], [0], [0], [1], [0, 0, 1, 1], [], []>} : vector<4x20xbf16>, vector<20x128xbf16>, vector<4x128xf32> -> vector<4x128xf32>
    %303 = vector.extract_strided_slice %84 {offsets = [9, 128], sizes = [1, 128], strides = [1, 1]} : vector<25x256xf32> to vector<1x128xf32>
    %304 = vector.broadcast %303 : vector<1x128xf32> to vector<4x128xf32>
    %305 = arith.mulf %302, %304 : vector<4x128xf32>
    %306 = arith.addf %300, %305 : vector<4x128xf32>
    %307 = vector.extract_strided_slice %33 {offsets = [0, 160], sizes = [20, 128], strides = [1, 1]} : vector<20x324xbf16> to vector<20x128xbf16>
    %cst_110 = arith.constant dense<0.000000e+00> : vector<4x128xf32>
    %308 = tpu.matmul %55, %307, %cst_110 {dimension_numbers = #tpu.dot_dimension_numbers<[1], [0], [0], [1], [0, 0, 1, 1], [], []>} : vector<4x20xbf16>, vector<20x128xbf16>, vector<4x128xf32> -> vector<4x128xf32>
    %309 = vector.extract_strided_slice %84 {offsets = [10, 128], sizes = [1, 128], strides = [1, 1]} : vector<25x256xf32> to vector<1x128xf32>
    %310 = vector.broadcast %309 : vector<1x128xf32> to vector<4x128xf32>
    %311 = arith.mulf %308, %310 : vector<4x128xf32>
    %312 = arith.addf %306, %311 : vector<4x128xf32>
    %313 = vector.extract_strided_slice %33 {offsets = [0, 161], sizes = [20, 128], strides = [1, 1]} : vector<20x324xbf16> to vector<20x128xbf16>
    %cst_111 = arith.constant dense<0.000000e+00> : vector<4x128xf32>
    %314 = tpu.matmul %57, %313, %cst_111 {dimension_numbers = #tpu.dot_dimension_numbers<[1], [0], [0], [1], [0, 0, 1, 1], [], []>} : vector<4x20xbf16>, vector<20x128xbf16>, vector<4x128xf32> -> vector<4x128xf32>
    %315 = vector.extract_strided_slice %84 {offsets = [11, 128], sizes = [1, 128], strides = [1, 1]} : vector<25x256xf32> to vector<1x128xf32>
    %316 = vector.broadcast %315 : vector<1x128xf32> to vector<4x128xf32>
    %317 = arith.mulf %314, %316 : vector<4x128xf32>
    %318 = arith.addf %312, %317 : vector<4x128xf32>
    %319 = vector.extract_strided_slice %33 {offsets = [0, 162], sizes = [20, 128], strides = [1, 1]} : vector<20x324xbf16> to vector<20x128xbf16>
    %cst_112 = arith.constant dense<0.000000e+00> : vector<4x128xf32>
    %320 = tpu.matmul %59, %319, %cst_112 {dimension_numbers = #tpu.dot_dimension_numbers<[1], [0], [0], [1], [0, 0, 1, 1], [], []>} : vector<4x20xbf16>, vector<20x128xbf16>, vector<4x128xf32> -> vector<4x128xf32>
    %321 = arith.addf %318, %320 : vector<4x128xf32>
    %322 = vector.extract_strided_slice %33 {offsets = [0, 163], sizes = [20, 128], strides = [1, 1]} : vector<20x324xbf16> to vector<20x128xbf16>
    %cst_113 = arith.constant dense<0.000000e+00> : vector<4x128xf32>
    %323 = tpu.matmul %61, %322, %cst_113 {dimension_numbers = #tpu.dot_dimension_numbers<[1], [0], [0], [1], [0, 0, 1, 1], [], []>} : vector<4x20xbf16>, vector<20x128xbf16>, vector<4x128xf32> -> vector<4x128xf32>
    %324 = vector.extract_strided_slice %84 {offsets = [13, 128], sizes = [1, 128], strides = [1, 1]} : vector<25x256xf32> to vector<1x128xf32>
    %325 = vector.broadcast %324 : vector<1x128xf32> to vector<4x128xf32>
    %326 = arith.mulf %323, %325 : vector<4x128xf32>
    %327 = arith.addf %321, %326 : vector<4x128xf32>
    %328 = vector.extract_strided_slice %33 {offsets = [0, 164], sizes = [20, 128], strides = [1, 1]} : vector<20x324xbf16> to vector<20x128xbf16>
    %cst_114 = arith.constant dense<0.000000e+00> : vector<4x128xf32>
    %329 = tpu.matmul %63, %328, %cst_114 {dimension_numbers = #tpu.dot_dimension_numbers<[1], [0], [0], [1], [0, 0, 1, 1], [], []>} : vector<4x20xbf16>, vector<20x128xbf16>, vector<4x128xf32> -> vector<4x128xf32>
    %330 = vector.extract_strided_slice %84 {offsets = [14, 128], sizes = [1, 128], strides = [1, 1]} : vector<25x256xf32> to vector<1x128xf32>
    %331 = vector.broadcast %330 : vector<1x128xf32> to vector<4x128xf32>
    %332 = arith.mulf %329, %331 : vector<4x128xf32>
    %333 = arith.addf %327, %332 : vector<4x128xf32>
    %334 = vector.extract_strided_slice %33 {offsets = [0, 176], sizes = [20, 128], strides = [1, 1]} : vector<20x324xbf16> to vector<20x128xbf16>
    %cst_115 = arith.constant dense<0.000000e+00> : vector<4x128xf32>
    %335 = tpu.matmul %65, %334, %cst_115 {dimension_numbers = #tpu.dot_dimension_numbers<[1], [0], [0], [1], [0, 0, 1, 1], [], []>} : vector<4x20xbf16>, vector<20x128xbf16>, vector<4x128xf32> -> vector<4x128xf32>
    %336 = vector.extract_strided_slice %84 {offsets = [15, 128], sizes = [1, 128], strides = [1, 1]} : vector<25x256xf32> to vector<1x128xf32>
    %337 = vector.broadcast %336 : vector<1x128xf32> to vector<4x128xf32>
    %338 = arith.mulf %335, %337 : vector<4x128xf32>
    %339 = arith.addf %333, %338 : vector<4x128xf32>
    %340 = vector.extract_strided_slice %33 {offsets = [0, 177], sizes = [20, 128], strides = [1, 1]} : vector<20x324xbf16> to vector<20x128xbf16>
    %cst_116 = arith.constant dense<0.000000e+00> : vector<4x128xf32>
    %341 = tpu.matmul %67, %340, %cst_116 {dimension_numbers = #tpu.dot_dimension_numbers<[1], [0], [0], [1], [0, 0, 1, 1], [], []>} : vector<4x20xbf16>, vector<20x128xbf16>, vector<4x128xf32> -> vector<4x128xf32>
    %342 = vector.extract_strided_slice %84 {offsets = [16, 128], sizes = [1, 128], strides = [1, 1]} : vector<25x256xf32> to vector<1x128xf32>
    %343 = vector.broadcast %342 : vector<1x128xf32> to vector<4x128xf32>
    %344 = arith.mulf %341, %343 : vector<4x128xf32>
    %345 = arith.addf %339, %344 : vector<4x128xf32>
    %346 = vector.extract_strided_slice %33 {offsets = [0, 178], sizes = [20, 128], strides = [1, 1]} : vector<20x324xbf16> to vector<20x128xbf16>
    %cst_117 = arith.constant dense<0.000000e+00> : vector<4x128xf32>
    %347 = tpu.matmul %69, %346, %cst_117 {dimension_numbers = #tpu.dot_dimension_numbers<[1], [0], [0], [1], [0, 0, 1, 1], [], []>} : vector<4x20xbf16>, vector<20x128xbf16>, vector<4x128xf32> -> vector<4x128xf32>
    %348 = vector.extract_strided_slice %84 {offsets = [17, 128], sizes = [1, 128], strides = [1, 1]} : vector<25x256xf32> to vector<1x128xf32>
    %349 = vector.broadcast %348 : vector<1x128xf32> to vector<4x128xf32>
    %350 = arith.mulf %347, %349 : vector<4x128xf32>
    %351 = arith.addf %345, %350 : vector<4x128xf32>
    %352 = vector.extract_strided_slice %33 {offsets = [0, 179], sizes = [20, 128], strides = [1, 1]} : vector<20x324xbf16> to vector<20x128xbf16>
    %cst_118 = arith.constant dense<0.000000e+00> : vector<4x128xf32>
    %353 = tpu.matmul %71, %352, %cst_118 {dimension_numbers = #tpu.dot_dimension_numbers<[1], [0], [0], [1], [0, 0, 1, 1], [], []>} : vector<4x20xbf16>, vector<20x128xbf16>, vector<4x128xf32> -> vector<4x128xf32>
    %354 = vector.extract_strided_slice %84 {offsets = [18, 128], sizes = [1, 128], strides = [1, 1]} : vector<25x256xf32> to vector<1x128xf32>
    %355 = vector.broadcast %354 : vector<1x128xf32> to vector<4x128xf32>
    %356 = arith.mulf %353, %355 : vector<4x128xf32>
    %357 = arith.addf %351, %356 : vector<4x128xf32>
    %358 = vector.extract_strided_slice %33 {offsets = [0, 180], sizes = [20, 128], strides = [1, 1]} : vector<20x324xbf16> to vector<20x128xbf16>
    %cst_119 = arith.constant dense<0.000000e+00> : vector<4x128xf32>
    %359 = tpu.matmul %73, %358, %cst_119 {dimension_numbers = #tpu.dot_dimension_numbers<[1], [0], [0], [1], [0, 0, 1, 1], [], []>} : vector<4x20xbf16>, vector<20x128xbf16>, vector<4x128xf32> -> vector<4x128xf32>
    %360 = vector.extract_strided_slice %84 {offsets = [19, 128], sizes = [1, 128], strides = [1, 1]} : vector<25x256xf32> to vector<1x128xf32>
    %361 = vector.broadcast %360 : vector<1x128xf32> to vector<4x128xf32>
    %362 = arith.mulf %359, %361 : vector<4x128xf32>
    %363 = arith.addf %357, %362 : vector<4x128xf32>
    %364 = vector.extract_strided_slice %33 {offsets = [0, 192], sizes = [20, 128], strides = [1, 1]} : vector<20x324xbf16> to vector<20x128xbf16>
    %cst_120 = arith.constant dense<0.000000e+00> : vector<4x128xf32>
    %365 = tpu.matmul %75, %364, %cst_120 {dimension_numbers = #tpu.dot_dimension_numbers<[1], [0], [0], [1], [0, 0, 1, 1], [], []>} : vector<4x20xbf16>, vector<20x128xbf16>, vector<4x128xf32> -> vector<4x128xf32>
    %366 = vector.extract_strided_slice %84 {offsets = [20, 128], sizes = [1, 128], strides = [1, 1]} : vector<25x256xf32> to vector<1x128xf32>
    %367 = vector.broadcast %366 : vector<1x128xf32> to vector<4x128xf32>
    %368 = arith.mulf %365, %367 : vector<4x128xf32>
    %369 = arith.addf %363, %368 : vector<4x128xf32>
    %370 = vector.extract_strided_slice %33 {offsets = [0, 193], sizes = [20, 128], strides = [1, 1]} : vector<20x324xbf16> to vector<20x128xbf16>
    %cst_121 = arith.constant dense<0.000000e+00> : vector<4x128xf32>
    %371 = tpu.matmul %77, %370, %cst_121 {dimension_numbers = #tpu.dot_dimension_numbers<[1], [0], [0], [1], [0, 0, 1, 1], [], []>} : vector<4x20xbf16>, vector<20x128xbf16>, vector<4x128xf32> -> vector<4x128xf32>
    %372 = vector.extract_strided_slice %84 {offsets = [21, 128], sizes = [1, 128], strides = [1, 1]} : vector<25x256xf32> to vector<1x128xf32>
    %373 = vector.broadcast %372 : vector<1x128xf32> to vector<4x128xf32>
    %374 = arith.mulf %371, %373 : vector<4x128xf32>
    %375 = arith.addf %369, %374 : vector<4x128xf32>
    %376 = vector.extract_strided_slice %33 {offsets = [0, 194], sizes = [20, 128], strides = [1, 1]} : vector<20x324xbf16> to vector<20x128xbf16>
    %cst_122 = arith.constant dense<0.000000e+00> : vector<4x128xf32>
    %377 = tpu.matmul %79, %376, %cst_122 {dimension_numbers = #tpu.dot_dimension_numbers<[1], [0], [0], [1], [0, 0, 1, 1], [], []>} : vector<4x20xbf16>, vector<20x128xbf16>, vector<4x128xf32> -> vector<4x128xf32>
    %378 = vector.extract_strided_slice %84 {offsets = [22, 128], sizes = [1, 128], strides = [1, 1]} : vector<25x256xf32> to vector<1x128xf32>
    %379 = vector.broadcast %378 : vector<1x128xf32> to vector<4x128xf32>
    %380 = arith.mulf %377, %379 : vector<4x128xf32>
    %381 = arith.addf %375, %380 : vector<4x128xf32>
    %382 = vector.extract_strided_slice %33 {offsets = [0, 195], sizes = [20, 128], strides = [1, 1]} : vector<20x324xbf16> to vector<20x128xbf16>
    %cst_123 = arith.constant dense<0.000000e+00> : vector<4x128xf32>
    %383 = tpu.matmul %81, %382, %cst_123 {dimension_numbers = #tpu.dot_dimension_numbers<[1], [0], [0], [1], [0, 0, 1, 1], [], []>} : vector<4x20xbf16>, vector<20x128xbf16>, vector<4x128xf32> -> vector<4x128xf32>
    %384 = vector.extract_strided_slice %84 {offsets = [23, 128], sizes = [1, 128], strides = [1, 1]} : vector<25x256xf32> to vector<1x128xf32>
    %385 = vector.broadcast %384 : vector<1x128xf32> to vector<4x128xf32>
    %386 = arith.mulf %383, %385 : vector<4x128xf32>
    %387 = arith.addf %381, %386 : vector<4x128xf32>
    %388 = vector.extract_strided_slice %33 {offsets = [0, 196], sizes = [20, 128], strides = [1, 1]} : vector<20x324xbf16> to vector<20x128xbf16>
    %cst_124 = arith.constant dense<0.000000e+00> : vector<4x128xf32>
    %389 = tpu.matmul %83, %388, %cst_124 {dimension_numbers = #tpu.dot_dimension_numbers<[1], [0], [0], [1], [0, 0, 1, 1], [], []>} : vector<4x20xbf16>, vector<20x128xbf16>, vector<4x128xf32> -> vector<4x128xf32>
    %390 = vector.extract_strided_slice %84 {offsets = [24, 128], sizes = [1, 128], strides = [1, 1]} : vector<25x256xf32> to vector<1x128xf32>
    %391 = vector.broadcast %390 : vector<1x128xf32> to vector<4x128xf32>
    %392 = arith.mulf %389, %391 : vector<4x128xf32>
    %393 = arith.addf %387, %392 : vector<4x128xf32>
    %394 = arith.truncf %393 : vector<4x128xf32> to vector<4x128xbf16>
    %c0_125 = arith.constant 0 : index
    %c0_126 = arith.constant 0 : index
    %c128 = arith.constant 128 : index
    %395 = vector.load %arg6[%c0_125, %c0_126, %c128] : memref<1x4x256xbf16, #tpu.memory_space<vmem>>, vector<1x4x128xbf16>
    %396 = vector.shape_cast %395 : vector<1x4x128xbf16> to vector<4x128xbf16>
    %397 = vector.shape_cast %394 : vector<4x128xbf16> to vector<1x4x128xbf16>
    tpu.vector_store %arg6[%c0_125, %c0_126, %c128], %397 {strides = array<i32>} : memref<1x4x256xbf16, #tpu.memory_space<vmem>>, vector<1x4x128xbf16>,
    %cst_127 = arith.constant dense<0.000000e+00> : vector<4xf32>
    %398 = vector.multi_reduction <add>, %393, %cst_127 [1] : vector<4x128xf32> to vector<4xf32>
    %399 = vector.shape_cast %398 : vector<4xf32> to vector<4x1xf32>
    %400 = arith.addf %241, %399 : vector<4x1xf32>
    %401 = arith.mulf %393, %393 : vector<4x128xf32>
    %cst_128 = arith.constant dense<0.000000e+00> : vector<4xf32>
    %402 = vector.multi_reduction <add>, %401, %cst_128 [1] : vector<4x128xf32> to vector<4xf32>
    %403 = vector.shape_cast %402 : vector<4xf32> to vector<4x1xf32>
    %404 = arith.addf %245, %403 : vector<4x1xf32>
    %c0_i32_129 = arith.constant 0 : i32
    %405 = arith.cmpi eq, %arg2, %c0_i32_129 : i32
    %406 = arith.extui %405 : i1 to i32
    %c0_i32_130 = arith.constant 0 : i32
    %407 = arith.cmpi ne, %406, %c0_i32_130 : i32
    scf.if %407 {
      %cst_147 = arith.constant 0.000000e+00 : f32
      %420 = vector.broadcast %cst_147 : f32 to vector<1x1x4x1xf32>
      %c0_148 = arith.constant 0 : index
      %c0_149 = arith.constant 0 : index
      %c0_150 = arith.constant 0 : index
      %c0_151 = arith.constant 0 : index
      %421 = vector.load %arg7[%c0_148, %c0_149, %c0_150, %c0_151] : memref<1x1x4x1xf32, #tpu.memory_space<vmem>>, vector<1x1x4x1xf32>
      tpu.vector_store %arg7[%c0_148, %c0_149, %c0_150, %c0_151], %420 {strides = array<i32>} : memref<1x1x4x1xf32, #tpu.memory_space<vmem>>, vector<1x1x4x1xf32>,
      %cst_152 = arith.constant 0.000000e+00 : f32
      %422 = vector.broadcast %cst_152 : f32 to vector<1x1x4x1xf32>
      %c0_153 = arith.constant 0 : index
      %c0_154 = arith.constant 0 : index
      %c0_155 = arith.constant 0 : index
      %c0_156 = arith.constant 0 : index
      %423 = vector.load %arg8[%c0_153, %c0_154, %c0_155, %c0_156] : memref<1x1x4x1xf32, #tpu.memory_space<vmem>>, vector<1x1x4x1xf32>
      tpu.vector_store %arg8[%c0_153, %c0_154, %c0_155, %c0_156], %422 {strides = array<i32>} : memref<1x1x4x1xf32, #tpu.memory_space<vmem>>, vector<1x1x4x1xf32>,
    } else {
    }
    %c0_131 = arith.constant 0 : index
    %c0_132 = arith.constant 0 : index
    %c0_133 = arith.constant 0 : index
    %c0_134 = arith.constant 0 : index
    %408 = vector.load %arg7[%c0_131, %c0_132, %c0_133, %c0_134] : memref<1x1x4x1xf32, #tpu.memory_space<vmem>>, vector<1x1x4x1xf32>
    %409 = vector.shape_cast %408 : vector<1x1x4x1xf32> to vector<4x1xf32>
    %410 = arith.addf %409, %400 : vector<4x1xf32>
    %c0_135 = arith.constant 0 : index
    %c0_136 = arith.constant 0 : index
    %c0_137 = arith.constant 0 : index
    %c0_138 = arith.constant 0 : index
    %411 = vector.load %arg7[%c0_135, %c0_136, %c0_137, %c0_138] : memref<1x1x4x1xf32, #tpu.memory_space<vmem>>, vector<1x1x4x1xf32>
    %412 = vector.shape_cast %411 : vector<1x1x4x1xf32> to vector<4x1xf32>
    %413 = vector.shape_cast %410 : vector<4x1xf32> to vector<1x1x4x1xf32>
    tpu.vector_store %arg7[%c0_135, %c0_136, %c0_137, %c0_138], %413 {strides = array<i32>} : memref<1x1x4x1xf32, #tpu.memory_space<vmem>>, vector<1x1x4x1xf32>,
    %c0_139 = arith.constant 0 : index
    %c0_140 = arith.constant 0 : index
    %c0_141 = arith.constant 0 : index
    %c0_142 = arith.constant 0 : index
    %414 = vector.load %arg8[%c0_139, %c0_140, %c0_141, %c0_142] : memref<1x1x4x1xf32, #tpu.memory_space<vmem>>, vector<1x1x4x1xf32>
    %415 = vector.shape_cast %414 : vector<1x1x4x1xf32> to vector<4x1xf32>
    %416 = arith.addf %415, %404 : vector<4x1xf32>
    %c0_143 = arith.constant 0 : index
    %c0_144 = arith.constant 0 : index
    %c0_145 = arith.constant 0 : index
    %c0_146 = arith.constant 0 : index
    %417 = vector.load %arg8[%c0_143, %c0_144, %c0_145, %c0_146] : memref<1x1x4x1xf32, #tpu.memory_space<vmem>>, vector<1x1x4x1xf32>
    %418 = vector.shape_cast %417 : vector<1x1x4x1xf32> to vector<4x1xf32>
    %419 = vector.shape_cast %416 : vector<4x1xf32> to vector<1x1x4x1xf32>
    tpu.vector_store %arg8[%c0_143, %c0_144, %c0_145, %c0_146], %419 {strides = array<i32>} : memref<1x1x4x1xf32, #tpu.memory_space<vmem>>, vector<1x1x4x1xf32>,
    return
  }
  func.func @transform_1(%arg0: i32, %arg1: i32, %arg2: i32) -> (i32, i32, i32) {
    %c0_i32 = arith.constant 0 : i32
    %c0_i32_0 = arith.constant 0 : i32
    %c0_i32_1 = arith.constant 0 : i32
    %c0_i32_2 = arith.constant 0 : i32
    return %c0_i32, %c0_i32_0, %c0_i32_1 : i32, i32, i32
  }
  func.func @transform_2(%arg0: i32, %arg1: i32, %arg2: i32) -> (i32, i32) {
    %c0_i32 = arith.constant 0 : i32
    %c0_i32_0 = arith.constant 0 : i32
    %c0_i32_1 = arith.constant 0 : i32
    return %c0_i32, %c0_i32_0 : i32, i32
  }
  func.func @transform_3(%arg0: i32, %arg1: i32, %arg2: i32) -> (i32, i32, i32) {
    %c2_i32 = arith.constant 2 : i32
    %0 = arith.muli %arg1, %c2_i32 : i32
    %1 = arith.addi %0, %arg2 : i32
    %c0_i32 = arith.constant 0 : i32
    %c0_i32_0 = arith.constant 0 : i32
    return %arg0, %c0_i32, %1 : i32, i32, i32
  }
  func.func @transform_4(%arg0: i32, %arg1: i32, %arg2: i32) -> (i32, i32, i32, i32) {
    %c0_i32 = arith.constant 0 : i32
    %c0_i32_0 = arith.constant 0 : i32
    %c0_i32_1 = arith.constant 0 : i32
    return %arg0, %arg1, %c0_i32, %c0_i32_0 : i32, i32, i32, i32
  }
  func.func @transform_5(%arg0: i32, %arg1: i32, %arg2: i32) -> (i32, i32, i32, i32) {
    %c0_i32 = arith.constant 0 : i32
    %c0_i32_0 = arith.constant 0 : i32
    %c0_i32_1 = arith.constant 0 : i32
    return %arg0, %arg1, %c0_i32, %c0_i32_0 : i32, i32, i32, i32
  }
}

</mosaic_0001>

<bundles_post_ra>
// kernel: tpu_custom_call.1
= control target key start
LH: loop header
LB: loop body
LE: loop exit
PB: predicated region body
PF: predicated region fallthrough
CT: control target
= control target key end

     0   :  { %s3870_s0 = inlined_call_operand.hbm [shape: bf16[2,4,1792], index: 0, kind: input, shape index: {}]   ;;  %s3871_s1 = inlined_call_operand.vmem [shape: bf16[25,4,20], index: 1, kind: input, shape index: {}]   ;;  %s3872_s2 = inlined_call_operand.vmem [shape: f32[25,256], index: 2, kind: input, shape index: {}]   ;;  %s3873_s3 = inlined_call_operand.hbm [shape: bf16[2,4,1024], index: 3, kind: output, shape index: {0}]   ;;  %s3874_s4 = inlined_call_operand.vmem [shape: f32[2,2,4,1], index: 4, kind: output, shape index: {1}]   ;;  %s3875_s5 = inlined_call_operand.vmem [shape: f32[2,2,4,1], index: 5, kind: output, shape index: {2}]  }
   0x1   :  { %3945 = sst [smem:[#allocation55_spill]] %s3873_s3 }
   0x2   :  { %3946 = sst [smem:[#allocation56_spill]] %s3874_s4 }
   0x3   :  { %3947 = sst [smem:[#allocation57_spill]] %s3875_s5 }
   0x4   :  { %11 = vsyncpa [#allocation5], 0 }
   0x5   :  { %13 = vsyncpa [#allocation5 + $0x1], 0  ;;  %s2636_s18 = smov 0   ;;  %s2638_s19 = smov 0  }
   0x6   :  { %s2640_s20 = smov 0   ;;  %s2642_s21 = smov 0  }
   0x7   :  { %s2644_s22 = smov 0   ;;  %s2646_s23 = smov 0  }
   0x8   :  { %s2648_s24 = smov 0   ;;  %s2650_s25 = smov 0  }
   0x9   :  { %s2652_s26 = smov 0   ;;  %s2654_s27 = smov 0  }
   0xa LB: > { %3948 = sst [smem:[#allocation14_spill]] %s2542_s18  ;;  %s2173_s28 = sadd.s32 4294967295, %s2578_s27   ;;  %s2578_s27 = sphi %s2654_s27, %s19_s27   ;;  %s2574_s26 = sphi %s2652_s26, %s4072_s26   ;;  %s2570_s25 = sphi %s2650_s25, %s4071_s25   ;;  %s2566_s24 = sphi %s2648_s24, %s4070_s24   ;;  %s2562_s23 = sphi %s2646_s23, %s4069_s23   ;;  %s2558_s22 = sphi %s2644_s22, %s4068_s22   ;;  %s2554_s21 = sphi %s2642_s21, %s4067_s21   ;;  %s2550_s20 = sphi %s2640_s20, %s4066_s20   ;;  %s2546_s19 = sphi %s2638_s19, %s4074_s19   ;;  %s2542_s18 = sphi %s2636_s18, %s4073_s18  }
   0xb   : > { %3949 = sst [smem:[#allocation15_spill]] %s2550_s20  ;;  %s2174_s29 = sadd.s32 4294967294, %s2578_s27  }
   0xc   : > { %3950 = sst [smem:[#allocation16_spill]] %s2566_s24  ;;  %s31_s30 = sadd.s32 1, %s2566_s24 }
   0xd   : > { %3951 = sst [smem:[#allocation17_spill]] %s2570_s25  ;;  %p32_p0 = scmp.ge.s32.totalorder %s31_s30, 2 }
   0xe   : > { %3952 = sst [smem:[#allocation18_spill]] %s2574_s26  ;;  %s34_s6 = sadd.s32 1, %s2570_s25 }
   0xf   : > { %3953 = sst [smem:[#allocation19_spill]] %s2578_s27  ;;  %s38_s7 = sadd.s32 1, %s2574_s26 }
  0x10   : > { %s2175_s8 = sshll.u32 %s2570_s25, 1  ;;  %s4076_s30 = smov (%p32_p0, %s31_s30), 0 }
  0x11   : > { %3954 = sst [smem:[#allocation20_spill]] %s4076_s30  ;;  %s4078_s6 = smov (!%p32_p0, %s34_s6), %s2570_s25 }
  0x12   : > { %s85_s9 = sadd.s32 %s2566_s24, %s2175_s8  ;;  %p103_p1 = scmp.ne.s32.totalorder %s2550_s20, %s2546_s19 }
  0x13   : > { %p36_p2 = scmp.ge.s32.totalorder %s4078_s6, 2  ;;  %p104_p3 = scmp.eq.s32.totalorder %s2173_s28, 7 }
  0x14   : > { %p109_p4 = scmp.ne.s32.totalorder %s2546_s19, %s2542_s18  ;;  %p110_p5 = scmp.eq.s32.totalorder %s2174_s29, 7 }
  0x15   : > { %s4080_s6 = smov (%p36_p2, %s4078_s6), 0  ;;  %s4082_s7 = smov (!%p36_p2, %s38_s7), %s2574_s26 }
  0x16   : > { %3955 = sst [smem:[#allocation21_spill]] %s4080_s6  ;;  %s2176_s10 = sshll.u32 %s4080_s6, 1 }
  0x17   : > { %p2704_p6 = por %p104_p3, %p103_p1  ;;  %p40_p7 = scmp.ge.s32.totalorder %s4082_s7, 2 }
  0x18   : > { %s87_s12 = sadd.s32 %s2176_s10, %s4076_s30  ;;  %p2709_p8 = por %p110_p5, %p109_p4 }
  0x19   : > { %s3956_s11 = scalar_select %p2704_p6, 1, 0 }
  0x1a   : > { %s89_s13 = ssub.s32 %s85_s9, %s87_s12  ;;  %s4084_s7 = smov (%p40_p7, %s4082_s7), 0 }
  0x1b   : > { %3957 = sst [smem:[#allocation22_spill]] %s3956_s11  ;;  %p2178_p9 = scmp.ge.s32.totalorder %s2578_s27, 1 }
  0x1c   : > { %s3958_s14 = scalar_select %p2709_p8, 1, 0 }
  0x1d   : > { %3960 = sst [smem:[#allocation24_spill]] %s4084_s7  ;;  %p190_p10 = scmp.lt.s32.totalorder %s2578_s27, 9 }
  0x1e   : > { %3959 = sst [smem:[#allocation23_spill]] %s3958_s14  ;;  %s88_s15 = ssub.s32 %s2574_s26, %s4084_s7 }
  0x1f   : > { %s93_s16 = sadd.s32 1, %s2550_s20  ;;  %s90_s17 = sor.u32 %s89_s13, %s88_s15 }
  0x20   : > { %p191_p11 = pnand %p2178_p9, %p190_p10  ;;  %p91_p12 = scmp.eq.s32.totalorder %s90_s17, 0 }
  0x22   : > { %s2721_s28 = scalar_select %p91_p12, %s2550_s20, %s93_s16  }
  0x23   : > { %194 = sbr.rel (%p191_p11) target bundleno = 926 (0x39e), region = 28 }
  0x24   : > { %3961 = sst [smem:[#allocation25_spill]] %s2721_s28 }
  0x28   : > { %s3878_s29 = sand.u32 1, %s2546_s19   ;;  %p230_p13 = scmp.lt.s32.totalorder %s2562_s23, 1 }
  0x29   : > { %s2727_s8 = sshll.u32 %s3878_s29, 2  ;;  %p232_p0 = scmp.lt.s32.totalorder %s2558_s22, 1 }
  0x2a   : > { %s2184_s9 = sshll.u32 %s2558_s22, 1  ;;  %p249_p1 = scmp.lt.s32.totalorder %s2554_s21, 0 }
  0x2b   : > { %s231_s10 = scalar_select %p230_p13, %s2562_s23, 1 }
  0x2c   : > { %s4086_s22 = smov (!%p232_p0, %s2558_s22), 1  ;;  %s2734_s13 = sadd.s32 %s2554_s21, %s2184_s9 }
  0x2d   : > { %s2180_s12 = sshll.u32 %s231_s10, 1  ;;  %s250_s17 = ssub.s32 0, %s2554_s21 }
  0x2e   : > { %s235_s15 = sadd.s32 %s2180_s12, %s4086_s22  ;;  %s3962_s4 = sld [smem:[#allocation56_spill]] }
  0x2f   : > { %s2181_s16 = sshll.u32 %s235_s15, 2  ;;  %s3963_s5 = sld [smem:[#allocation57_spill]] }
  0x30   : > { %s2185_s10 = smin.u32 %s2554_s21, %s250_s17  ;;  %p2299_p3 = scmp.eq.s32.totalorder %s2554_s21, 0 }
  0x31   : > { %s252_s9 = sand.u32 1, %s2185_s10   ;;  %s2189_s12 = sshll.u32 %s2734_s13, 8 }
  0x32   : > { %s253_s22 = ssub.s32 0, %s252_s9  ;;  %s266_s15 = sshra.s32 %s2189_s12, 7 }
  0x33   : > { %s4088_s22 = smov (!%p249_p1, %s253_s22), %s252_s9  ;;  %s3884_s24 = smul.u32 14, %s2562_s23 }
  0x34   : > { %s2741_s29 = scalar_lea.vmem %s3962_s4, %s2181_s16  ;;  %p2187_p4 = scmp.lt.s32.totalorder %s4088_s22, 0 }
  0x35   : > { %s2746_s25 = scalar_lea.vmem %s3963_s5, %s2181_s16  ;;  %s259_s28 = sadd.s32 2, %s4088_s22 }
  0x36   : > { %s269_s6 = sadd.s32 %s3884_s24, %s266_s15  ;;  %s2755_s7 = sadd.s32 256, %s2189_s12 }
  0x37   : > { %s4090_s28 = smov (!%p2187_p4, %s259_s28), %s4088_s22  ;;  %s2190_s26 = sshll.u32 %s269_s6, 1 }
  0x38   : > { %s271_s10 = scalar_lea.hbm %s3870_s0, %s2190_s26  ;;  %s2284_s9 = sshll.u32 %s4090_s28, 4 }
  0x39   : > { %s283_s4 = sshll.u32 %s271_s10, 4  ;;  %s2764_s5 = scalar_lea.vmem [#allocation2], %s2284_s9  ;;  %s2767_s4 = int_to_ptr.hbm [resolvable:$true] %s283_s4 }
  0x3a   : > { %s285_s20 = sshll.u32 %s2764_s5, 4  ;;  %s2770_s22 = scalar_lea.sflag [#allocation3], %s4090_s28  ;;  %s286_s20 = int_to_ptr.vmem [resolvable:$true] %s285_s20 }
  0x3b   : > { %s2410_s12 = sshra.s32 %s2767_s4, 4  ;;  %s3886_s16 = scalar_lea.hbm %s3870_s0, 56  ;;  %s2411_s12 = int_to_ptr.hbm [resolvable:$true] %s2410_s12 }
  0x3c   : > { %s2412_s15 = scalar_lea.hbm %s2411_s12, 16  ;;  %p2417_p10 = scmp.lt.s32.totalorder %s2411_s12, %s3870_s0 }
  0x3d   : > { %p2413_p5 = scmp.ne.s32.totalorder %s2411_s12, %s2412_s15  ;;  %p2418_p11 = scmp.lt.s32.totalorder %s3886_s16, %s2412_s15 }
  0x3f   : > { %p2414_p7 = pnand %p2413_p5, %p2299_p3  ;;  %p2419_p12 = por %p2418_p11, %p2417_p10 }
  0x41   : > { %p2415_p9 = pneg %p2414_p7 }
  0x43   : > { %p2420_p13 = pnand %p2419_p12, %p2415_p9 }
  0x45   : > { %2423 = shalt.err (!%p2420_p13)  }
  0x46   : > { %s2424_s30 = sshra.s32 %s286_s20, 4  ;;  %s2580_s6 = smov [#allocation2]   ;;  %s2425_s30 = int_to_ptr.vmem [resolvable:$true] %s2424_s30 }
  0x47   : > { %s2426_s14 = scalar_lea.vmem %s2425_s30, 16  ;;  %s2787_s26 = scalar_lea.vmem %s2580_s6, 32 }
  0x48   : > { %p2427_p0 = scmp.ne.s32.totalorder %s2425_s30, %s2426_s14  ;;  %p2431_p5 = scmp.lt.s32.totalorder %s2425_s30, [#allocation2] }
  0x49   : > { %p2432_p7 = scmp.lt.s32.totalorder %s2787_s26, %s2426_s14 }
  0x4a   : > { %p2428_p1 = pnand %p2427_p0, %p2299_p3 }
  0x4b   : > { %p2433_p2 = por %p2432_p7, %p2431_p5 }
  0x4c   : > { %p2429_p4 = pneg %p2428_p1 }
  0x4e   : > { %p2434_p8 = pnand %p2433_p2, %p2429_p4 }
  0x50   : > { %2437 = shalt.err (!%p2434_p8)  }
  0x51   : > { %2290 = dma.hbm_to_vmem [thread:$0]  (%p2299_p3), %s2767_s4, 256, %s286_s20, %s2770_s22 }
  0x52   : > { %s3964_s24 = sadd.s32 1, %s2554_s21  ;;  %s295_s15 = ssub.s32 1, %s4090_s28 }
  0x53   : > { %p2796_p9 = scmp.lt.s32.totalorder %s3964_s24, 2  ;;  %s297_s14 = sshra.s32 %s2755_s7, 7 }
  0x54   : > { %s3966_s30 = smul.u32 14, %s2562_s23  ;;  %s2287_s10 = sshll.u32 %s295_s15, 4 }
  0x55   : > { %s305_s3 = scalar_lea.vmem [#allocation2], %s2287_s10  ;;  %s306_s4 = scalar_lea.sflag [#allocation3], %s295_s15 }
  0x56   : > { %s300_s17 = sadd.s32 %s297_s14, %s3966_s30  ;;  %s316_s11 = sshll.u32 %s305_s3, 4  ;;  %s317_s11 = int_to_ptr.vmem [resolvable:$true] %s316_s11 }
  0x57   : > { %s2195_s9 = sshll.u32 %s300_s17, 1 }
  0x58   : > { %s302_s18 = scalar_lea.hbm %s3870_s0, %s2195_s9 }
  0x59   : > { %s314_s27 = sshll.u32 %s302_s18, 4  ;;  %s3967_s18 = scalar_lea.hbm %s3870_s0, 56  ;;  %s315_s27 = int_to_ptr.hbm [resolvable:$true] %s314_s27 }
  0x5a   : > { %s2438_s20 = sshra.s32 %s315_s27, 4  ;;  %s2439_s20 = int_to_ptr.hbm [resolvable:$true] %s2438_s20 }
  0x5b   : > { %s2440_s24 = scalar_lea.hbm %s2439_s20, 16  ;;  %p2445_p10 = scmp.lt.s32.totalorder %s2439_s20, %s3870_s0 }
  0x5c   : > { %p2441_p8 = scmp.ne.s32.totalorder %s2439_s20, %s2440_s24  ;;  %p2446_p11 = scmp.lt.s32.totalorder %s3967_s18, %s2440_s24 }
  0x5e   : > { %p2442_p2 = pnand %p2441_p8, %p2796_p9  ;;  %p2447_p12 = por %p2446_p11, %p2445_p10 }
  0x60   : > { %p2443_p3 = pneg %p2442_p2 }
  0x62   : > { %p2448_p13 = pnand %p2447_p12, %p2443_p3 }
  0x64   : > { %2451 = shalt.err (!%p2448_p13)  }
  0x65   : > { %s2452_s3 = sshra.s32 %s317_s11, 4  ;;  %s2453_s3 = int_to_ptr.vmem [resolvable:$true] %s2452_s3 }
  0x66   : > { %s2454_s15 = scalar_lea.vmem %s2453_s3, 16  ;;  %p2459_p5 = scmp.lt.s32.totalorder %s2453_s3, [#allocation2] }
  0x67   : > { %p2455_p0 = scmp.ne.s32.totalorder %s2453_s3, %s2454_s15  ;;  %p2460_p7 = scmp.lt.s32.totalorder %s2787_s26, %s2454_s15 }
  0x69   : > { %p2456_p1 = pnand %p2455_p0, %p2796_p9  ;;  %p2461_p8 = por %p2460_p7, %p2459_p5 }
  0x6b   : > { %p2457_p4 = pneg %p2456_p1 }
  0x6d   : > { %p2462_p2 = pnand %p2461_p8, %p2457_p4 }
  0x6f   : > { %2465 = shalt.err (!%p2462_p2)  }
  0x70   : > { %2292 = dma.hbm_to_vmem [thread:$0]  (%p2796_p9), %s315_s27, 256, %s317_s11, %s306_s4 }
  0x71   : > { %s2822_s30 = scalar_lea.vmem [#allocation4], %s2727_s8 }
  0x72   : > { %2534 = dma.done.wait %s2770_s22, 256 }
  0x73   : > { %2535 = vsyncadd %s2770_s22, 4294967040  ;;  %v328_v0 = vld [vmem:[%s2764_s5] sm:$0xff]  ;;  %v329_v1 = vld [vmem:[%s2764_s5 + $0x8] sm:$0xff]  ;;  %vm370_vm0 = vcmask 1041408   ;;  %vm3922_vm1 = vcmask 1043456   ;;  %vm380_vm2 = vcmask 1045504  }
  0x74   : > { %331 = vst [vmem:[#allocation1] ss:$4 sm:$0xff] %v328_v0  ;;  %s2581_s5 = smov 31   ;;  %s2582_s27 = smov 33   ;;  %vm454_vm3 = vcmask 277504   ;;  %vm489_vm4 = vcmask 269312  }
  0x75   : > { %340 = vst [vmem:[#allocation1 + $0x21] ss:$4 sm:$0xff] %v329_v1  ;;  %s2583_s11 = smov 34   ;;  %s2584_s8 = smov 30   ;;  %vm523_vm5 = vcmask 261120   ;;  %vm557_vm6 = vcmask 252928  }
  0x76   : > { %s2585_s22 = smov 32   ;;  %s2586_s26 = smov 18   ;;  %vm591_vm7 = vcmask 244736   ;;  %vm625_vm8 = vcmask 146432   ;;  %vm458_vm9 = vcmask 162816   ;;  %vm693_vm10 = vcmask 130048  }
  0x77   : > { %s2587_s12 = smov 17   ;;  %s2588_s17 = smov 16   ;;  %vm659_vm11 = vcmask 138240   ;;  %vm761_vm12 = vcmask 113664   ;;  %vm3905_vm13 = vcmask 121856   ;;  %vm3911_vm14 = vcmask 15360  }
  0x78   : > { %s2589_s10 = smov 15   ;;  %s2590_s9 = smov 14   ;;  %vm3906_vm15 = vcmask 7168  }
  0x79   : > { %s2591_s6 = smov 2   ;;  %s2592_s4 = smov 1  }
  0x7a   : > { %s2593_s20 = smov 126   ;;  %s2594_s24 = smov 127  }
  0x7b   : > { %v332_v2 = vld.sshfl [vmem:[#allocation1] sm:$0xff pattern:$0x73625140]  ;;  %v333_v3 = vld.sshfl [vmem:[#allocation1 + $0x8] sm:$0xff pattern:$0x73625140] }
  0x7c   : > { %v2828_v4 = vld.sshfl [vmem:[#allocation1 + $0x10] sm:$0xff pattern:$0x73625140]  ;;  %v2830_v5 = vld.sshfl [vmem:[#allocation1 + $0x18] sm:$0xff pattern:$0x73625140] }
  0x7d   : > { %337 = vst [vmem:[#allocation1 + $0x1] ss:$4 sm:$0xff] %v328_v0  ;;  %v2832_v6 = vld.sshfl [vmem:[#allocation1 + $0x20] sm:$0xff pattern:$0x73625140]  ;;  %s3893_s28 = smov 114  }
  0x7e   : > { %348 = vst [vmem:[#allocation1 + $0x22] ss:$4 sm:$0xff] %v329_v1  ;;  %s3901_s7 = smov 112   ;;  %s3903_s14 = smov 113  }
  0x7f   : > { %s3897_s3 = smov 111   ;;  %s3895_s16 = smov 110  }
  0x80   : > { %s3899_s18 = smov 98   ;;  %s2601_s15 = smov 97  }
  0x81   : > { %p4056_p9 = scmp.ne.s32.totalorder %s2554_s21, 0 }
  0x84   : > { %v341_v7 = vld.sshfl [vmem:[#allocation1 + $0x8] sm:$0xff pattern:$0x73625140]  ;;  %v342_v8 = vld.sshfl [vmem:[#allocation1 + $0x10] sm:$0xff pattern:$0x73625140] }
  0x85   : > { %v2834_v9 = vld.sshfl [vmem:[#allocation1 + $0x18] sm:$0xff pattern:$0x73625140]  ;;  %v2836_v10 = vld.sshfl [vmem:[#allocation1 + $0x20] sm:$0xff pattern:$0x73625140]  ;;  %v372_v12 = vsel %vm370_vm0, %v333_v3, %v342_v8  ;;  %v371_v18 = vsel %vm370_vm0, %v332_v2, %v341_v7 }
  0x86   : > { %346 = vst [vmem:[#allocation1 + $0x2] ss:$4 sm:$0xff] %v328_v0  ;;  %v2838_v11 = vld.sshfl [vmem:[#allocation1 + $0x28] sm:$0xff pattern:$0x73625140]  ;;  %v373_v34 = vsel %vm370_vm0, %v2828_v4, %v2834_v9 }
  0x87   : > { %356 = vst [vmem:[#allocation1 + $0x23] ss:$4 sm:$0xff] %v329_v1  ;;  %v378_v38 = vsel %vm3922_vm1, %v373_v34, %v2836_v10 }
  0x8d   : > { %v350_v13 = vld.sshfl [vmem:[#allocation1 + $0x18] sm:$0xff pattern:$0x73625140]  ;;  %v349_v14 = vld.sshfl [vmem:[#allocation1 + $0x10] sm:$0xff pattern:$0x73625140] }
  0x8e   : > { %v358_v15 = vld.sshfl [vmem:[#allocation1 + $0x20] sm:$0xff pattern:$0x73625140]  ;;  %v377_v16 = vsel %vm3922_vm1, %v372_v12, %v350_v13  ;;  %354 = vst [vmem:[#allocation1 + $0x3] ss:$4 sm:$0xff] %v328_v0  ;;  %v376_v19 = vsel %vm3922_vm1, %v371_v18, %v349_v14 }
  0x8f   : > { %v2843_v17 = vsel %vm380_vm2, %v377_v16, %v358_v15  ;;  %v359_v37 = vld.sshfl [vmem:[#allocation1 + $0x28] sm:$0xff pattern:$0x73625140]  ;;  %v3035_v12 = vld [vmem:[%s3871_s1] sm:$0x3] }
  0x90   : > { %551 = vrot.lane.b32.xlu1 %v2843_v17, %s2581_s5  ;;  %483 = vrot.lane.b32.xlu2 %v2843_v17, %s2582_s27  ;;  %v2954_v40 = vsel %vm380_vm2, %v378_v38, %v359_v37  ;;  %v3049_v14 = vld [vmem:[%s3871_s1 + $0x2] sm:$0x3] }
  0x91   : > { %448 = vrot.lane.b32.xlu0 %v2843_v17, %s2583_s11 }
  0x95   : > { %v357_v20 = vld.sshfl [vmem:[#allocation1 + $0x18] sm:$0xff pattern:$0x73625140] }
  0x96   : > { %v381_v21 = vsel %vm380_vm2, %v376_v19, %v357_v20  ;;  %361 = vst [vmem:[#allocation1] ss:$4 sm:$0xff] %v329_v1 }
  0x98   : > { %585 = vrot.lane.b32.xlu2 %v2843_v17, %s2584_s8  ;;  %583 = vrot.lane.b32.xlu1 %v381_v21, %s2584_s8 }
  0x99   : > { %517 = vrot.lane.b32.xlu0 %v2843_v17, %s2585_s22 }
  0x9d   : > { %v362_v22 = vld.sshfl [vmem:[#allocation1] sm:$0xff pattern:$0x73625140]  ;;  %v2862_v23 = vld.sshfl [vmem:[#allocation1 + $0x8] sm:$0xff pattern:$0x73625140] }
  0x9e   : > { %v2938_v33 = vld.sshfl [vmem:[#allocation1 + $0x10] sm:$0xff pattern:$0x73625140] }
  0xa0   : > { %481 = vrot.lane.b32.xlu2 %v381_v21, %s2582_s27  ;;  %450 = vrot.lane.b32.xlu1 %v362_v22, %s2583_s11 }
  0xa1   : > { %446 = vrot.lane.b32.xlu0 %v381_v21, %s2583_s11 }
  0xa8   : > { %515 = vrot.lane.b32.xlu2 %v381_v21, %s2585_s22  ;;  %452 = vrot.lane.b32.xlu1 %v2862_v23, %s2583_s11 }
  0xa9   : > { %549 = vrot.lane.b32.xlu0 %v381_v21, %s2581_s5 }
  0xb0   : > { %617 = vrot.lane.b32.xlu2 %v381_v21, %s2586_s26  ;;  %487 = vrot.lane.b32.xlu1 %v2862_v23, %s2582_s27 }
  0xb1   : > { %485 = vrot.lane.b32.xlu0 %v362_v22, %s2582_s27 }
  0xb8   : > { %521 = vrot.lane.b32.xlu2 %v2862_v23, %s2585_s22  ;;  %519 = vrot.lane.b32.xlu1 %v362_v22, %s2585_s22 }
  0xb9   : > { %555 = vrot.lane.b32.xlu0 %v2862_v23, %s2581_s5 }
  0xc0   : > { %553 = vrot.lane.b32.xlu2 %v362_v22, %s2581_s5  ;;  %589 = vrot.lane.b32.xlu1 %v2862_v23, %s2584_s8 }
  0xc1   : > { %587 = vrot.lane.b32.xlu0 %v362_v22, %s2584_s8 }
  0xc8   : > { %623 = vrot.lane.b32.xlu2 %v2862_v23, %s2586_s26  ;;  %621 = vrot.lane.b32.xlu1 %v362_v22, %s2586_s26 }
  0xc9   : > { %619 = vrot.lane.b32.xlu0 %v2843_v17, %s2586_s26 }
  0xd0   : > { %655 = vrot.lane.b32.xlu2 %v362_v22, %s2587_s12  ;;  %653 = vrot.lane.b32.xlu1 %v2843_v17, %s2587_s12 }
  0xd1   : > { %651 = vrot.lane.b32.xlu0 %v381_v21, %s2587_s12 }
  0xd8   : > { %691 = vrot.lane.b32.xlu2 %v2862_v23, %s2588_s17  ;;  %689 = vrot.lane.b32.xlu1 %v362_v22, %s2588_s17 }
  0xd9   : > { %657 = vrot.lane.b32.xlu0 %v2862_v23, %s2587_s12 }
  0xe0   : > { %723 = vrot.lane.b32.xlu2 %v362_v22, %s2589_s10  ;;  %687 = vrot.lane.b32.xlu1 %v2843_v17, %s2588_s17 }
  0xe1   : > { %685 = vrot.lane.b32.xlu0 %v381_v21, %s2588_s17 }
  0xe8   : > { %759 = vrot.lane.b32.xlu2 %v2862_v23, %s2590_s9  ;;  %757 = vrot.lane.b32.xlu1 %v362_v22, %s2590_s9 }
  0xe9   : > { %725 = vrot.lane.b32.xlu0 %v2862_v23, %s2589_s10 }
  0xea   : > { %v2904_v24 = vpop.permute.xlu2 %483 }
  0xf0   : > { %791 = vrot.lane.b32.xlu2 %v362_v22, %s2591_s6  ;;  %721 = vrot.lane.b32.xlu1 %v2843_v17, %s2589_s10 }
  0xf1   : > { %719 = vrot.lane.b32.xlu0 %v381_v21, %s2589_s10 }
  0xf2   : > { %v2910_v25 = vpop.permute.xlu2 %585 }
  0xf8   : > { %755 = vrot.lane.b32.xlu2 %v2843_v17, %s2590_s9  ;;  %753 = vrot.lane.b32.xlu1 %v381_v21, %s2590_s9 }
  0xf9   : > { %793 = vrot.lane.b32.xlu0 %v2862_v23, %s2591_s6 }
  0xfa   : > { %v482_v26 = vpop.permute.xlu2 %481 }
  0xfb   : > { %v490_v52 = vsel %vm489_vm4, %v482_v26, %v2904_v24 }
 0x100   : > { %787 = vrot.lane.b32.xlu2 %v381_v21, %s2591_s6  ;;  %827 = vrot.lane.b32.xlu1 %v2862_v23, %s2592_s4 }
 0x101   : > { %825 = vrot.lane.b32.xlu0 %v362_v22, %s2592_s4 }
 0x102   : > { %v2921_v27 = vpop.permute.xlu1 %551  ;;  %v2923_v28 = vpop.permute.xlu2 %515 }
 0x103   : > { %v2925_v29 = vpop.permute.xlu0 %448 }
 0x108   : > { %823 = vrot.lane.b32.xlu2 %v2843_v17, %s2592_s4  ;;  %821 = vrot.lane.b32.xlu1 %v381_v21, %s2592_s4 }
 0x109   : > { %789 = vrot.lane.b32.xlu0 %v2843_v17, %s2591_s6 }
 0x10a   : > { %v2932_v30 = vpop.permute.xlu1 %583  ;;  %v2934_v31 = vpop.permute.xlu2 %617 }
 0x10b   : > { %v2936_v32 = vpop.permute.xlu0 %517  ;;  %v592_v3 = vsel %vm591_vm7, %v2932_v30, %v2910_v25 }
 0x10c   : > { %v524_v60 = vsel %vm523_vm5, %v2923_v28, %v2936_v32 }
 0x110   : > { %913 = vrot.lane.b32.xlu2 %v2862_v23, %s2593_s20  ;;  %881 = vrot.lane.b32.xlu1 %v2938_v33, %s2594_s24 }
 0x111   : > { %879 = vrot.lane.b32.xlu0 %v2862_v23, %s2594_s24 }
 0x112   : > { %v2949_v35 = vpop.permute.xlu2 %521  ;;  %v451_v36 = vpop.permute.xlu1 %450 }
 0x113   : > { %v447_v39 = vpop.permute.xlu0 %446 }
 0x114   : > { %v455_v46 = vsel %vm454_vm3, %v447_v39, %v2925_v29 }
 0x118   : > { %877 = vrot.lane.b32.xlu2 %v2954_v40, %s2594_s24  ;;  %875 = vrot.lane.b32.xlu1 %v2843_v17, %s2594_s24 }
 0x119   : > { %915 = vrot.lane.b32.xlu0 %v2938_v33, %s2593_s20 }
 0x11a   : > { %v554_v41 = vpop.permute.xlu2 %553  ;;  %v2962_v42 = vpop.permute.xlu1 %452 }
 0x11b   : > { %v550_v43 = vpop.permute.xlu0 %549  ;;  %v456_v44 = vsel %vm454_vm3, %v451_v36, %v2962_v42 }
 0x11c   : > { %v463_v45 = vsel %vm370_vm0, %v456_v44, 0  ;;  %v558_v61 = vsel %vm557_vm6, %v550_v43, %v2921_v27 }
 0x11d   : > { %471 = vmatpush.bf16.msra.mxu0 %v463_v45 }
 0x120   : > { %909 = vrot.lane.b32.xlu2 %v2843_v17, %s2593_s20  ;;  %949 = vrot.lane.b32.xlu1 %v2938_v33, %s3893_s28 }
 0x121   : > { %947 = vrot.lane.b32.xlu0 %v2862_v23, %s3893_s28  ;;  %472 = vmatpush.bf16.msra.mxu0 %v455_v46 }
 0x122   : > { %v2975_v47 = vpop.permute.xlu2 %623  ;;  %v2977_v48 = vpop.permute.xlu1 %487 }
 0x123   : > { %v486_v49 = vpop.permute.xlu0 %485 }
 0x124   : > { %v491_v50 = vsel %vm489_vm4, %v486_v49, %v2977_v48  ;;  %2224 = vmatmul.msk.bf16.vlgmr.msra.gmra.mxu0 %vm458_vm9, %v3035_v12 }
 0x125   : > { %v497_v51 = vsel %vm370_vm0, %v491_v50, 0 }
 0x126   : > { %505 = vmatpush.bf16.msra.mxu1 %v497_v51 }
 0x128   : > { %945 = vrot.lane.b32.xlu2 %v2954_v40, %s3893_s28  ;;  %943 = vrot.lane.b32.xlu1 %v2843_v17, %s3893_s28 }
 0x129   : > { %911 = vrot.lane.b32.xlu0 %v2954_v40, %s2593_s20 }
 0x12a   : > { %506 = vmatpush.bf16.msra.mxu1 %v490_v52  ;;  %v2990_v53 = vpop.permute.xlu2 %655  ;;  %v520_v54 = vpop.permute.xlu1 %519 }
 0x12b   : > { %v2992_v55 = vpop.permute.xlu0 %555  ;;  %v525_v56 = vsel %vm523_vm5, %v520_v54, %v2949_v35 }
 0x12c   : > { %v531_v57 = vsel %vm370_vm0, %v525_v56, 0  ;;  %v559_v58 = vsel %vm557_vm6, %v554_v41, %v2992_v55  ;;  %v3098_v41 = vld [vmem:[%s3871_s1 + $0x6] sm:$0x3] }
 0x12d   : > { %539 = vmatpush.bf16.msra.mxu2 %v531_v57  ;;  %v565_v59 = vsel %vm370_vm0, %v559_v58, 0  ;;  %2225 = vmatmul.msk.bf16.vlgmr.msra.gmra.mxu1 %vm458_vm9, %v3049_v14  ;;  %v3131_v57 = vld [vmem:[%s3871_s1 + $0xa] sm:$0x3] }
 0x12e   : > { %573 = vmatpush.bf16.msra.mxu3 %v565_v59 }
 0x130   : > { %1015 = vrot.lane.b32.xlu2 %v2862_v23, %s3901_s7  ;;  %983 = vrot.lane.b32.xlu1 %v2938_v33, %s3903_s14 }
 0x131   : > { %981 = vrot.lane.b32.xlu0 %v2862_v23, %s3903_s14  ;;  %540 = vmatpush.bf16.msra.mxu2 %v524_v60 }
 0x132   : > { %574 = vmatpush.bf16.msra.mxu3 %v558_v61  ;;  %v3011_v62 = vpop.permute.xlu2 %691  ;;  %v3013_v63 = vpop.permute.xlu1 %589 }
 0x133   : > { %v588_v0 = vpop.permute.xlu0 %587 }
 0x134   : > { %v593_v1 = vsel %vm591_vm7, %v588_v0, %v3013_v63 }
 0x135   : > { %v599_v2 = vsel %vm370_vm0, %v593_v1, 0  ;;  %2227 = vmatmul.msk.bf16.vlgmr.msra.gmra.mxu3 %vm458_vm9, %v3098_v41 }
 0x136   : > { %607 = vmatpush.bf16.msrb.mxu0 %v599_v2  ;;  %v3151_v2 = vld [vmem:[%s3871_s1 + $0xc] sm:$0x3] }
 0x138   : > { %979 = vrot.lane.b32.xlu2 %v2954_v40, %s3903_s14  ;;  %977 = vrot.lane.b32.xlu1 %v2843_v17, %s3903_s14  ;;  %s3989_s14 = smov 114  }
 0x139   : > { %1017 = vrot.lane.b32.xlu0 %v2938_v33, %s3901_s7 }
 0x13a   : > { %608 = vmatpush.bf16.msrb.mxu0 %v592_v3  ;;  %v724_v4 = vpop.permute.xlu2 %723  ;;  %v622_v7 = vpop.permute.xlu1 %621 }
 0x13b   : > { %v3027_v8 = vpop.permute.xlu0 %619  ;;  %v627_v9 = vsel %vm625_vm8, %v622_v7, %v2975_v47 }
 0x13c   : > { %v633_v10 = vsel %vm370_vm0, %v627_v9, 0  ;;  %v626_v13 = vsel %vm625_vm8, %v2934_v31, %v3027_v8  ;;  %v3077_v31 = vld [vmem:[%s3871_s1 + $0x4] sm:$0x3] }
 0x13d   : > { %641 = vmatpush.bf16.msrb.mxu1 %v633_v10  ;;  %2226 = vmatmul.msk.bf16.vlgmr.msra.gmra.mxu2 %vm458_vm9, %v3077_v31 }
 0x140   : > { %1011 = vrot.lane.b32.xlu2 %v2843_v17, %s3901_s7  ;;  %1051 = vrot.lane.b32.xlu1 %v2938_v33, %s3897_s3 }
 0x141   : > { %1049 = vrot.lane.b32.xlu0 %v2862_v23, %s3897_s3  ;;  %642 = vmatpush.bf16.msrb.mxu1 %v626_v13  ;;  %v3171_v13 = vld [vmem:[%s3871_s1 + $0x8] sm:$0x3] }
 0x142   : > { %v3053_v15 = vpop.permute.xlu2 %759  ;;  %v3055_v16 = vpop.permute.xlu1 %653  ;;  %2228 = vmatmul.msk.bf16.vlgmr.msrb.gmra.mxu0 %vm458_vm9, %v3171_v13 }
 0x143   : > { %v652_v18 = vpop.permute.xlu0 %651 }
 0x144   : > { %v660_v34 = vsel %vm659_vm11, %v652_v18, %v3055_v16  ;;  %2229 = vmatmul.msk.bf16.vlgmr.msrb.gmra.mxu1 %vm458_vm9, %v3131_v57  ;;  %v3176_v18 = vld [vmem:[%s3871_s1 + $0xe] sm:$0x3] }
 0x148   : > { %1085 = vrot.lane.b32.xlu2 %v2938_v33, %s3895_s16  ;;  %1083 = vrot.lane.b32.xlu1 %v2862_v23, %s3895_s16 }
 0x149   : > { %1013 = vrot.lane.b32.xlu0 %v2954_v40, %s3901_s7  ;;  %s2604_s7 = smov 94  }
 0x14a   : > { %v792_v19 = vpop.permute.xlu2 %791  ;;  %v690_v20 = vpop.permute.xlu1 %689 }
 0x14b   : > { %v3065_v21 = vpop.permute.xlu0 %657  ;;  %v695_v22 = vsel %vm693_vm10, %v690_v20, %v3011_v62 }
 0x14c   : > { %v661_v26 = vsel %vm659_vm11, %v2990_v53, %v3065_v21  ;;  %v701_v28 = vsel %vm370_vm0, %v695_v22, 0 }
 0x14d   : > { %v667_v30 = vsel %vm370_vm0, %v661_v26, 0  ;;  %709 = vmatpush.bf16.msrb.mxu3 %v701_v28 }
 0x14e   : > { %675 = vmatpush.bf16.msrb.mxu2 %v667_v30  ;;  %v858_v30 = vsel %vm370_vm0, %v2862_v23, 0 }
 0x150   : > { %1079 = vrot.lane.b32.xlu2 %v2843_v17, %s3895_s16  ;;  %1047 = vrot.lane.b32.xlu1 %v2954_v40, %s3897_s3 }
 0x151   : > { %1045 = vrot.lane.b32.xlu0 %v2843_v17, %s3897_s3  ;;  %s2602_s3 = smov 96  }
 0x152   : > { %676 = vmatpush.bf16.msrb.mxu2 %v660_v34  ;;  %v3089_v36 = vpop.permute.xlu2 %755  ;;  %v3091_v37 = vpop.permute.xlu1 %687 }
 0x153   : > { %v686_v38 = vpop.permute.xlu0 %685 }
 0x154   : > { %v694_v39 = vsel %vm693_vm10, %v686_v38, %v3091_v37 }
 0x155   : > { %710 = vmatpush.bf16.msrb.mxu3 %v694_v39  ;;  %2230 = vmatmul.msk.bf16.vlgmr.msrb.gmra.mxu2 %vm458_vm9, %v3151_v2 }
 0x158   : > { %1119 = vrot.lane.b32.xlu2 %v2938_v33, %s3899_s18  ;;  %1117 = vrot.lane.b32.xlu1 %v2862_v23, %s3899_s18 }
 0x159   : > { %1081 = vrot.lane.b32.xlu0 %v2954_v40, %s3895_s16  ;;  %2231 = vmatmul.msk.bf16.vlgmr.msrb.gmra.mxu3 %vm458_vm9, %v3176_v18 }
 0x15a   : > { %v788_v43 = vpop.permute.xlu2 %787  ;;  %v758_v44 = vpop.permute.xlu1 %757 }
 0x15b   : > { %v3108_v45 = vpop.permute.xlu0 %725  ;;  %v763_v46 = vsel %vm761_vm12, %v758_v44, %v3053_v15 }
 0x15c   : > { %v729_v49 = vsel %vm3905_vm13, %v724_v4, %v3108_v45  ;;  %v769_v50 = vsel %vm370_vm0, %v763_v46, 0 }
 0x15d   : > { %v735_v51 = vsel %vm370_vm0, %v729_v49, 0  ;;  %777 = vmatpush.bf16.msra.mxu1 %v769_v50 }
 0x15e   : > { %743 = vmatpush.bf16.msra.mxu0 %v735_v51 }
 0x160   : > { %1113 = vrot.lane.b32.xlu2 %v2843_v17, %s3899_s18  ;;  %1153 = vrot.lane.b32.xlu1 %v2938_v33, %s2601_s15 }
 0x161   : > { %1151 = vrot.lane.b32.xlu0 %v2862_v23, %s2601_s15 }
 0x162   : > { %v3122_v52 = vpop.permute.xlu2 %823  ;;  %v3124_v53 = vpop.permute.xlu1 %721 }
 0x163   : > { %v720_v54 = vpop.permute.xlu0 %719 }
 0x164   : > { %v728_v56 = vsel %vm3905_vm13, %v720_v54, %v3124_v53  ;;  %vm3907_vm13 = vcmask 1039360  }
 0x165   : > { %744 = vmatpush.bf16.msra.mxu0 %v728_v56  ;;  %v3233_v56 = vld [vmem:[%s3871_s1 + $0x12] sm:$0x3] }
 0x168   : > { %1187 = vrot.lane.b32.xlu2 %v2938_v33, %s2602_s3  ;;  %1185 = vrot.lane.b32.xlu1 %v2862_v23, %s2602_s3 }
 0x169   : > { %1115 = vrot.lane.b32.xlu0 %v2954_v40, %s3899_s18  ;;  %s2603_s18 = smov 95   ;;  %866 = vmatpush.bf16.msrb.mxu0 %v858_v30  ;;  %v3276_v30 = vld [vmem:[%s3871_s1 + $0x16] sm:$0x3] }
 0x16a   : > { %v914_v58 = vpop.permute.xlu2 %913  ;;  %v754_v59 = vpop.permute.xlu1 %753 }
 0x16b   : > { %v3141_v60 = vpop.permute.xlu0 %793  ;;  %v762_v61 = vsel %vm761_vm12, %v754_v59, %v3089_v36 }
 0x16c   : > { %v797_v0 = vsel %vm3911_vm14, %v792_v19, %v3141_v60  ;;  %778 = vmatpush.bf16.msra.mxu1 %v762_v61 }
 0x16d   : > { %v803_v1 = vsel %vm370_vm0, %v797_v0, 0  ;;  %867 = vmatpush.bf16.msrb.mxu0 %v2843_v17 }
 0x16e   : > { %811 = vmatpush.bf16.msra.mxu2 %v803_v1 }
 0x16f   : > { %2233 = vmatmul.msk.bf16.vlgmr.msra.gmra.mxu1 %vm458_vm9, %v3233_v56 }
 0x170   : > { %1219 = vrot.lane.b32.xlu2 %v2862_v23, %s2603_s18  ;;  %1149 = vrot.lane.b32.xlu1 %v2954_v40, %s2601_s15 }
 0x171   : > { %1147 = vrot.lane.b32.xlu0 %v2843_v17, %s2601_s15 }
 0x172   : > { %v3161_v3 = vpop.permute.xlu2 %877  ;;  %v3163_v4 = vpop.permute.xlu1 %827 }
 0x173   : > { %v826_v7 = vpop.permute.xlu0 %825 }
 0x174   : > { %v831_v9 = vsel %vm3906_vm15, %v826_v7, %v3163_v4  ;;  %v3253_v7 = vld [vmem:[%s3871_s1 + $0x14] sm:$0x3] }
 0x175   : > { %v837_v10 = vsel %vm370_vm0, %v831_v9, 0 }
 0x176   : > { %845 = vmatpush.bf16.msra.mxu3 %v837_v10 }
 0x178   : > { %1183 = vrot.lane.b32.xlu2 %v2954_v40, %s2602_s3  ;;  %1181 = vrot.lane.b32.xlu1 %v2843_v17, %s2602_s3 }
 0x179   : > { %1221 = vrot.lane.b32.xlu0 %v2938_v33, %s2603_s18 }
 0x17a   : > { %v910_v19 = vpop.permute.xlu2 %909  ;;  %v822_v20 = vpop.permute.xlu1 %821 }
 0x17b   : > { %v3188_v22 = vpop.permute.xlu0 %789  ;;  %v830_v26 = vsel %vm3906_vm15, %v822_v20, %v3122_v52  ;;  %vm3909_vm15 = vcmask 1031168  }
 0x17c   : > { %v796_v28 = vsel %vm3911_vm14, %v788_v43, %v3188_v22  ;;  %846 = vmatpush.bf16.msra.mxu3 %v830_v26  ;;  %vm3924_vm14 = vcmask 900096  }
 0x17d   : > { %812 = vmatpush.bf16.msra.mxu2 %v796_v28 }
 0x17f   : > { %2235 = vmatmul.msk.bf16.vlgmr.msra.gmra.mxu3 %vm458_vm9, %v3276_v30 }
 0x180   : > { %1253 = vrot.lane.b32.xlu2 %v2862_v23, %s2604_s7  ;;  %1217 = vrot.lane.b32.xlu1 %v2954_v40, %s2603_s18  ;;  %v3213_v23 = vld [vmem:[%s3871_s1 + $0x10] sm:$0x3] }
 0x181   : > { %1215 = vrot.lane.b32.xlu0 %v2843_v17, %s2603_s18  ;;  %2232 = vmatmul.msk.bf16.vlgmr.msra.gmra.mxu0 %vm458_vm9, %v3213_v23 }
 0x182   : > { %v3202_v34 = vpop.permute.xlu2 %945  ;;  %v3204_v38 = vpop.permute.xlu1 %881  ;;  %2234 = vmatmul.msk.bf16.vlgmr.msra.gmra.mxu2 %vm458_vm9, %v3253_v7 }
 0x183   : > { %3968 = vst [vmem:[#allocation26_spill] sm:$0xff] %v3202_v34  ;;  %v880_v39 = vpop.permute.xlu0 %879 }
 0x184   : > { %v885_v43 = vsel %vm3907_vm13, %v880_v39, %v3204_v38 }
 0x185   : > { %v891_v44 = vsel %vm370_vm0, %v885_v43, 0 }
 0x186   : > { %899 = vmatpush.bf16.msrb.mxu1 %v891_v44 }
 0x188   : > { %1249 = vrot.lane.b32.xlu2 %v2843_v17, %s2604_s7  ;;  %1296 = vrot.lane.b32.xlu1 %v2938_v33, %s2583_s11 }
 0x189   : > { %1255 = vrot.lane.b32.xlu0 %v2938_v33, %s2604_s7 }
 0x18a   : > { %v1016_v46 = vpop.permute.xlu2 %1015  ;;  %v876_v49 = vpop.permute.xlu1 %875 }
 0x18b   : > { %v3223_v50 = vpop.permute.xlu0 %915  ;;  %v884_v51 = vsel %vm3907_vm13, %v876_v49, %v3161_v3  ;;  %vm3908_vm13 = vcmask 932864  }
 0x18c   : > { %v919_v54 = vsel %vm3909_vm15, %v914_v58, %v3223_v50  ;;  %900 = vmatpush.bf16.msrb.mxu1 %v884_v51  ;;  %v3296_v51 = vld [vmem:[%s3871_s1 + $0x18] sm:$0x3] }
 0x18d   : > { %v925_v17 = vsel %vm370_vm0, %v919_v54, 0 }
 0x18e   : > { %933 = vmatpush.bf16.msrb.mxu2 %v925_v17 }
 0x190   : > { %1294 = vrot.lane.b32.xlu2 %v2954_v40, %s2583_s11  ;;  %1322 = vrot.lane.b32.xlu1 %v2938_v33, %s2582_s27 }
 0x191   : > { %1251 = vrot.lane.b32.xlu0 %v2954_v40, %s2604_s7  ;;  %2236 = vmatmul.msk.bf16.vlgmr.msrb.gmra.mxu0 %vm458_vm9, %v3296_v51 }
 0x192   : > { %v3243_v58 = vpop.permute.xlu2 %979  ;;  %v3245_v59 = vpop.permute.xlu1 %949 }
 0x193   : > { %3969 = vst [vmem:[#allocation27_spill] sm:$0xff] %v3245_v59  ;;  %v948_v61 = vpop.permute.xlu0 %947 }
 0x194   : > { %v953_v0 = vsel %vm3908_vm13, %v948_v61, %v3245_v59  ;;  %v3307_v61 = vld [vmem:[%s3871_s1 + $0x1a] sm:$0x3] }
 0x195   : > { %v959_v1 = vsel %vm370_vm0, %v953_v0, 0  ;;  %3972 = vst [vmem:[#allocation30_spill] sm:$0xff] %v3307_v61  ;;  %2237 = vmatmul.msk.bf16.vlgmr.msrb.gmra.mxu1 %vm458_vm9, %v3307_v61 }
 0x196   : > { %967 = vmatpush.bf16.msrb.mxu3 %v959_v1 }
 0x198   : > { %1346 = vrot.lane.b32.xlu2 %v2954_v40, %s2585_s22  ;;  %1320 = vrot.lane.b32.xlu1 %v2954_v40, %s2582_s27  ;;  %s3995_s27 = smov 111  }
 0x199   : > { %1348 = vrot.lane.b32.xlu0 %v2938_v33, %s2585_s22 }
 0x19a   : > { %v1012_v9 = vpop.permute.xlu2 %1011  ;;  %v944_v10 = vpop.permute.xlu1 %943 }
 0x19b   : > { %v3263_v20 = vpop.permute.xlu0 %911  ;;  %v952_v26 = vsel %vm3908_vm13, %v944_v10, %v3202_v34  ;;  %vm3910_vm13 = vcmask 924672   ;;  %v3368_v34 = vld [vmem:[%s3871_s1 + $0x22] sm:$0x3] }
 0x19c   : > { %3970 = vst [vmem:[#allocation28_spill] sm:$0xff] %v3263_v20  ;;  %v918_v28 = vsel %vm3909_vm15, %v910_v19, %v3263_v20  ;;  %968 = vmatpush.bf16.msrb.mxu3 %v952_v26  ;;  %vm3916_vm15 = vcmask 916480  }
 0x19d   : > { %934 = vmatpush.bf16.msrb.mxu2 %v918_v28  ;;  %v3321_v28 = vld [vmem:[%s3871_s1 + $0x1c] sm:$0x3]  ;;  %3980 = vst [vmem:[#allocation38_spill] sm:$0xff] %v3368_v34 }
 0x19e   : > { %3974 = vst [vmem:[#allocation32_spill] sm:$0xff] %v3321_v28 }
 0x1a0   : > { %1372 = vrot.lane.b32.xlu2 %v2954_v40, %s2581_s5  ;;  %1400 = vrot.lane.b32.xlu1 %v2938_v33, %s2584_s8 }
 0x1a1   : > { %1374 = vrot.lane.b32.xlu0 %v2938_v33, %s2581_s5  ;;  %2238 = vmatmul.msk.bf16.vlgmr.msrb.gmra.mxu2 %vm458_vm9, %v3321_v28 }
 0x1a2   : > { %v3282_v19 = vpop.permute.xlu2 %1085  ;;  %v3284_v39 = vpop.permute.xlu1 %983 }
 0x1a3   : > { %3971 = vst [vmem:[#allocation29_spill] sm:$0xff] %v3282_v19  ;;  %v982_v43 = vpop.permute.xlu0 %981 }
 0x1a4   : > { %v987_v44 = vsel %vm3910_vm13, %v982_v43, %v3284_v39 }
 0x1a5   : > { %v993_v49 = vsel %vm370_vm0, %v987_v44, 0 }
 0x1a6   : > { %1001 = vmatpush.bf16.msra.mxu0 %v993_v49 }
 0x1a8   : > { %1452 = vrot.lane.b32.xlu2 %v2938_v33, %s2587_s12  ;;  %1398 = vrot.lane.b32.xlu1 %v2954_v40, %s2584_s8 }
 0x1a9   : > { %1426 = vrot.lane.b32.xlu0 %v2938_v33, %s2586_s26 }
 0x1aa   : > { %v3302_v54 = vpop.permute.xlu2 %1079  ;;  %v978_v17 = vpop.permute.xlu1 %977 }
 0x1ab   : > { %v3309_v0 = vpop.permute.xlu0 %1017  ;;  %v986_v1 = vsel %vm3910_vm13, %v978_v17, %v3243_v58  ;;  %vm1053_vm13 = vcmask 908288  }
 0x1ac   : > { %3973 = vst [vmem:[#allocation31_spill] sm:$0xff] %v3309_v0  ;;  %v1021_v10 = vsel %vm3916_vm15, %v1016_v46, %v3309_v0  ;;  %1002 = vmatpush.bf16.msra.mxu0 %v986_v1  ;;  %v3332_v46 = vld [vmem:[%s3871_s1 + $0x1e] sm:$0x3] }
 0x1ad   : > { %v1027_v26 = vsel %vm370_vm0, %v1021_v10, 0  ;;  %3975 = vst [vmem:[#allocation33_spill] sm:$0xff] %v3332_v46  ;;  %2239 = vmatmul.msk.bf16.vlgmr.msrb.gmra.mxu3 %vm458_vm9, %v3332_v46  ;;  %v3352_v10 = vld [vmem:[%s3871_s1 + $0x20] sm:$0x3] }
 0x1ae   : > { %1035 = vmatpush.bf16.msra.mxu1 %v1027_v26  ;;  %3978 = vst [vmem:[#allocation36_spill] sm:$0xff] %v3352_v10 }
 0x1af   : > { %2240 = vmatmul.msk.bf16.vlgmr.msra.gmra.mxu0 %vm458_vm9, %v3352_v10  ;;  %v3413_v10 = vld.sshfl [vmem:[#allocation1 + $0x18] sm:$0xff pattern:$0x73625140] }
 0x1b0   : > { %1478 = vrot.lane.b32.xlu2 %v2938_v33, %s2588_s17  ;;  %1450 = vrot.lane.b32.xlu1 %v2954_v40, %s2587_s12  ;;  %s3998_s12 = smov 110  }
 0x1b1   : > { %1424 = vrot.lane.b32.xlu0 %v2954_v40, %s2586_s26 }
 0x1b2   : > { %v3338_v43 = vpop.permute.xlu2 %1119  ;;  %v3340_v44 = vpop.permute.xlu1 %1051 }
 0x1b3   : > { %3976 = vst [vmem:[#allocation34_spill] sm:$0xff] %v3338_v43  ;;  %v1050_v49 = vpop.permute.xlu0 %1049 }
 0x1b4   : > { %3977 = vst [vmem:[#allocation35_spill] sm:$0xff] %v3340_v44  ;;  %v1055_v17 = vsel %vm1053_vm13, %v1050_v49, %v3340_v44 }
 0x1b5   : > { %v1061_v1 = vsel %vm370_vm0, %v1055_v17, 0 }
 0x1b6   : > { %1069 = vmatpush.bf16.msra.mxu2 %v1061_v1 }
 0x1b8   : > { %1530 = vrot.lane.b32.xlu2 %v2938_v33, %s2590_s9  ;;  %1476 = vrot.lane.b32.xlu1 %v2954_v40, %s2588_s17  ;;  %s3999_s17 = smov 98  }
 0x1b9   : > { %1504 = vrot.lane.b32.xlu0 %v2938_v33, %s2589_s10 }
 0x1ba   : > { %v1114_v26 = vpop.permute.xlu2 %1113  ;;  %v1084_v49 = vpop.permute.xlu1 %1083 }
 0x1bb   : > { %v3358_v17 = vpop.permute.xlu0 %1013  ;;  %v1089_v1 = vsel %vm3924_vm14, %v1084_v49, %v3282_v19  ;;  %v374_v19 = vsel %vm370_vm0, %v2830_v5, %v2832_v6 }
 0x1bc   : > { %3979 = vst [vmem:[#allocation37_spill] sm:$0xff] %v3358_v17  ;;  %v1095_v44 = vsel %vm370_vm0, %v1089_v1, 0  ;;  %v1020_v46 = vsel %vm3916_vm15, %v1012_v9, %v3358_v17  ;;  %v3387_v1 = vld [vmem:[%s3871_s1 + $0x24] sm:$0x3]  ;;  %vm1121_vm15 = vcmask 801792  }
 0x1bd   : > { %1036 = vmatpush.bf16.msra.mxu1 %v1020_v46  ;;  %1103 = vmatpush.bf16.msra.mxu3 %v1095_v44  ;;  %3983 = vst [vmem:[#allocation41_spill] sm:$0xff] %v3387_v1 }
 0x1c0   : > { %1528 = vrot.lane.b32.xlu2 %v2954_v40, %s2590_s9  ;;  %1556 = vrot.lane.b32.xlu1 %v2938_v33, %s2591_s6 }
 0x1c1   : > { %1502 = vrot.lane.b32.xlu0 %v2954_v40, %s2589_s10  ;;  %2241 = vmatmul.msk.bf16.vlgmr.msra.gmra.mxu1 %vm458_vm9, %v3368_v34  ;;  %v379_v34 = vsel %vm3922_vm1, %v374_v19, %v2838_v11  ;;  %v3418_v11 = vld [vmem:[%s3871_s1 + $0x26] sm:$0x3]  ;;  %vm3932_vm1 = vcmask 793600  }
 0x1c2   : > { %v3378_v9 = vpop.permute.xlu2 %1187  ;;  %v3380_v46 = vpop.permute.xlu1 %1047  ;;  %3985 = vst [vmem:[#allocation43_spill] sm:$0xff] %v3418_v11 }
 0x1c3   : > { %3981 = vst [vmem:[#allocation39_spill] sm:$0xff] %v3378_v9  ;;  %v1046_v44 = vpop.permute.xlu0 %1045 }
 0x1c4   : > { %3982 = vst [vmem:[#allocation40_spill] sm:$0xff] %v3380_v46  ;;  %v1054_v49 = vsel %vm1053_vm13, %v1046_v44, %v3380_v46  ;;  %v360_v46 = vld.sshfl [vmem:[#allocation1 + $0x30] sm:$0xff pattern:$0x73625140] }
 0x1c5   : > { %1070 = vmatpush.bf16.msra.mxu2 %v1054_v49 }
 0x1c8   : > { %1580 = vrot.lane.b32.xlu2 %v2954_v40, %s2592_s4  ;;  %1582 = vrot.lane.b32.xlu1 %v2938_v33, %s2592_s4  ;;  %s3988_s4 = smov 113  }
 0x1c9   : > { %1554 = vrot.lane.b32.xlu0 %v2954_v40, %s2591_s6  ;;  %2242 = vmatmul.msk.bf16.vlgmr.msra.gmra.mxu2 %vm458_vm9, %v3387_v1  ;;  %v3411_v1 = vsel %vm380_vm2, %v379_v34, %v360_v46  ;;  %vm1189_vm2 = vcmask 785408  }
 0x1ca   : > { %v1220_v44 = vpop.permute.xlu2 %1219  ;;  %v1118_v49 = vpop.permute.xlu1 %1117 }
 0x1cb   : > { %v3402_v5 = vpop.permute.xlu0 %1081  ;;  %v1123_v6 = vsel %vm1121_vm15, %v1118_v49, %v3338_v43 }
 0x1cc   : > { %3984 = vst [vmem:[#allocation42_spill] sm:$0xff] %v3402_v5  ;;  %v1129_v33 = vsel %vm370_vm0, %v1123_v6, 0  ;;  %v1088_v17 = vsel %vm3924_vm14, %v3302_v54, %v3402_v5  ;;  %vm1223_vm14 = vcmask 777216  }
 0x1cd   : > { %1104 = vmatpush.bf16.msra.mxu3 %v1088_v17  ;;  %1137 = vmatpush.bf16.msrb.mxu0 %v1129_v33 }
 0x1d0   : > { %1623 = vrot.lane.b32.xlu2 %v3411_v1, %s2594_s24  ;;  %1651 = vrot.lane.b32.xlu1 %v3413_v10, %s2593_s20 }
 0x1d1   : > { %1625 = vrot.lane.b32.xlu0 %v3413_v10, %s2594_s24  ;;  %2243 = vmatmul.msk.bf16.vlgmr.msra.gmra.mxu3 %vm458_vm9, %v3418_v11  ;;  %v3451_v11 = vld [vmem:[%s3871_s1 + $0x28] sm:$0x3] }
 0x1d2   : > { %v3428_v34 = vpop.permute.xlu2 %1183  ;;  %v3430_v19 = vpop.permute.xlu1 %1153  ;;  %3991 = vst [vmem:[#allocation47_spill] sm:$0xff] %v3451_v11 }
 0x1d3   : > { %3986 = vst [vmem:[#allocation44_spill] sm:$0xff] %v3428_v34  ;;  %v1152_v54 = vpop.permute.xlu0 %1151 }
 0x1d4   : > { %3987 = vst [vmem:[#allocation45_spill] sm:$0xff] %v3430_v19  ;;  %v1157_v17 = vsel %vm3932_vm1, %v1152_v54, %v3430_v19  ;;  %v3489_v19 = vld [vmem:[%s3871_s1 + $0x2c] sm:$0x3] }
 0x1d5   : > { %v1163_v46 = vsel %vm370_vm0, %v1157_v17, 0  ;;  %3997 = vst [vmem:[#allocation51_spill] sm:$0xff] %v3489_v19 }
 0x1d6   : > { %1171 = vmatpush.bf16.msrb.mxu1 %v1163_v46 }
 0x1d8   : > { %1703 = vrot.lane.b32.xlu2 %v3413_v10, %s3988_s4  ;;  %1677 = vrot.lane.b32.xlu1 %v3413_v10, %s3989_s14 }
 0x1d9   : > { %1649 = vrot.lane.b32.xlu0 %v3411_v1, %s2593_s20  ;;  %s3992_s20 = smov 112  }
 0x1da   : > { %v1254_v49 = vpop.permute.xlu2 %1253  ;;  %v1186_v6 = vpop.permute.xlu1 %1185 }
 0x1db   : > { %v3441_v33 = vpop.permute.xlu0 %1115  ;;  %v1191_v54 = vsel %vm1189_vm2, %v1186_v6, %v3378_v9  ;;  %v3532_v9 = vld [vmem:[%s3872_s2] sm:$0xff] }
 0x1dc   : > { %3990 = vst [vmem:[#allocation46_spill] sm:$0xff] %v3441_v33  ;;  %v1197_v17 = vsel %vm370_vm0, %v1191_v54, 0  ;;  %v1122_v46 = vsel %vm1121_vm15, %v1114_v26, %v3441_v33  ;;  %v478_v28 = vperm.slane %v3532_v9, 0  ;;  %v512_v61 = vperm.slane %v3532_v9, 1 }
 0x1dd   : > { %1138 = vmatpush.bf16.msrb.mxu0 %v1122_v46  ;;  %1205 = vmatpush.bf16.msrb.mxu2 %v1197_v17  ;;  %v3470_v46 = vld [vmem:[%s3871_s1 + $0x2a] sm:$0x3]  ;;  %v546_v20 = vperm.slane %v3532_v9, 2 }
 0x1de   : > { %3994 = vst [vmem:[#allocation49_spill] sm:$0xff] %v3470_v46 }
 0x1e0   : > { %1701 = vrot.lane.b32.xlu2 %v3411_v1, %s3988_s4  ;;  %1729 = vrot.lane.b32.xlu1 %v3413_v10, %s3992_s20 }
 0x1e1   : > { %1675 = vrot.lane.b32.xlu0 %v3411_v1, %s3989_s14  ;;  %2244 = vmatmul.msk.bf16.vlgmr.msrb.gmra.mxu0 %vm458_vm9, %v3451_v11 }
 0x1e2   : > { %v3461_v26 = vpop.permute.xlu2 %1249  ;;  %v3463_v6 = vpop.permute.xlu1 %1149 }
 0x1e3   : > { %3993 = vst [vmem:[#allocation48_spill] sm:$0xff] %v3463_v6  ;;  %v1148_v54 = vpop.permute.xlu0 %1147 }
 0x1e4   : > { %v1156_v17 = vsel %vm3932_vm1, %v1148_v54, %v3463_v6  ;;  %vm1257_vm1 = vcmask 769024  }
 0x1e5   : > { %1172 = vmatpush.bf16.msrb.mxu1 %v1156_v17 }
 0x1e8   : > { %1753 = vrot.lane.b32.xlu2 %v3411_v1, %s3995_s27  ;;  %1727 = vrot.lane.b32.xlu1 %v3411_v1, %s3992_s20 }
 0x1e9   : > { %1755 = vrot.lane.b32.xlu0 %v3413_v10, %s3995_s27  ;;  %2245 = vmatmul.msk.bf16.vlgmr.msrb.gmra.mxu1 %vm458_vm9, %v3470_v46  ;;  %v508_v46 = vpop.f32.mrf.mxu1 }
 0x1ea   : > { %v1295_v54 = vpop.permute.xlu2 %1294  ;;  %v1182_v17 = vpop.permute.xlu1 %1181 }
 0x1eb   : > { %v3480_v6 = vpop.permute.xlu0 %1221  ;;  %v1190_v11 = vsel %vm1189_vm2, %v1182_v17, %v3428_v34 }
 0x1ec   : > { %3996 = vst [vmem:[#allocation50_spill] sm:$0xff] %v3480_v6  ;;  %v1225_v33 = vsel %vm1223_vm14, %v1220_v44, %v3480_v6  ;;  %1206 = vmatpush.bf16.msrb.mxu2 %v1190_v11 }
 0x1ed   : > { %v1231_v5 = vsel %vm370_vm0, %v1225_v33, 0  ;;  %v3509_v33 = vld [vmem:[%s3871_s1 + $0x2e] sm:$0x3] }
 0x1ee   : > { %1239 = vmatpush.bf16.msrb.mxu3 %v1231_v5  ;;  %4001 = vst [vmem:[#allocation53_spill] sm:$0xff] %v3509_v33 }
 0x1ef   : > { %2246 = vmatmul.msk.bf16.vlgmr.msrb.gmra.mxu2 %vm458_vm9, %v3489_v19  ;;  %v474_v19 = vpop.f32.mrf.mxu0 }
 0x1f0   : > { %1779 = vrot.lane.b32.xlu2 %v3411_v1, %s3998_s12  ;;  %1807 = vrot.lane.b32.xlu1 %v3413_v10, %s3999_s17 }
 0x1f1   : > { %1781 = vrot.lane.b32.xlu0 %v3413_v10, %s3998_s12 }
 0x1f2   : > { %v3500_v44 = vpop.permute.xlu2 %1346  ;;  %v3502_v11 = vpop.permute.xlu1 %1217 }
 0x1f3   : > { %4000 = vst [vmem:[#allocation52_spill] sm:$0xff] %v3502_v11  ;;  %v1216_v17 = vpop.permute.xlu0 %1215 }
 0x1f4   : > { %v1224_v5 = vsel %vm1223_vm14, %v1216_v17, %v3502_v11 }
 0x1f5   : > { %1240 = vmatpush.bf16.msrb.mxu3 %v1224_v5 }
 0x1f7   : > { %v476_v0 = vpop.f32.mrf.mxu0 }
 0x1f8   : > { %2247 = vmatmul.msk.bf16.vlgmr.msrb.gmra.mxu3 %vm458_vm9, %v3509_v33  ;;  %1859 = vrot.lane.b32.xlu2 %v3413_v10, %s2602_s3 }
 0x1f9   : > { %1833 = vrot.lane.b32.xlu0 %v3413_v10, %s2601_s15  ;;  %1805 = vrot.lane.b32.xlu1 %v3411_v1, %s3999_s17 }
 0x1fa   : > { %v3519_v17 = vpop.permute.xlu2 %1372  ;;  %v1297_v5 = vpop.permute.xlu1 %1296 }
 0x1fb   : > { %v3521_v11 = vpop.permute.xlu0 %1255  ;;  %v1299_v34 = vsel %vm454_vm3, %v2962_v42, %v1297_v5  ;;  %v510_v42 = vpop.f32.mrf.mxu1 }
 0x1fc   : > { %4002 = vst [vmem:[#allocation54_spill] sm:$0xff] %v3521_v11  ;;  %v1259_v33 = vsel %vm1257_vm1, %v1254_v49, %v3521_v11  ;;  %v1302_v6 = vsel %vm370_vm0, %v1299_v34, 0  ;;  %v479_v34 = vmul.f32 %v478_v28, %v474_v19  ;;  %v513_v49 = vmul.f32 %v512_v61, %v508_v46  ;;  %v542_v11 = vpop.f32.mrf.mxu2  ;;  %v576_v28 = vpop.f32.mrf.mxu3  ;;  %v3556_v61 = vld [vmem:[%s3871_s1 + $0x30] sm:$0x3] }
 0x1fd   : > { %v1265_v43 = vsel %vm370_vm0, %v1259_v33, 0  ;;  %1310 = vmatpush.bf16.msra.mxu1 %v1302_v6  ;;  %v547_v19 = vmul.f32 %v546_v20, %v542_v11 }
 0x1fe   : > { %1273 = vmatpush.bf16.msra.mxu0 %v1265_v43  ;;  %v1298_v43 = vsel %vm454_vm3, %v2925_v29, %v1295_v54  ;;  %v514_v42 = vadd.f32 %v513_v49, %v479_v34  ;;  %v580_v54 = vperm.slane %v3532_v9, 3  ;;  %vm4003_vm3 = vcmask 121856  }
 0x200   : > { %1885 = vrot.lane.b32.xlu2 %v3413_v10, %s2603_s18  ;;  %v548_v46 = vadd.f32 %v547_v19, %v514_v42  ;;  %v581_v49 = vmul.f32 %v580_v54, %v576_v28  ;;  %v648_v42 = vperm.slane %v3532_v9, 5  ;;  %v1350_v28 = vsel %vm523_vm5, %v2936_v32, %v3500_v44 }
 0x201   : > { %1831 = vrot.lane.b32.xlu0 %v3411_v1, %s2601_s15  ;;  %1857 = vrot.lane.b32.xlu1 %v3411_v1, %s2602_s3  ;;  %v682_v44 = vperm.slane %v3532_v9, 6 }
 0x202   : > { %1311 = vmatpush.bf16.msra.mxu1 %v1298_v43  ;;  %v1453_v0 = vpop.permute.xlu2 %1452  ;;  %v1323_v6 = vpop.permute.xlu1 %1322 }
 0x203   : > { %v3544_v33 = vpop.permute.xlu0 %1251  ;;  %v1325_v5 = vsel %vm489_vm4, %v2977_v48, %v1323_v6  ;;  %v610_v48 = vpop.f32.mrf.mxu0  ;;  %v1455_v19 = vsel %vm659_vm11, %v3065_v21, %v1453_v0 }
 0x204   : > { %v1328_v59 = vsel %vm370_vm0, %v1325_v5, 0  ;;  %v1258_v29 = vsel %vm1257_vm1, %v3461_v26, %v3544_v33  ;;  %v644_v26 = vpop.f32.mrf.mxu1  ;;  %v544_v43 = vpop.f32.mrf.mxu2  ;;  %v582_v5 = vadd.f32 %v581_v49, %v548_v46  ;;  %v1458_v46 = vsel %vm370_vm0, %v1455_v19, 0 }
 0x205   : > { %1274 = vmatpush.bf16.msra.mxu0 %v1258_v29  ;;  %1336 = vmatpush.bf16.msra.mxu2 %v1328_v59  ;;  %v578_v6 = vpop.f32.mrf.mxu3 }
 0x206   : > { %2249 = vmatmul.msk.bf16.vlgmr.msra.gmra.mxu1 %vm458_vm9, %v3035_v12 }
 0x208   : > { %2248 = vmatmul.msk.bf16.vlgmr.msra.gmra.mxu0 %vm458_vm9, %v3556_v61  ;;  %1909 = vrot.lane.b32.xlu2 %v3411_v1, %s2604_s7 }
 0x209   : > { %1911 = vrot.lane.b32.xlu0 %v3413_v10, %s2604_s7  ;;  %1883 = vrot.lane.b32.xlu1 %v3411_v1, %s2603_s18  ;;  %v614_v1 = vperm.slane %v3532_v9, 4 }
 0x20a   : > { %v1479_v59 = vpop.permute.xlu2 %1478  ;;  %v1321_v20 = vpop.permute.xlu1 %1320 }
 0x20b   : > { %v1349_v12 = vpop.permute.xlu0 %1348  ;;  %v1324_v11 = vsel %vm489_vm4, %v2904_v24, %v1321_v20  ;;  %v612_v29 = vpop.f32.mrf.mxu0  ;;  %v615_v24 = vmul.f32 %v614_v1, %v610_v48  ;;  %vm4004_vm4 = vcmask 15360  }
 0x20c   : > { %v1351_v34 = vsel %vm523_vm5, %v2949_v35, %v1349_v12  ;;  %1337 = vmatpush.bf16.msra.mxu2 %v1324_v11  ;;  %v649_v35 = vmul.f32 %v648_v42, %v644_v26  ;;  %v646_v20 = vpop.f32.mrf.mxu1  ;;  %v678_v0 = vpop.f32.mrf.mxu2  ;;  %vm4005_vm5 = vmmov %vm4003_vm3 }
 0x20d   : > { %v1354_v10 = vsel %vm370_vm0, %v1351_v34, 0  ;;  %v616_v11 = vadd.f32 %v615_v24, %v582_v5  ;;  %v712_v34 = vpop.f32.mrf.mxu3  ;;  %v683_v6 = vmul.f32 %v682_v44, %v678_v0  ;;  %v3610_v20 = vld [vmem:[%s3872_s2 + $0x10] sm:$0xff] }
 0x20e   : > { %1362 = vmatpush.bf16.msra.mxu3 %v1354_v10 }
 0x20f   : > { %2250 = vmatmul.msk.bf16.vlgmr.msra.gmra.mxu2 %vm458_vm9, %v3049_v14  ;;  %v650_v26 = vadd.f32 %v649_v35, %v616_v11 }
 0x211   : > { %v684_v5 = vadd.f32 %v683_v6, %v650_v26 }
 0x212   : > { %1363 = vmatpush.bf16.msra.mxu3 %v1350_v28  ;;  %v1531_v54 = vpop.permute.xlu2 %1530  ;;  %v1401_v12 = vpop.permute.xlu1 %1400 }
 0x213   : > { %v1375_v43 = vpop.permute.xlu0 %1374  ;;  %v1403_v21 = vsel %vm591_vm7, %v3013_v63, %v1401_v12  ;;  %v746_v49 = vpop.f32.mrf.mxu0  ;;  %v1481_v63 = vsel %vm693_vm10, %v3011_v62, %v1479_v59  ;;  %v716_v62 = vperm.slane %v3532_v9, 7 }
 0x214   : > { %v1377_v14 = vsel %vm557_vm6, %v2992_v55, %v1375_v43  ;;  %v1406_v48 = vsel %vm370_vm0, %v1403_v21, 0  ;;  %v780_v10 = vpop.f32.mrf.mxu1  ;;  %v1376_v55 = vsel %vm557_vm6, %v2921_v27, %v3519_v17  ;;  %v1484_v1 = vsel %vm370_vm0, %v1481_v63, 0  ;;  %v680_v24 = vpop.f32.mrf.mxu2 }
 0x215   : > { %v1380_v32 = vsel %vm370_vm0, %v1377_v14, 0  ;;  %1414 = vmatpush.bf16.msrb.mxu1 %v1406_v48  ;;  %2251 = vmatmul.msk.bf16.vlgmr.msra.gmra.mxu3 %vm458_vm9, %v3077_v31  ;;  %v714_v35 = vpop.f32.mrf.mxu3  ;;  %v717_v17 = vmul.f32 %v716_v62, %v712_v34  ;;  %v906_v24 = vperm.slane %v3610_v20, 5  ;;  %vm4006_vm6 = vcmask 924672  }
 0x216   : > { %1466 = vmatpush.bf16.msrb.mxu3 %v1458_v46  ;;  %1388 = vmatpush.bf16.msrb.mxu0 %v1380_v32  ;;  %v784_v46 = vperm.slane %v3610_v20, 1 }
 0x218   : > { %v785_v0 = vmul.f32 %v784_v46, %v780_v10 }
 0x21a   : > { %1389 = vmatpush.bf16.msrb.mxu0 %v1376_v55  ;;  %v1529_v42 = vpop.permute.xlu2 %1528  ;;  %v1399_v29 = vpop.permute.xlu1 %1398 }
 0x21b   : > { %v1427_v31 = vpop.permute.xlu0 %1426  ;;  %v1402_v19 = vsel %vm591_vm7, %v2910_v25, %v1399_v29  ;;  %v750_v25 = vperm.slane %v3610_v20, 0  ;;  %v748_v9 = vpop.f32.mrf.mxu0  ;;  %vm4007_vm7 = vcmask 7168  }
 0x21c   : > { %v1429_v59 = vsel %vm625_vm8, %v2975_v47, %v1427_v31  ;;  %1415 = vmatpush.bf16.msrb.mxu1 %v1402_v19  ;;  %v718_v47 = vadd.f32 %v717_v17, %v684_v5  ;;  %v782_v12 = vpop.f32.mrf.mxu1  ;;  %v814_v26 = vpop.f32.mrf.mxu2 }
 0x21d   : > { %v1432_v27 = vsel %vm370_vm0, %v1429_v59, 0  ;;  %2252 = vmatmul.msk.bf16.vlgmr.msrb.gmra.mxu0 %vm458_vm9, %v3098_v41  ;;  %v751_v28 = vmul.f32 %v750_v25, %v746_v49  ;;  %v1533_v41 = vsel %vm761_vm12, %v3053_v15, %v1531_v54  ;;  %v848_v32 = vpop.f32.mrf.mxu3  ;;  %v818_v15 = vperm.slane %v3610_v20, 2  ;;  %v2409_v25 = vld.sshfl [vmem:[#allocation1 + $0x10] sm:$0xff pattern:$0x73625140] }
 0x21e   : > { %1492 = vmatpush.bf16.msra.mxu0 %v1484_v1  ;;  %1440 = vmatpush.bf16.msrb.mxu2 %v1432_v27  ;;  %v1536_v44 = vsel %vm370_vm0, %v1533_v41, 0  ;;  %v1606_v9 = vsel %vm370_vm0, %v2409_v25, 0 }
 0x21f   : > { %2253 = vmatmul.msk.bf16.vlgmr.msrb.gmra.mxu1 %vm458_vm9, %v3171_v13  ;;  %v752_v21 = vadd.f32 %v751_v28, %v718_v47  ;;  %v819_v49 = vmul.f32 %v818_v15, %v814_v26 }
 0x221   : > { %v786_v34 = vadd.f32 %v785_v0, %v752_v21 }
 0x222   : > { %v3618_v11 = vpop.permute.xlu2 %1580  ;;  %v1451_v43 = vpop.permute.xlu1 %1450 }
 0x223   : > { %v1425_v14 = vpop.permute.xlu0 %1424  ;;  %v1454_v48 = vsel %vm659_vm11, %v3055_v16, %v1451_v43  ;;  %v869_v54 = vpop.f32.mrf.mxu0  ;;  %v820_v63 = vadd.f32 %v819_v49, %v786_v34  ;;  %vm4010_vm11 = vmmov %vm4007_vm7 }
 0x224   : > { %v1428_v13 = vsel %vm625_vm8, %v3027_v8, %v1425_v14  ;;  %1467 = vmatpush.bf16.msrb.mxu3 %v1454_v48  ;;  %v902_v16 = vpop.f32.mrf.mxu1  ;;  %v1532_v8 = vsel %vm761_vm12, %v3089_v36, %v1529_v42  ;;  %v816_v1 = vpop.f32.mrf.mxu2  ;;  %vm4008_vm8 = vmmov %vm4004_vm4  ;;  %vm4011_vm12 = vcmask 1031168  }
 0x225   : > { %1441 = vmatpush.bf16.msrb.mxu2 %v1428_v13  ;;  %v907_v27 = vmul.f32 %v906_v24, %v902_v16  ;;  %v4016_v16 = vld [vmem:[#allocation28_spill] sm:$0xff] }
 0x227   : > { %2255 = vmatmul.msk.bf16.vlgmr.msrb.gmra.mxu3 %vm458_vm9, %v3151_v2  ;;  %v852_v2 = vperm.slane %v3610_v20, 3 }
 0x228   : > { %2254 = vmatmul.msk.bf16.vlgmr.msrb.gmra.mxu2 %vm458_vm9, %v3131_v57  ;;  %v850_v57 = vpop.f32.mrf.mxu3 }
 0x229   : > { %1544 = vmatpush.bf16.msra.mxu2 %v1536_v44  ;;  %v853_v36 = vmul.f32 %v852_v2, %v848_v32 }
 0x22a   : > { %v3632_v6 = vpop.permute.xlu2 %1623  ;;  %v1477_v10 = vpop.permute.xlu1 %1476 }
 0x22b   : > { %v1505_v55 = vpop.permute.xlu0 %1504  ;;  %v1480_v5 = vsel %vm693_vm10, %v3091_v37, %v1477_v10  ;;  %v871_v42 = vpop.f32.mrf.mxu0  ;;  %v854_v19 = vadd.f32 %v853_v36, %v820_v63  ;;  %vm4009_vm10 = vmmov %vm4006_vm6  ;;  %v4018_v10 = vld [vmem:[#allocation30_spill] sm:$0xff] }
 0x22c   : > { %v1507_v29 = vsel %vm4003_vm3, %v3108_v45, %v1505_v55  ;;  %1493 = vmatpush.bf16.msra.mxu0 %v1480_v5  ;;  %v904_v37 = vpop.f32.mrf.mxu1  ;;  %v3646_v47 = vpop.f32.mrf.mxu2  ;;  %vm4012_vm3 = vcmask 1039360   ;;  %v4020_v5 = vld [vmem:[#allocation31_spill] sm:$0xff]  ;;  %v4024_v42 = vld [vmem:[#allocation33_spill] sm:$0xff] }
 0x22d   : > { %1545 = vmatpush.bf16.msra.mxu2 %v1532_v8  ;;  %v1510_v31 = vsel %vm370_vm0, %v1507_v29, 0  ;;  %v873_v62 = vadd.f32 %v869_v54, %v854_v19  ;;  %v4014_v54 = vld [vmem:[#allocation27_spill] sm:$0xff]  ;;  %v4022_v29 = vld [vmem:[#allocation26_spill] sm:$0xff]  ;;  %v4025_v19 = vld [vmem:[#allocation36_spill] sm:$0xff] }
 0x22e   : > { %1518 = vmatpush.bf16.msra.mxu1 %v1510_v31 }
 0x22f   : > { %2256 = vmatmul.msk.bf16.vlgmr.msra.gmra.mxu0 %vm458_vm9, %v3176_v18  ;;  %v3651_v46 = vadd.f32 %v907_v27, %v873_v62  ;;  %v4028_v27 = vld [vmem:[#allocation35_spill] sm:$0xff] }
 0x230   : > { %v3653_v12 = vpop.f32.mrf.mxu3 }
 0x232   : > { %v1704_v59 = vpop.permute.xlu2 %1703  ;;  %v1557_v35 = vpop.permute.xlu1 %1556 }
 0x233   : > { %v1503_v17 = vpop.permute.xlu0 %1502  ;;  %v1559_v45 = vsel %vm4004_vm4, %v3141_v60, %v1557_v35  ;;  %v3655_v41 = vpop.f32.mrf.mxu0  ;;  %v1706_v60 = vsel %vm4006_vm6, %v3284_v39, %v1704_v59  ;;  %vm4013_vm4 = vmmov %vm4012_vm3  ;;  %v4026_v59 = vld [vmem:[#allocation37_spill] sm:$0xff] }
 0x234   : > { %v1562_v28 = vsel %vm370_vm0, %v1559_v45, 0  ;;  %v1506_v18 = vsel %vm4005_vm5, %v3124_v53, %v1503_v17  ;;  %v1709_v53 = vsel %vm370_vm0, %v1706_v60, 0  ;;  %v938_v48 = vpop.f32.mrf.mxu2  ;;  %vm4015_vm5 = vcmask 932864   ;;  %vm4017_vm6 = vmmov %vm4011_vm12 }
 0x235   : > { %1519 = vmatpush.bf16.msra.mxu1 %v1506_v18  ;;  %1570 = vmatpush.bf16.msra.mxu3 %v1562_v28  ;;  %v4029_v18 = vld [vmem:[#allocation39_spill] sm:$0xff]  ;;  %v974_v48 = vperm.slane %v3610_v20, 7 }
 0x238   : > { %2258 = vmatmul.msk.bf16.vlgmr.msra.gmra.mxu2 %vm458_vm9, %v3233_v56  ;;  %2257 = vmatmul.msk.bf16.vlgmr.msra.gmra.mxu1 %vm458_vm9, %v3213_v23  ;;  %v972_v26 = vpop.f32.mrf.mxu3 }
 0x239   : > { %1614 = vmatpush.bf16.msrb.mxu1 %v1606_v9  ;;  %v940_v9 = vperm.slane %v3610_v20, 6 }
 0x23a   : > { %v1702_v43 = vpop.permute.xlu2 %1701  ;;  %v1583_v21 = vpop.permute.xlu1 %1582 }
 0x23b   : > { %v1555_v0 = vpop.permute.xlu0 %1554  ;;  %v1585_v14 = vsel %vm4007_vm7, %v3163_v4, %v1583_v21  ;;  %v1705_v23 = vsel %vm4009_vm10, %v3243_v58, %v1702_v43  ;;  %v1006_v13 = vpop.f32.mrf.mxu0  ;;  %v1584_v4 = vsel %vm4010_vm11, %v3122_v52, %v3618_v11  ;;  %vm4021_vm7 = vcmask 916480   ;;  %v4031_v43 = vld [vmem:[#allocation40_spill] sm:$0xff] }
 0x23c   : > { %v1588_v39 = vsel %vm370_vm0, %v1585_v14, 0  ;;  %v1558_v56 = vsel %vm4008_vm8, %v3188_v22, %v1555_v0  ;;  %vm4023_vm8 = vmmov %vm4015_vm5  ;;  %v941_v14 = vmul.f32 %v940_v9, %v3646_v47  ;;  %v4047_v9 = vld [vmem:[#allocation49_spill] sm:$0xff] }
 0x23d   : > { %1615 = vmatpush.bf16.msrb.mxu1 %v2954_v40  ;;  %1571 = vmatpush.bf16.msra.mxu3 %v1558_v56  ;;  %vm4027_vm10 = vmmov %vm4021_vm7  ;;  %v3732_v56 = vld [vmem:[%s3872_s2 + $0x20] sm:$0xff] }
 0x23e   : > { %1596 = vmatpush.bf16.msrb.mxu0 %v1588_v39  ;;  %v3672_v40 = vpop.f32.mrf.mxu1 }
 0x240   : > { %2259 = vmatmul.msk.bf16.vlgmr.msra.gmra.mxu3 %vm458_vm9, %v3253_v7 }
 0x241   : > { %1717 = vmatpush.bf16.msra.mxu1 %v1709_v53  ;;  %v4030_v53 = vld [vmem:[#allocation38_spill] sm:$0xff] }
 0x242   : > { %1597 = vmatpush.bf16.msrb.mxu0 %v1584_v4  ;;  %v1652_v34 = vpop.permute.xlu1 %1651  ;;  %v1754_v15 = vpop.permute.xlu2 %1753 }
 0x243   : > { %v1626_v22 = vpop.permute.xlu0 %1625  ;;  %v1654_v32 = vsel %vm4011_vm12, %v3223_v50, %v1652_v34  ;;  %v1627_v50 = vsel %vm4013_vm4, %v3161_v3, %v3632_v6  ;;  %v4019_v3 = vld [vmem:[#allocation32_spill] sm:$0xff]  ;;  %v1757_v21 = vsel %vm1053_vm13, %v4031_v43, %v1754_v15  ;;  %v4033_v34 = vld [vmem:[#allocation29_spill] sm:$0xff]  ;;  %vm4040_vm12 = vcmask 793600  }
 0x244   : > { %v1628_v58 = vsel %vm4012_vm3, %v3204_v38, %v1626_v22  ;;  %v1657_v44 = vsel %vm370_vm0, %v1654_v32, 0  ;;  %v4035_v32 = vld [vmem:[#allocation41_spill] sm:$0xff] }
 0x245   : > { %1718 = vmatpush.bf16.msra.mxu1 %v1705_v23  ;;  %2260 = vmatmul.msk.bf16.vlgmr.msrb.gmra.mxu0 %vm458_vm9, %v3276_v30  ;;  %v1631_v7 = vsel %vm370_vm0, %v1628_v58, 0  ;;  %v4032_v23 = vld [vmem:[#allocation34_spill] sm:$0xff]  ;;  %v942_v58 = vadd.f32 %v941_v14, %v3651_v46  ;;  %v1042_v46 = vperm.slane %v3732_v56, 1  ;;  %v1212_v14 = vperm.slane %v3732_v56, 6 }
 0x246   : > { %1665 = vmatpush.bf16.msrb.mxu3 %v1657_v44  ;;  %1639 = vmatpush.bf16.msrb.mxu2 %v1631_v7  ;;  %v1040_v52 = vpop.f32.mrf.mxu1  ;;  %v975_v44 = vmul.f32 %v974_v48, %v3653_v12  ;;  %v1008_v7 = vperm.slane %v3732_v56, 0  ;;  %v4049_v48 = vld [vmem:[#allocation54_spill] sm:$0xff] }
 0x248   : > { %2261 = vmatmul.msk.bf16.vlgmr.msrb.gmra.mxu1 %vm458_vm9, %v3296_v51 }
 0x24a   : > { %1640 = vmatpush.bf16.msrb.mxu2 %v1627_v50  ;;  %v1678_v38 = vpop.permute.xlu1 %1677  ;;  %v1780_v51 = vpop.permute.xlu2 %1779  ;;  %v4036_v50 = vld [vmem:[#allocation50_spill] sm:$0xff] }
 0x24b   : > { %v1650_v11 = vpop.permute.xlu0 %1649  ;;  %v1680_v49 = vsel %vm4015_vm5, %v4014_v54, %v1678_v38 }
 0x24c   : > { %v1683_v30 = vsel %vm370_vm0, %v1680_v49, 0  ;;  %v1653_v8 = vsel %vm4017_vm6, %v4016_v16, %v1650_v11  ;;  %v3697_v63 = vpop.f32.mrf.mxu2  ;;  %v4037_v11 = vld [vmem:[#allocation42_spill] sm:$0xff]  ;;  %v1009_v16 = vmul.f32 %v1008_v7, %v3655_v41  ;;  %v1043_v41 = vmul.f32 %v1042_v46, %v3672_v40 }
 0x24d   : > { %2262 = vmatmul.msk.bf16.vlgmr.msrb.gmra.mxu2 %vm458_vm9, %v4018_v10  ;;  %1666 = vmatpush.bf16.msrb.mxu3 %v1653_v8  ;;  %v4039_v10 = vld [vmem:[#allocation45_spill] sm:$0xff]  ;;  %v2407_v7 = vld [vmem:[%s3872_s2 + $0x30] ss:$0 sm:$0xff] }
 0x24e   : > { %1691 = vmatpush.bf16.msra.mxu0 %v1683_v30  ;;  %v976_v30 = vadd.f32 %v975_v44, %v942_v58 }
 0x250   : > { %2263 = vmatmul.msk.bf16.vlgmr.msrb.gmra.mxu3 %vm458_vm9, %v4019_v3 }
 0x252   : > { %v1730_v6 = vpop.permute.xlu1 %1729  ;;  %v1860_v24 = vpop.permute.xlu2 %1859 }
 0x253   : > { %v1676_v55 = vpop.permute.xlu0 %1675  ;;  %v1732_v1 = vsel %vm4021_vm7, %v4020_v5, %v1730_v6  ;;  %v1862_v60 = vsel %vm1189_vm2, %v4029_v18, %v1860_v24  ;;  %v4041_v6 = vld [vmem:[#allocation46_spill] sm:$0xff] }
 0x254   : > { %v1735_v2 = vsel %vm370_vm0, %v1732_v1, 0  ;;  %v1679_v57 = vsel %vm4023_vm8, %v4022_v29, %v1676_v55  ;;  %v1074_v31 = vpop.f32.mrf.mxu2  ;;  %v3708_v36 = vpop.f32.mrf.mxu3  ;;  %v1865_v0 = vsel %vm370_vm0, %v1862_v60, 0  ;;  %v1010_v1 = vadd.f32 %v1009_v16, %v976_v30  ;;  %v437_v16 = vld [vmem:[%s3872_s2 + $0x8] sm:$0xff] }
 0x255   : > { %1692 = vmatpush.bf16.msra.mxu0 %v1679_v57  ;;  %1743 = vmatpush.bf16.msra.mxu2 %v1735_v2  ;;  %v1076_v2 = vperm.slane %v3732_v56, 2  ;;  %v4043_v57 = vld [vmem:[#allocation47_spill] sm:$0xff] }
 0x256   : > { %v1044_v31 = vadd.f32 %v1043_v41, %v1010_v1 }
 0x258   : > { %2264 = vmatmul.msk.bf16.vlgmr.msra.gmra.mxu0 %vm458_vm9, %v4024_v42  ;;  %2265 = vmatmul.msk.bf16.vlgmr.msra.gmra.mxu1 %vm458_vm9, %v4025_v19  ;;  %v1077_v42 = vmul.f32 %v1076_v2, %v3697_v63  ;;  %v1110_v19 = vperm.slane %v3732_v56, 3  ;;  %v4048_v63 = vld [vmem:[#allocation51_spill] sm:$0xff] }
 0x25a   : > { %v1728_v37 = vpop.permute.xlu1 %1727  ;;  %v1886_v4 = vpop.permute.xlu2 %1885 }
 0x25b   : > { %v1756_v62 = vpop.permute.xlu0 %1755  ;;  %v1731_v35 = vsel %vm4027_vm10, %v4026_v59, %v1728_v37  ;;  %v1888_v38 = vsel %vm1223_vm14, %v4036_v50, %v1886_v4  ;;  %v4044_v59 = vld [vmem:[#allocation48_spill] sm:$0xff] }
 0x25c   : > { %v1758_v17 = vsel %vm1053_vm13, %v4028_v27, %v1756_v62  ;;  %1744 = vmatpush.bf16.msra.mxu2 %v1731_v35  ;;  %v1108_v45 = vpop.f32.mrf.mxu3  ;;  %vm4034_vm13 = vcmask 900096   ;;  %v1891_v49 = vsel %vm370_vm0, %v1888_v38, 0  ;;  %v4046_v27 = vld [vmem:[#allocation44_spill] sm:$0xff] }
 0x25d   : > { %v1761_v25 = vsel %vm370_vm0, %v1758_v17, 0  ;;  %vm4038_vm11 = vmmov %vm4034_vm13  ;;  %v1078_v17 = vadd.f32 %v1077_v42, %v1044_v31  ;;  %v1111_v45 = vmul.f32 %v1110_v19, %v3708_v36 }
 0x25e   : > { %1769 = vmatpush.bf16.msra.mxu3 %v1761_v25  ;;  %v1140_v28 = vpop.f32.mrf.mxu0  ;;  %v1783_v54 = vsel %vm4038_vm11, %v4037_v11, %v1780_v51  ;;  %v4042_v51 = vld [vmem:[#allocation43_spill] sm:$0xff]  ;;  %v1144_v25 = vperm.slane %v3732_v56, 4 }
 0x25f   : > { %2266 = vmatmul.msk.bf16.vlgmr.msra.gmra.mxu2 %vm458_vm9, %v4030_v53  ;;  %v1112_v18 = vadd.f32 %v1111_v45, %v1078_v17  ;;  %v1178_v53 = vperm.slane %v3732_v56, 5  ;;  %v1395_v45 = vperm.slane %v437_v16, 3 }
 0x260   : > { %v1145_v60 = vmul.f32 %v1144_v25, %v1140_v28  ;;  %v1246_v28 = vperm.slane %v3732_v56, 7 }
 0x262   : > { %1770 = vmatpush.bf16.msra.mxu3 %v1757_v21  ;;  %v1808_v39 = vpop.permute.xlu1 %1807  ;;  %v1910_v4 = vpop.permute.xlu2 %1909 }
 0x263   : > { %v1782_v26 = vpop.permute.xlu0 %1781  ;;  %v1810_v13 = vsel %vm1121_vm15, %v4032_v23, %v1808_v39  ;;  %v4050_v23 = vld [vmem:[#allocation52_spill] sm:$0xff] }
 0x264   : > { %v1784_v22 = vsel %vm4034_vm13, %v4033_v34, %v1782_v26  ;;  %v1813_v47 = vsel %vm370_vm0, %v1810_v13, 0  ;;  %v1146_v34 = vadd.f32 %v1145_v60, %v1112_v18  ;;  %v1421_v18 = vperm.slane %v437_v16, 4 }
 0x265   : > { %v1787_v20 = vsel %vm370_vm0, %v1784_v22, 0  ;;  %2267 = vmatmul.msk.bf16.vlgmr.msra.gmra.mxu3 %vm458_vm9, %v4035_v32  ;;  %1821 = vmatpush.bf16.msrb.mxu1 %v1813_v47  ;;  %v1913_v32 = vsel %vm1257_vm1, %v3544_v33, %v1910_v4 }
 0x266   : > { %1873 = vmatpush.bf16.msrb.mxu3 %v1865_v0  ;;  %1795 = vmatpush.bf16.msrb.mxu0 %v1787_v20  ;;  %v1174_v15 = vpop.f32.mrf.mxu1  ;;  %v1142_v52 = vpop.f32.mrf.mxu0  ;;  %v4051_v20 = vld [vmem:[#allocation53_spill] sm:$0xff] }
 0x267   : > { %v1179_v22 = vmul.f32 %v1178_v53, %v1174_v15 }
 0x269   : > { %v1180_v58 = vadd.f32 %v1179_v22, %v1146_v34 }
 0x26a   : > { %1796 = vmatpush.bf16.msrb.mxu0 %v1783_v54 }
 0x26b   : > { %v1834_v12 = vpop.permute.xlu0 %1833  ;;  %v1806_v8 = vpop.permute.xlu1 %1805 }
 0x26c   : > { %v1836_v3 = vsel %vm4040_vm12, %v4039_v10, %v1834_v12  ;;  %v1809_v55 = vsel %vm1121_vm15, %v4041_v6, %v1806_v8  ;;  %vm4045_vm15 = vmmov %vm4040_vm12  ;;  %v1317_v8 = vperm.slane %v437_v16, 0 }
 0x26d   : > { %v1839_v5 = vsel %vm370_vm0, %v1836_v3, 0  ;;  %2268 = vmatmul.msk.bf16.vlgmr.msrb.gmra.mxu0 %vm458_vm9, %v4042_v51  ;;  %1822 = vmatpush.bf16.msrb.mxu1 %v1809_v55 }
 0x26e   : > { %1899 = vmatpush.bf16.msra.mxu0 %v1891_v49  ;;  %1847 = vmatpush.bf16.msrb.mxu2 %v1839_v5  ;;  %v1176_v29 = vpop.f32.mrf.mxu1 }
 0x270   : > { %2269 = vmatmul.msk.bf16.vlgmr.msrb.gmra.mxu1 %vm458_vm9, %v4043_v57 }
 0x272   : > { %v1208_v24 = vpop.f32.mrf.mxu2 }
 0x273   : > { %v1832_v37 = vpop.permute.xlu0 %1831  ;;  %v1858_v62 = vpop.permute.xlu1 %1857  ;;  %v1213_v47 = vmul.f32 %v1212_v14, %v1208_v24  ;;  %v1447_v14 = vperm.slane %v437_v16, 5 }
 0x274   : > { %v1835_v35 = vsel %vm4045_vm15, %v4044_v59, %v1832_v37  ;;  %v1861_v40 = vsel %vm1189_vm2, %v4046_v27, %v1858_v62  ;;  %v1369_v27 = vperm.slane %v437_v16, 2 }
 0x275   : > { %1848 = vmatpush.bf16.msrb.mxu2 %v1835_v35  ;;  %1874 = vmatpush.bf16.msrb.mxu3 %v1861_v40  ;;  %v1214_v56 = vadd.f32 %v1213_v47, %v1180_v58 }
 0x278   : > { %2270 = vmatmul.msk.bf16.vlgmr.msrb.gmra.mxu2 %vm458_vm9, %v4047_v9  ;;  %2271 = vmatmul.msk.bf16.vlgmr.msrb.gmra.mxu3 %vm458_vm9, %v4048_v63 }
 0x27a   : > { %v1210_v43 = vpop.f32.mrf.mxu2 }
 0x27b   : > { %v1912_v21 = vpop.permute.xlu0 %1911  ;;  %v1242_v0 = vpop.f32.mrf.mxu3 }
 0x27c   : > { %v1914_v36 = vsel %vm1257_vm1, %v4049_v48, %v1912_v21  ;;  %v1884_v39 = vpop.permute.xlu1 %1883  ;;  %v1247_v44 = vmul.f32 %v1246_v28, %v1242_v0  ;;  %v1499_v28 = vperm.slane %v437_v16, 7 }
 0x27d   : > { %v1917_v26 = vsel %vm370_vm0, %v1914_v36, 0  ;;  %v1887_v13 = vsel %vm1223_vm14, %v4050_v23, %v1884_v39  ;;  %vm4052_vm0 = vcmask 1043456  }
 0x27e   : > { %1900 = vmatpush.bf16.msra.mxu0 %v1887_v13  ;;  %1925 = vmatpush.bf16.msra.mxu1 %v1917_v26  ;;  %v1248_v38 = vadd.f32 %v1247_v44, %v1214_v56  ;;  %vm4053_vm1 = vmmov %vm4052_vm0  ;;  %v1473_v26 = vperm.slane %v437_v16, 6  ;;  %v439_v13 = vld [vmem:[%s3872_s2 + $0x18] sm:$0xff] }
 0x27f   : > { %v1551_v44 = vperm.slane %v439_v13, 1  ;;  %vm4055_vm14 = vmmov %vm4052_vm0 }
 0x281   : > { %2272 = vmatmul.msk.bf16.vlgmr.msra.gmra.mxu0 %vm458_vm9, %v4051_v20  ;;  %v1525_v20 = vperm.slane %v439_v13, 0 }
 0x282   : > { %1926 = vmatpush.bf16.msra.mxu1 %v1913_v32 }
 0x283   : > { %v1313_v15 = vpop.f32.mrf.mxu1  ;;  %v1244_v52 = vpop.f32.mrf.mxu3 }
 0x284   : > { %v1318_v3 = vmul.f32 %v1317_v8, %v1313_v15  ;;  %v1577_v52 = vperm.slane %v439_v13, 2 }
 0x285   : > { %v1276_v50 = vpop.f32.mrf.mxu0  ;;  %2273 = vmatmul.msk.bf16.vlgmr.msra.gmra.mxu1 %vm458_vm9, %v3556_v61  ;;  %v1343_v61 = vperm.slane %v437_v16, 1  ;;  %vm4054_vm9 = vmmov %vm4052_vm0 }
 0x286   : > { %v1281_v11 = vmul.f32 %v2407_v7, %v1276_v50 }
 0x288   : > { %v1282_v54 = vadd.f32 %v1281_v11, %v1248_v38 }
 0x28a   : > { %v1283_v49 = vpack.c.bf16 %v1282_v54, %v1282_v54  ;;  %v1285_v33 = vsel %vm4052_vm0, %v1282_v54, 0.0  ;;  %v1289_v30 = vmul.f32 %v1282_v54, %v1282_v54 }
 0x28b   : > { %1286 = vadd.xlane.f32.xlu0 %v1285_v33  ;;  %v1315_v46 = vpop.f32.mrf.mxu1 }
 0x28c   : > { %1284 = vst [vmem:[%s2822_s30] sm:$0x3] %v1283_v49  ;;  %v1290_v12 = vsel %vm4053_vm1, %v1289_v30, 0.0  ;;  %v1603_v30 = vperm.slane %v439_v13, 3 }
 0x28d   : > { %1291 = vadd.xlane.f32.xlu1 %v1290_v12  ;;  %v1278_v10 = vpop.f32.mrf.mxu0 }
 0x292   : > { %v1339_v6 = vpop.f32.mrf.mxu2 }
 0x293   : > { %v1344_v55 = vmul.f32 %v1343_v61, %v1339_v6  ;;  %v1646_v61 = vperm.slane %v439_v13, 5 }
 0x295   : > { %v1345_v5 = vadd.f32 %v1344_v55, %v1318_v3 }
 0x298   : > { %v1365_v51 = vpop.f32.mrf.mxu3 }
 0x299   : > { %v1370_v17 = vmul.f32 %v1369_v27, %v1365_v51  ;;  %v1672_v51 = vperm.slane %v439_v13, 6 }
 0x29a   : > { %v1341_v1 = vpop.f32.mrf.mxu2  ;;  %v1391_v41 = vpop.f32.mrf.mxu0 }
 0x29b   : > { %v1371_v9 = vadd.f32 %v1370_v17, %v1345_v5  ;;  %v1396_v63 = vmul.f32 %v1395_v45, %v1391_v41 }
 0x29c   : > { %v1417_v2 = vpop.f32.mrf.mxu1 }
 0x29d   : > { %v1397_v21 = vadd.f32 %v1396_v63, %v1371_v9  ;;  %v1422_v0 = vmul.f32 %v1421_v18, %v1417_v2 }
 0x29f   : > { %v1423_v36 = vadd.f32 %v1422_v0, %v1397_v21 }
 0x2a0   : > { %v1367_v29 = vpop.f32.mrf.mxu3 }
 0x2a2   : > { %v1393_v57 = vpop.f32.mrf.mxu0 }
 0x2a3   : > { %v1698_v57 = vperm.slane %v439_v13, 7 }
 0x2a4   : > { %v1419_v31 = vpop.f32.mrf.mxu1 }
 0x2a5   : > { %v441_v31 = vld [vmem:[%s3872_s2 + $0x28] sm:$0xff] }
 0x2a6   : > { %v1776_v17 = vperm.slane %v441_v31, 2  ;;  %v1802_v18 = vperm.slane %v441_v31, 3 }
 0x2aa   : > { %v1469_v42 = vpop.f32.mrf.mxu3 }
 0x2ab   : > { %v1443_v19 = vpop.f32.mrf.mxu2  ;;  %v1474_v22 = vmul.f32 %v1473_v26, %v1469_v42  ;;  %v1854_v26 = vperm.slane %v441_v31, 5 }
 0x2ac   : > { %v1495_v24 = vpop.f32.mrf.mxu0  ;;  %v1448_v39 = vmul.f32 %v1447_v14, %v1443_v19  ;;  %v1828_v14 = vperm.slane %v441_v31, 4 }
 0x2ad   : > { %v1500_v58 = vmul.f32 %v1499_v28, %v1495_v24  ;;  %v1724_v24 = vperm.slane %v441_v31, 0 }
 0x2ae   : > { %v1449_v34 = vadd.f32 %v1448_v39, %v1423_v36 }
 0x2b0   : > { %v1475_v32 = vadd.f32 %v1474_v22, %v1449_v34  ;;  %v1906_v34 = vperm.slane %v441_v31, 7 }
 0x2b2   : > { %v1471_v37 = vpop.f32.mrf.mxu3  ;;  %v1501_v50 = vadd.f32 %v1500_v58, %v1475_v32 }
 0x2b3   : > { %v1445_v62 = vpop.f32.mrf.mxu2 }
 0x2b4   : > { %v1497_v59 = vpop.f32.mrf.mxu0  ;;  %v1750_v62 = vperm.slane %v441_v31, 1 }
 0x2b5   : > { %v1521_v35 = vpop.f32.mrf.mxu1 }
 0x2b6   : > { %v1526_v15 = vmul.f32 %v1525_v20, %v1521_v35 }
 0x2b8   : > { %v1527_v49 = vadd.f32 %v1526_v15, %v1501_v50 }
 0x2bb   : > { %v1547_v40 = vpop.f32.mrf.mxu2 }
 0x2bc   : > { %v1552_v38 = vmul.f32 %v1551_v44, %v1547_v40  ;;  %v2408_v44 = vld [vmem:[%s3872_s2 + $0x38] ss:$0 sm:$0xff] }
 0x2bd   : > { %v1523_v25 = vpop.f32.mrf.mxu1 }
 0x2be   : > { %v1553_v46 = vadd.f32 %v1552_v38, %v1527_v49 }
 0x2c2   : > { %v1599_v60 = vpop.f32.mrf.mxu0 }
 0x2c3   : > { %v1573_v53 = vpop.f32.mrf.mxu3  ;;  %v1549_v43 = vpop.f32.mrf.mxu2  ;;  %v1604_v16 = vmul.f32 %v1603_v30, %v1599_v60 }
 0x2c4   : > { %v1578_v33 = vmul.f32 %v1577_v52, %v1573_v53 }
 0x2c5   : > { %v1617_v48 = vpop.f32.mrf.mxu1 }
 0x2c6   : > { %v1579_v8 = vadd.f32 %v1578_v33, %v1553_v46 }
 0x2c8   : > { %v1605_v55 = vadd.f32 %v1604_v16, %v1579_v8 }
 0x2ca   : > { %v1601_v23 = vpop.f32.mrf.mxu0  ;;  %v1621_v1 = vadd.f32 %v1617_v48, %v1605_v55 }
 0x2cb   : > { %v1575_v4 = vpop.f32.mrf.mxu3  ;;  %v1880_v23 = vperm.slane %v441_v31, 6 }
 0x2cd   : > { %v1619_v47 = vpop.f32.mrf.mxu1 }
 0x2d0   : > { %v1642_v7 = vpop.f32.mrf.mxu2 }
 0x2d1   : > { %v1647_v5 = vmul.f32 %v1646_v61, %v1642_v7 }
 0x2d3   : > { %v1668_v56 = vpop.f32.mrf.mxu3  ;;  %v1648_v2 = vadd.f32 %v1647_v5, %v1621_v1 }
 0x2d4   : > { %v1673_v29 = vmul.f32 %v1672_v51, %v1668_v56 }
 0x2d5   : > { %v1694_v11 = vpop.f32.mrf.mxu0  ;;  %v1720_v54 = vpop.f32.mrf.mxu1 }
 0x2d6   : > { %v1674_v42 = vadd.f32 %v1673_v29, %v1648_v2  ;;  %v1699_v19 = vmul.f32 %v1698_v57, %v1694_v11  ;;  %v1725_v40 = vmul.f32 %v1724_v24, %v1720_v54 }
 0x2d8   : > { %v1644_v12 = vpop.f32.mrf.mxu2  ;;  %v1700_v27 = vadd.f32 %v1699_v19, %v1674_v42 }
 0x2da   : > { %v1726_v9 = vadd.f32 %v1725_v40, %v1700_v27 }
 0x2db   : > { %v1670_v10 = vpop.f32.mrf.mxu3 }
 0x2dd   : > { %v1696_v3 = vpop.f32.mrf.mxu0  ;;  %v1722_v6 = vpop.f32.mrf.mxu1 }
 0x2e2   : > { %v1746_v41 = vpop.f32.mrf.mxu2 }
 0x2e3   : > { %v1751_v25 = vmul.f32 %v1750_v62, %v1746_v41 }
 0x2e5   : > { %v1752_v53 = vadd.f32 %v1751_v25, %v1726_v9 }
 0x2e8   : > { %v1772_v37 = vpop.f32.mrf.mxu3 }
 0x2e9   : > { %v1777_v63 = vmul.f32 %v1776_v17, %v1772_v37 }
 0x2ea   : > { %v1798_v59 = vpop.f32.mrf.mxu0  ;;  %v1748_v35 = vpop.f32.mrf.mxu2 }
 0x2eb   : > { %v1778_v21 = vadd.f32 %v1777_v63, %v1752_v53  ;;  %v1803_v0 = vmul.f32 %v1802_v18, %v1798_v59 }
 0x2ed   : > { %v1824_v45 = vpop.f32.mrf.mxu1  ;;  %v1804_v36 = vadd.f32 %v1803_v0, %v1778_v21 }
 0x2ee   : > { %v1829_v39 = vmul.f32 %v1828_v14, %v1824_v45 }
 0x2f0   : > { %v1774_v60 = vpop.f32.mrf.mxu3  ;;  %v1830_v22 = vadd.f32 %v1829_v39, %v1804_v36 }
 0x2f2   : > { %v1800_v43 = vpop.f32.mrf.mxu0 }
 0x2f5   : > { %v1826_v48 = vpop.f32.mrf.mxu1 }
 0x2fb   : > { %v1850_v13 = vpop.f32.mrf.mxu2  ;;  %v1876_v4 = vpop.f32.mrf.mxu3 }
 0x2fc   : > { %v1855_v28 = vmul.f32 %v1854_v26, %v1850_v13  ;;  %v1881_v47 = vmul.f32 %v1880_v23, %v1876_v4 }
 0x2fe   : > { %v1856_v20 = vadd.f32 %v1855_v28, %v1830_v22  ;;  %v1902_v32 = vpop.f32.mrf.mxu0  ;;  %v1287_v8 = vpop.xlane.xlu0 %1286 }
 0x2ff   : > { %v1907_v58 = vmul.f32 %v1906_v34, %v1902_v32 }
 0x300   : > { %v1882_v7 = vadd.f32 %v1881_v47, %v1856_v20  ;;  %v1292_v61 = vpop.xlane.xlu1 %1291 }
 0x302   : > { %v1908_v15 = vadd.f32 %v1907_v58, %v1882_v7  ;;  %v1928_v52 = vpop.f32.mrf.mxu1 }
 0x303   : > { %v1933_v56 = vmul.f32 %v2408_v44, %v1928_v52  ;;  %v1852_v50 = vpop.f32.mrf.mxu2  ;;  %v1878_v38 = vpop.f32.mrf.mxu3 }
 0x305   : > { %v1934_v11 = vadd.f32 %v1933_v56, %v1908_v15 }
 0x306   : > { %v1904_v54 = vpop.f32.mrf.mxu0 }
 0x307   : > { %v1935_v49 = vpack.c.bf16 %v1934_v11, %v1934_v11  ;;  %v1937_v33 = vsel %vm4054_vm9, %v1934_v11, 0.0  ;;  %v1941_v46 = vmul.f32 %v1934_v11, %v1934_v11 }
 0x308   : > { %1938 = vadd.xlane.f32.xlu2 %v1937_v33 }
 0x309   : > { %1936 = vst [vmem:[%s2822_s30 + $0x2] sm:$0x3] %v1935_v49  ;;  %v1942_v12 = vsel %vm4055_vm14, %v1941_v46, 0.0 }
 0x30a   : > { %v1930_v30 = vpop.f32.mrf.mxu1 }
 0x310   : > { %1943 = vadd.xlane.f32.xlu2 %v1942_v12 }
 0x37b   : > { %v1939_v16 = vpop.xlane.xlu2 %1938 }
 0x37c   : > { %v1940_v10 = vadd.f32 %v1939_v16, %v1287_v8 }
 0x380   : > { %1948 = sbr.rel (%p4056_p9) target bundleno = 904 (0x388), region = 48 }
 0x383   : > { %v1944_v3 = vpop.xlane.xlu2 %1943 }
 0x384   : > { %v1945_v6 = vadd.f32 %v1944_v3, %v1292_v61 }
 0x385   : > { %vm1949_vm2 = vcmask 3072   ;;  %v2605_v55 = vmov 0.0  }
 0x386   : > { %1950 = vst.msk [vmem:[%s2741_s29] sm:$0xf] %vm1949_vm2, %v2605_v55 }
 0x387   : > { %1951 = vst.msk [vmem:[%s2746_s25] sm:$0xf] %vm1949_vm2, %v2605_v55 }
 0x388 PF: > { %vm1954_vm3 = vcmask 3072   ;;  %s2277_s21 = sshll.u32 %s2734_s13, 1  ;;  %s2278_s5 = sshll.u32 %s2562_s23, 3 }
 0x389   : > { %s1989_s22 = sadd.s32 %s2278_s5, %s2277_s21  ;;  %s1993_s9 = sshll.u32 %s2822_s30, 4  ;;  %s1994_s9 = int_to_ptr.vmem [resolvable:$true] %s1993_s9 }
 0x38a   : > { %s2279_s10 = sshll.u32 %s1989_s22, 1  ;;  %s4058_s18 = sld [smem:[#allocation55_spill]] }
 0x38b   : > { %s4060_s14 = sand.u32 1, %s2546_s19  }
 0x38c   : > { %s1960_s24 = scalar_lea.sflag [#allocation5], %s4060_s14 }
 0x38d   : > { %v1952_v5 = vld [vmem:[%s2741_s29] sm:$0xf] }
 0x38e   : > { %v1956_v51 = vld [vmem:[%s2746_s25] sm:$0xf]  ;;  %v1953_v1 = vadd.f32 %v1952_v5, %v1940_v10 }
 0x38f   : > { %v1957_v41 = vadd.f32 %v1956_v51, %v1945_v6 }
 0x390   : > { %1955 = vst.msk [vmem:[%s2741_s29] sm:$0xf] %vm1954_vm3, %v1953_v1  ;;  %s4059_s7 = smov %s4058_s18  ;;  %s1991_s6 = scalar_lea.hbm %s4058_s18, %s2279_s10 }
 0x391   : > { %1958 = vst.msk [vmem:[%s2746_s25] sm:$0xf] %vm1954_vm3, %v1957_v41  ;;  %s1995_s4 = sshll.u32 %s1991_s6, 4  ;;  %s2486_s25 = scalar_lea.hbm %s4059_s7, 32  ;;  %s1996_s4 = int_to_ptr.hbm [resolvable:$true] %s1995_s4 }
 0x392   : > { %s2480_s16 = sshra.s32 %s1996_s4, 4  ;;  %s2481_s16 = int_to_ptr.hbm [resolvable:$true] %s2480_s16 }
 0x393   : > { %s2482_s20 = scalar_lea.hbm %s2481_s16, 4  ;;  %p2487_p12 = scmp.lt.s32.totalorder %s2481_s16, %s4059_s7 }
 0x394   : > { %p2483_p3 = scmp.ne.s32.totalorder %s2481_s16, %s2482_s20  ;;  %p2488_p13 = scmp.lt.s32.totalorder %s2486_s25, %s2482_s20 }
 0x396   : > { %p2484_p10 = pnand %p2483_p3, %p2704_p6  ;;  %p2489_p0 = por %p2488_p13, %p2487_p12 }
 0x398   : > { %p2485_p11 = pneg %p2484_p10 }
 0x39a   : > { %p2490_p1 = pnand %p2489_p0, %p2485_p11 }
 0x39c   : > { %2493 = shalt.err (!%p2490_p1)
}
 0x39d   : > { %2293 = dma.vmem_to_hbm [thread:$0]  (%p2704_p6), %s1994_s9, 64, %s1996_s4, %s1960_s24  }
 0x39e PF: > { %s4061_s8 = sld [smem:[#allocation19_spill]] }
 0x39f   : > { %s4062_s28 = sld [smem:[#allocation14_spill]] }
 0x3a0   : > { %s4063_s27 = sld [smem:[#allocation23_spill]] }
 0x3a4   : > { %p2301_p4 = scmp.ge.s32.totalorder %s4061_s8, 2 }
 0x3a5   : > { %s2013_s11 = sand.u32 1, %s4062_s28  }
 0x3a6   : > { %p4064_p5 = scmp.ne.s32.totalorder %s4063_s27, 0  ;;  %s2014_s26 = scalar_lea.sflag [#allocation5], %s2013_s11 }
 0x3a8   : > { %p2296_p7 = pnand %p2301_p4, %p4064_p5 }
 0x3aa   : > { %p2297_p8 = pneg %p2296_p7 }
 0x3ac   : > { %2537 = dma.done.wait (%p2297_p8), %s2014_s26, 64  }
 0x3ad   : > { %2539 = vsyncadd (%p2297_p8), %s2014_s26, 4294967232  ;;  %s19_s27 = sadd.s32 1, %s4061_s8   ;;  %s4065_s12 = sld [smem:[#allocation15_spill]] }
 0x3ae   : > { %p16_p2 = scmp.ge.s32.totalorder %s19_s27, 10   ;;  %s4066_s20 = sld [smem:[#allocation25_spill]] }
 0x3af   : > { %s4067_s21 = sld [smem:[#allocation16_spill]]  ;;  %s4073_s18 = smov %s2546_s19 }
 0x3b0   : > { %s4068_s22 = sld [smem:[#allocation17_spill]]  ;;  %18 = sbr.rel (!%p16_p2) target bundleno = 10 (0xa), region = 143 }
 0x3b1   : > { %s4069_s23 = sld [smem:[#allocation18_spill]] }
 0x3b2   : > { %s4070_s24 = sld [smem:[#allocation20_spill]] }
 0x3b3   : > { %s4071_s25 = sld [smem:[#allocation21_spill]]  ;;  %s4074_s19 = smov %s4065_s12 }
 0x3b4   : > { %s4072_s26 = sld [smem:[#allocation24_spill]] }
 0x3b5   :  { %2042 = vsyncpa [#allocation5], 1 }
 0x3b6   :  { %2044 = vsyncpa [#allocation5 + $0x1], 1 }
 0x3b7   :  { %2045 = vsyncmov [#allocation3] }
 0x3ba   :  { %s2046_s17 = vpop.sfrf %2045 }
 0x3bb   :  { %p2282_p6 = scmp.ne.s32.totalorder %s2046_s17, 0 }
 0x3bd   :  { %2050 = shalt.err (%p2282_p6)  }
 0x3be   :  { %2052 = vsyncmov [#allocation3 + $0x1] }
 0x3c1   :  { %s2053_s5 = vpop.sfrf %2052 }
 0x3c2   :  { %p2283_p9 = scmp.ne.s32.totalorder %s2053_s5, 0 }
 0x3c4   :  { %2057 = shalt.err (%p2283_p9)  }

</bundles_post_ra>
